<compile_context>
chip_gen: v7x
topology: tpu7x:2x2x1
jax: 0.10.0
libtpu: 0.0.40
codegen_flags: <defaults>
</compile_context>

<pallas_src>
import jax
import jax.numpy as jnp
from jax.experimental import pallas as pl
from jax.experimental.pallas import tpu as pltpu

VISION_DIM = 1024
TEXT_DIM = 768
PROJ_DIM = 512
NUM_CLASSES = 25  # task == 'phenotyping'


def _head_kernel(img0_ref, img1_ref, txt_ref, wp_ref, wc_ref, bc_ref, out_ref):
    """img*_ref: [bt, HW, 1024] bf16 (channel-last, spatial axis is sublanes)
       txt_ref : [bt, 768]
       wp_ref  : [2816, 512] bf16 (1/HW already folded into the vision rows)
       wc_ref  : [512, 128] bf16 (zero-padded classifier), bc_ref: [1, 128] f32
    """
    wdt = wp_ref.dtype

    # Spatial pooling: sublane (axis=-2) reduce with f32 accumulation.  The
    # 1/HW mean scale is pre-folded into wp's vision rows, so a sum suffices.
    pooled0 = jnp.sum(img0_ref[...].astype(jnp.float32), axis=-2).astype(wdt)
    pooled1 = jnp.sum(img1_ref[...].astype(jnp.float32), axis=-2).astype(wdt)
    txt = txt_ref[...].astype(wdt)

    # Projection (bias-free): three accumulating dots against static row-slices
    # of the resident weight (starts 0 / 1024 / 2048 are 16-row bf16 tile
    # aligned -> cheap views, no concat temp).  f32 accumulation on the MXU.
    proj = jnp.dot(pooled0, wp_ref[:VISION_DIM, :],
                   preferred_element_type=jnp.float32)
    proj += jnp.dot(pooled1, wp_ref[VISION_DIM:2 * VISION_DIM, :],
                    preferred_element_type=jnp.float32)
    proj += jnp.dot(txt, wp_ref[2 * VISION_DIM:, :],
                    preferred_element_type=jnp.float32)

    act = jnp.tanh(proj)                                           # [bt, 512] f32

    logits = (jnp.dot(act.astype(wc_ref.dtype), wc_ref[...],
                      preferred_element_type=jnp.float32)
              + bc_ref[...])                                       # [bt, 128]
    out_ref[...] = logits.astype(out_ref.dtype)


def _choose_tiling(batch):
    """Per-generation batch tile + VMEM limit.  Aims for >=2 grid steps
    (>=4 on v7x) when the batch allows, keeping bt a multiple of 8 sublanes
    (or == batch) so 2-D text/output tiles satisfy the (8, 128) rule."""
    try:
        kind = jax.devices()[0].device_kind.lower()
    except Exception:  # pragma: no cover
        kind = ""
    if "v5" in kind:
        bt_cap, vmem_bytes, min_steps = 64, 96 << 20, 2   # 128 MiB physical
    elif "v6" in kind:
        bt_cap, vmem_bytes, min_steps = 64, 64 << 20, 2   # 128 MiB physical
    else:  # v7x (64 MiB VMEM / TC, 2 TCs) and unknown -> conservative
        bt_cap, vmem_bytes, min_steps = 32, 48 << 20, 4

    bt = min(bt_cap, max(8, -(-batch // min_steps)))      # cdiv
    bt = min(bt, batch)
    if bt < batch:
        bt = max(8, (bt // 8) * 8)
        bt = min(bt, batch)
    return max(1, bt), vmem_bytes


def multimodal_conv_head(img_feat0_nchw, img_feat1_nchw, text_cls,
                         w_proj, w_cls, b_cls, *, block_b=None):
    """img_feat*_nchw: [B, 1024, H, W]  (PyTorch conv layout, backbone dtype)
       text_cls:       [B, 768]
       w_proj:         [2*1024 + 768, 512]   (x @ w_proj convention)
       w_cls:          [512, num_classes], b_cls: [num_classes]
    """
    B, C, H, W = img_feat0_nchw.shape
    assert C == VISION_DIM
    HW = H * W
    num_classes = w_cls.shape[1]
    nc_pad = max(128, -(-num_classes // 128) * 128)

    # Channel-last features [B, HW, C]: lane dim becomes C=1024.
    # TODO(synk): in production have the backbone emit NHWC directly (JAX convs
    # are NHWC-native) so this transpose fuses at the backbone output.
    img0 = jnp.transpose(img_feat0_nchw, (0, 2, 3, 1)).reshape(B, HW, C)
    img1 = jnp.transpose(img_feat1_nchw, (0, 2, 3, 1)).reshape(B, HW, C)

    # Weight prep (done once at load time in production):
    #  - fold the 1/HW mean scale into the vision rows of w_proj,
    #  - cast projection / classifier weights to bf16 for the MXU,
    #  - zero-pad the classifier to 128 output lanes (lane-dense stores).
    inv_hw = jnp.float32(1.0 / HW)
    wp = jnp.concatenate(
        [w_proj[:2 * VISION_DIM] * inv_hw, w_proj[2 * VISION_DIM:]],
        axis=0).astype(jnp.bfloat16)                               # [2816, 512]
    wc = jnp.zeros((PROJ_DIM, nc_pad), jnp.bfloat16)
    wc = wc.at[:, :num_classes].set(w_cls.astype(jnp.bfloat16))    # [512, 128]
    bc = jnp.zeros((1, nc_pad), jnp.float32)
    bc = bc.at[0, :num_classes].set(b_cls.astype(jnp.float32))     # [1, 128]

    if block_b is None:
        bt, vmem_bytes = _choose_tiling(B)
    else:
        bt, vmem_bytes = min(block_b, B), 64 << 20
    grid = (pl.cdiv(B, bt),)

    grid_spec = pltpu.PrefetchScalarGridSpec(
        num_scalar_prefetch=0,
        grid=grid,
        in_specs=[
            pl.BlockSpec((bt, HW, C), lambda b: (b, 0, 0)),        # img0 tile
            pl.BlockSpec((bt, HW, C), lambda b: (b, 0, 0)),        # img1 tile
            pl.BlockSpec((bt, TEXT_DIM), lambda b: (b, 0)),        # text tile
            pl.BlockSpec(wp.shape, lambda b: (0, 0)),              # weights:
            pl.BlockSpec(wc.shape, lambda b: (0, 0)),              #  constant index
            pl.BlockSpec(bc.shape, lambda b: (0, 0)),              #  -> VMEM-resident
        ],
        out_specs=pl.BlockSpec((bt, nc_pad), lambda b: (b, 0)),
    )
    # Note: if VMEM gets tight at larger bt on v7x, the constant-index weight
    # specs could be single-buffered (pipeline_mode=pl.Buffered(1)); not needed
    # at the budgets above.

    out_padded = pl.pallas_call(
        _head_kernel,
        out_shape=jax.ShapeDtypeStruct((B, nc_pad), jnp.float32),
        grid_spec=grid_spec,
        compiler_params=pltpu.CompilerParams(
            dimension_semantics=("parallel",),   # batch splits over v7x's 2 TCs
            vmem_limit_bytes=vmem_bytes,
        ),
    )(img0, img1, text_cls, wp, wc, bc)

    return out_padded[:, :num_classes]


def reference(img_feat0_nchw, img_feat1_nchw, text_cls, w_proj, w_cls, b_cls):
    p0 = jnp.mean(img_feat0_nchw.astype(jnp.float32), axis=(2, 3))
    p1 = jnp.mean(img_feat1_nchw.astype(jnp.float32), axis=(2, 3))
    vl = jnp.concatenate([p0, p1, text_cls.astype(jnp.float32)], axis=1)
    act = jnp.tanh(vl @ w_proj)
    return act @ w_cls + b_cls


if __name__ == "__main__":
    key = jax.random.PRNGKey(0)
    k_img0, k_img1, k_txt, k_wp, k_wc, k_bc = jax.random.split(key, 6)

    B, H, W = 2, 7, 7  # convnext_base final feature map for 224x224 input
    # Backbone features in their native bf16.
    img_feat0 = jax.random.normal(k_img0, (B, VISION_DIM, H, W), jnp.bfloat16)
    img_feat1 = jax.random.normal(k_img1, (B, VISION_DIM, H, W), jnp.bfloat16)
    text_cls = jax.random.normal(k_txt, (B, TEXT_DIM), jnp.bfloat16)

    proj_in_dim = 2 * VISION_DIM + TEXT_DIM
    w_proj = jax.random.normal(k_wp, (proj_in_dim, PROJ_DIM), jnp.float32) * 0.02
    w_cls = jax.random.normal(k_wc, (PROJ_DIM, NUM_CLASSES), jnp.float32) * 0.02
    b_cls = jax.random.normal(k_bc, (NUM_CLASSES,), jnp.float32) * 0.02

    logits = multimodal_conv_head(img_feat0, img_feat1, text_cls,
                                  w_proj, w_cls, b_cls)
    logits = jax.block_until_ready(logits)

    ref = reference(img_feat0, img_feat1, text_cls, w_proj, w_cls, b_cls)
    assert logits.shape == (B, NUM_CLASSES)
    # bf16 weights/features vs f32 reference: errors ~1e-3 on ~0.2-scale logits.
    assert jnp.allclose(logits, ref, atol=2e-2, rtol=2e-2)
    print("KERNEL_OK")
</pallas_src>

<mosaic_0001>
module attributes {stable_mosaic.version = 11 : i64} {
  func.func @_head_kernel(%arg0: i32, %arg1: memref<2x49x1024xbf16, #tpu.memory_space<vmem>>, %arg2: memref<2x49x1024xbf16, #tpu.memory_space<vmem>>, %arg3: memref<2x768xbf16, #tpu.memory_space<vmem>>, %arg4: memref<2816x512xbf16, #tpu.memory_space<vmem>>, %arg5: memref<512x128xbf16, #tpu.memory_space<vmem>>, %arg6: memref<1x128xf32, #tpu.memory_space<vmem>>, %arg7: memref<2x128xf32, #tpu.memory_space<vmem>>) attributes {dimension_semantics = [#tpu.dimension_semantics<parallel>], iteration_bounds = array<i64: 1>, scalar_prefetch = 0 : i64, scratch_operands = 0 : i64, tpu.core_type = #tpu.core_type<tc>, window_params = [{transform_indices = @transform_0, window_bounds = array<i64: 2, 49, 1024>}, {transform_indices = @transform_1, window_bounds = array<i64: 2, 49, 1024>}, {transform_indices = @transform_2, window_bounds = array<i64: 2, 768>}, {pipeline_mode = #tpu.pipeline_mode<synchronous>, transform_indices = @transform_3, window_bounds = array<i64: 2816, 512>}, {pipeline_mode = #tpu.pipeline_mode<synchronous>, transform_indices = @transform_4, window_bounds = array<i64: 512, 128>}, {pipeline_mode = #tpu.pipeline_mode<synchronous>, transform_indices = @transform_5, window_bounds = array<i64: 1, 128>}, {transform_indices = @transform_6, window_bounds = array<i64: 2, 128>}]} {
    %c0 = arith.constant 0 : index
    %c0_0 = arith.constant 0 : index
    %c0_1 = arith.constant 0 : index
    %0 = vector.load %arg1[%c0, %c0_0, %c0_1] : memref<2x49x1024xbf16, #tpu.memory_space<vmem>>, vector<2x49x1024xbf16>
    %1 = arith.extf %0 : vector<2x49x1024xbf16> to vector<2x49x1024xf32>
    %cst = arith.constant dense<0.000000e+00> : vector<2x1024xf32>
    %2 = vector.multi_reduction <add>, %1, %cst [1] : vector<2x49x1024xf32> to vector<2x1024xf32>
    %3 = arith.truncf %2 : vector<2x1024xf32> to vector<2x1024xbf16>
    %c0_2 = arith.constant 0 : index
    %c0_3 = arith.constant 0 : index
    %c0_4 = arith.constant 0 : index
    %4 = vector.load %arg2[%c0_2, %c0_3, %c0_4] : memref<2x49x1024xbf16, #tpu.memory_space<vmem>>, vector<2x49x1024xbf16>
    %5 = arith.extf %4 : vector<2x49x1024xbf16> to vector<2x49x1024xf32>
    %cst_5 = arith.constant dense<0.000000e+00> : vector<2x1024xf32>
    %6 = vector.multi_reduction <add>, %5, %cst_5 [1] : vector<2x49x1024xf32> to vector<2x1024xf32>
    %7 = arith.truncf %6 : vector<2x1024xf32> to vector<2x1024xbf16>
    %c0_6 = arith.constant 0 : index
    %c0_7 = arith.constant 0 : index
    %8 = vector.load %arg3[%c0_6, %c0_7] : memref<2x768xbf16, #tpu.memory_space<vmem>>, vector<2x768xbf16>
    %c0_8 = arith.constant 0 : index
    %c0_9 = arith.constant 0 : index
    %9 = vector.load %arg4[%c0_8, %c0_9] : memref<2816x512xbf16, #tpu.memory_space<vmem>>, vector<1024x512xbf16>
    %cst_10 = arith.constant dense<0.000000e+00> : vector<2x512xf32>
    %10 = tpu.matmul %3, %9, %cst_10 {dimension_numbers = #tpu.dot_dimension_numbers<[1], [0], [0], [1], [0, 0, 1, 1], [], []>} : vector<2x1024xbf16>, vector<1024x512xbf16>, vector<2x512xf32> -> vector<2x512xf32>
    %c1024 = arith.constant 1024 : index
    %c0_11 = arith.constant 0 : index
    %11 = vector.load %arg4[%c1024, %c0_11] : memref<2816x512xbf16, #tpu.memory_space<vmem>>, vector<1024x512xbf16>
    %cst_12 = arith.constant dense<0.000000e+00> : vector<2x512xf32>
    %12 = tpu.matmul %7, %11, %cst_12 {dimension_numbers = #tpu.dot_dimension_numbers<[1], [0], [0], [1], [0, 0, 1, 1], [], []>} : vector<2x1024xbf16>, vector<1024x512xbf16>, vector<2x512xf32> -> vector<2x512xf32>
    %13 = arith.addf %10, %12 : vector<2x512xf32>
    %c2048 = arith.constant 2048 : index
    %c0_13 = arith.constant 0 : index
    %14 = vector.load %arg4[%c2048, %c0_13] : memref<2816x512xbf16, #tpu.memory_space<vmem>>, vector<768x512xbf16>
    %cst_14 = arith.constant dense<0.000000e+00> : vector<2x512xf32>
    %15 = tpu.matmul %8, %14, %cst_14 {dimension_numbers = #tpu.dot_dimension_numbers<[1], [0], [0], [1], [0, 0, 1, 1], [], []>} : vector<2x768xbf16>, vector<768x512xbf16>, vector<2x512xf32> -> vector<2x512xf32>
    %16 = arith.addf %13, %15 : vector<2x512xf32>
    %17 = math.tanh %16 : vector<2x512xf32>
    %18 = arith.truncf %17 : vector<2x512xf32> to vector<2x512xbf16>
    %c0_15 = arith.constant 0 : index
    %c0_16 = arith.constant 0 : index
    %19 = vector.load %arg5[%c0_15, %c0_16] : memref<512x128xbf16, #tpu.memory_space<vmem>>, vector<512x128xbf16>
    %cst_17 = arith.constant dense<0.000000e+00> : vector<2x128xf32>
    %20 = tpu.matmul %18, %19, %cst_17 {dimension_numbers = #tpu.dot_dimension_numbers<[1], [0], [0], [1], [0, 0, 1, 1], [], []>} : vector<2x512xbf16>, vector<512x128xbf16>, vector<2x128xf32> -> vector<2x128xf32>
    %c0_18 = arith.constant 0 : index
    %c0_19 = arith.constant 0 : index
    %21 = vector.load %arg6[%c0_18, %c0_19] : memref<1x128xf32, #tpu.memory_space<vmem>>, vector<1x128xf32>
    %22 = vector.broadcast %21 : vector<1x128xf32> to vector<2x128xf32>
    %23 = arith.addf %20, %22 : vector<2x128xf32>
    %c0_20 = arith.constant 0 : index
    %c0_21 = arith.constant 0 : index
    %24 = vector.load %arg7[%c0_20, %c0_21] : memref<2x128xf32, #tpu.memory_space<vmem>>, vector<2x128xf32>
    tpu.vector_store %arg7[%c0_20, %c0_21], %23 {strides = array<i32>} : memref<2x128xf32, #tpu.memory_space<vmem>>, vector<2x128xf32>,
    return
  }
  func.func @transform_0(%arg0: i32) -> (i32, i32, i32) {
    %c0_i32 = arith.constant 0 : i32
    %c0_i32_0 = arith.constant 0 : i32
    %c0_i32_1 = arith.constant 0 : i32
    return %arg0, %c0_i32, %c0_i32_0 : i32, i32, i32
  }
  func.func @transform_1(%arg0: i32) -> (i32, i32, i32) {
    %c0_i32 = arith.constant 0 : i32
    %c0_i32_0 = arith.constant 0 : i32
    %c0_i32_1 = arith.constant 0 : i32
    return %arg0, %c0_i32, %c0_i32_0 : i32, i32, i32
  }
  func.func @transform_2(%arg0: i32) -> (i32, i32) {
    %c0_i32 = arith.constant 0 : i32
    %c0_i32_0 = arith.constant 0 : i32
    return %arg0, %c0_i32 : i32, i32
  }
  func.func @transform_3(%arg0: i32) -> (i32, i32) {
    %c0_i32 = arith.constant 0 : i32
    %c0_i32_0 = arith.constant 0 : i32
    %c0_i32_1 = arith.constant 0 : i32
    return %c0_i32, %c0_i32_0 : i32, i32
  }
  func.func @transform_4(%arg0: i32) -> (i32, i32) {
    %c0_i32 = arith.constant 0 : i32
    %c0_i32_0 = arith.constant 0 : i32
    %c0_i32_1 = arith.constant 0 : i32
    return %c0_i32, %c0_i32_0 : i32, i32
  }
  func.func @transform_5(%arg0: i32) -> (i32, i32) {
    %c0_i32 = arith.constant 0 : i32
    %c0_i32_0 = arith.constant 0 : i32
    %c0_i32_1 = arith.constant 0 : i32
    return %c0_i32, %c0_i32_0 : i32, i32
  }
  func.func @transform_6(%arg0: i32) -> (i32, i32) {
    %c0_i32 = arith.constant 0 : i32
    %c0_i32_0 = arith.constant 0 : i32
    return %arg0, %c0_i32 : i32, i32
  }
}

</mosaic_0001>

<bundles_post_ra>
// kernel: tpu_custom_call.1
= control target key start
LH: loop header
LB: loop body
LE: loop exit
PB: predicated region body
PF: predicated region fallthrough
CT: control target
= control target key end

     0   :  { %11 = vsyncpa [#allocation3], 0  ;;  %s9474_s0 = inlined_call_operand.vmem [shape: bf16[2,49,1024], index: 0, kind: input, shape index: {}]   ;;  %s9475_s1 = inlined_call_operand.vmem [shape: bf16[2,49,1024], index: 1, kind: input, shape index: {}]   ;;  %s9476_s2 = inlined_call_operand.hbm [shape: bf16[2,768], index: 2, kind: input, shape index: {}]   ;;  %s9477_s3 = inlined_call_operand.hbm [shape: bf16[2816,512], index: 3, kind: input, shape index: {}]   ;;  %s9478_s4 = inlined_call_operand.hbm [shape: bf16[512,128], index: 4, kind: input, shape index: {}]   ;;  %s9479_s5 = inlined_call_operand.hbm [shape: f32[1,128], index: 5, kind: input, shape index: {}]   ;;  %s9480_s6 = inlined_call_operand.hbm [shape: f32[2,128], index: 6, kind: output, shape index: {}]  }
   0x1   :  { %12 = vsyncpa [#allocation6], 0 }
   0x2   :  { %13 = vsyncpa [#allocation9], 0 }
   0x3   :  { %14 = vsyncpa [#allocation4], 0  ;;  %s8614_s21 = smov [#allocation5]   ;;  %s8496_s25 = scalar_lea.hbm %s9477_s3, 90112 }
   0x4   :  { %s34_s22 = sshll.u32 %s8614_s21, 4  ;;  %p8497_p0 = scmp.ne.s32.totalorder %s9477_s3, %s8496_s25  ;;  %s35_s22 = int_to_ptr.vmem [resolvable:$true] %s34_s22 }
   0x5   :  { %p8500_p1 = scmp.lt.u32.totalorder %s8496_s25, %s9477_s3 }
   0x7   :  { %p8502_p2 = pnand %p8500_p1, %p8497_p0 }
   0x9   :  { %8505 = shalt.err (!%p8502_p2)
}
   0xa   :  { %s8506_s30 = scalar_lea.vmem %s35_s22, 90112  ;;  %p8511_p4 = scmp.lt.s32.totalorder %s35_s22, %s35_s22 }
   0xb   :  { %p8507_p3 = scmp.ne.s32.totalorder %s35_s22, %s8506_s30  ;;  %p8512_p5 = scmp.lt.s32.totalorder %s8506_s30, %s8506_s30 }
   0xd   :  { %p8513_p6 = por %p8512_p5, %p8511_p4 }
   0xf   :  { %p8514_p7 = pnand %p8513_p6, %p8507_p3 }
  0x11   :  { %8517 = shalt.err (!%p8514_p7)
}
  0x12   :  { %s8615_s7 = smov 256   ;;  %s8616_s8 = smov 16  }
  0x13   :  { %40 = dma.hbm_to_vmem [thread:$0]  %s9477_s3, 90112, %s35_s22, [#allocation6], %s8615_s7, %s8615_s7, %s8616_s8  }
  0x14   :  { %s8617_s11 = smov [#allocation2]   ;;  %s8618_s13 = smov [#allocation7]  }
  0x15   :  { %s25_s12 = sshll.u32 %s8617_s11, 4  ;;  %s46_s14 = sshll.u32 %s8618_s13, 4  ;;  %s26_s12 = int_to_ptr.vmem [resolvable:$true] %s25_s12  ;;  %s47_s14 = int_to_ptr.vmem [resolvable:$true] %s46_s14 }
  0x16   :  { %s8518_s17 = scalar_lea.hbm %s9476_s2, 96 }
  0x17   :  { %p8519_p8 = scmp.ne.s32.totalorder %s9476_s2, %s8518_s17  ;;  %p8522_p9 = scmp.lt.u32.totalorder %s8518_s17, %s9476_s2 }
  0x19   :  { %p8524_p10 = pnand %p8522_p9, %p8519_p8 }
  0x1b   :  { %8527 = shalt.err (!%p8524_p10)
}
  0x1c   :  { %s8528_s3 = scalar_lea.vmem %s26_s12, 96  ;;  %p8533_p12 = scmp.lt.s32.totalorder %s26_s12, %s26_s12 }
  0x1d   :  { %p8529_p11 = scmp.ne.s32.totalorder %s26_s12, %s8528_s3  ;;  %p8534_p13 = scmp.lt.s32.totalorder %s8528_s3, %s8528_s3 }
  0x1f   :  { %p8535_p0 = por %p8534_p13, %p8533_p12 }
  0x21   :  { %p8536_p1 = pnand %p8535_p0, %p8529_p11 }
  0x23   :  { %8539 = shalt.err (!%p8536_p1)
}
  0x24   :  { %28 = dma.hbm_to_vmem [thread:$0]  %s9476_s2, 96, %s26_s12, [#allocation3]  }
  0x25   :  { %s8540_s26 = scalar_lea.hbm %s9478_s4, 4096 }
  0x26   :  { %p8541_p2 = scmp.ne.s32.totalorder %s9478_s4, %s8540_s26  ;;  %p8544_p3 = scmp.lt.u32.totalorder %s8540_s26, %s9478_s4 }
  0x28   :  { %p8546_p4 = pnand %p8544_p3, %p8541_p2 }
  0x2a   :  { %8549 = shalt.err (!%p8546_p4)
}
  0x2b   :  { %s8550_s7 = scalar_lea.vmem %s47_s14, 4096  ;;  %p8555_p6 = scmp.lt.s32.totalorder %s47_s14, %s47_s14 }
  0x2c   :  { %p8551_p5 = scmp.ne.s32.totalorder %s47_s14, %s8550_s7  ;;  %p8556_p7 = scmp.lt.s32.totalorder %s8550_s7, %s8550_s7 }
  0x2e   :  { %p8557_p8 = por %p8556_p7, %p8555_p6 }
  0x30   :  { %p8558_p9 = pnand %p8557_p8, %p8551_p5 }
  0x32   :  { %8561 = shalt.err (!%p8558_p9)
}
  0x33   :  { %s8619_s2 = smov 64   ;;  %s8620_s8 = smov 4  }
  0x34   :  { %52 = dma.hbm_to_vmem [thread:$0]  %s9478_s4, 4096, %s47_s14, [#allocation6], %s8619_s2, %s8619_s2, %s8620_s8  }
  0x35   :  { %s8621_s11 = smov [#allocation8]   ;;  %s8562_s16 = scalar_lea.hbm %s9479_s5, 16 }
  0x36   :  { %s59_s12 = sshll.u32 %s8621_s11, 4  ;;  %p8563_p10 = scmp.ne.s32.totalorder %s9479_s5, %s8562_s16  ;;  %s60_s12 = int_to_ptr.vmem [resolvable:$true] %s59_s12 }
  0x37   :  { %p8566_p11 = scmp.lt.u32.totalorder %s8562_s16, %s9479_s5 }
  0x39   :  { %p8568_p12 = pnand %p8566_p11, %p8563_p10 }
  0x3b   :  { %8571 = shalt.err (!%p8568_p12)
}
  0x3c   :  { %s8572_s21 = scalar_lea.vmem %s60_s12, 16  ;;  %s8576_s4 = scalar_lea.vmem %s60_s12, 32 }
  0x3d   :  { %p8573_p13 = scmp.ne.s32.totalorder %s60_s12, %s8572_s21  ;;  %p8577_p0 = scmp.lt.s32.totalorder %s60_s12, %s60_s12 }
  0x3e   :  { %p8578_p1 = scmp.lt.s32.totalorder %s8576_s4, %s8572_s21 }
  0x40   :  { %p8579_p2 = por %p8578_p1, %p8577_p0 }
  0x42   :  { %p8580_p3 = pnand %p8579_p2, %p8573_p13 }
  0x44   :  { %8583 = shalt.err (!%p8580_p3)
}
  0x45   :  { %62 = dma.hbm_to_vmem [thread:$0]  %s9479_s5, 16, %s60_s12, [#allocation9]  }
  0x46   :  { %8606 = dma.done.wait [#allocation3], 96  }
  0x47   :  { %8607 = vsyncadd [#allocation3], 4294967200 }
  0x48   :  { %8608 = dma.done.wait [#allocation6], 94208  }
  0x49   :  { %8609 = vsyncadd [#allocation6], 4294873088 }
  0x4a   :  { %8610 = dma.done.wait [#allocation9], 16  }
  0x4b   :  { %8611 = vsyncadd [#allocation9], 4294967280  ;;  %v7399_v0 = vld [vmem:[#allocation5 + $0x804] ss:$16 sps:$4 sm:$0xff]   ;;  %v7401_v1 = vld [vmem:[#allocation5 + $0x80c] ss:$16 sps:$4 sm:$0xff]  }
  0x4c   :  { %2711 = vmatprep.subr.bf16.mxu0 %v7399_v0  ;;  %v7403_v2 = vld [vmem:[#allocation5 + $0x800] ss:$16 sps:$4 sm:$0xff]   ;;  %v7404_v3 = vld [vmem:[#allocation5 + $0x808] ss:$16 sps:$4 sm:$0xff]   ;;  %2875 = vmatprep.subr.bf16.mxu1 %v7401_v1  ;;  %v7405_v4 = vld [vmem:[#allocation5 + $0x824] ss:$16 sps:$4 sm:$0xff]  }
  0x4d   :  { %2712 = vmatpush1.bf16.msra.mxu0 %v7403_v2  ;;  %2876 = vmatpush1.bf16.msra.mxu1 %v7404_v3  ;;  %v7407_v5 = vld [vmem:[#allocation5 + $0x82c] ss:$16 sps:$4 sm:$0xff]   ;;  %v7409_v6 = vld [vmem:[#allocation5 + $0x820] ss:$16 sps:$4 sm:$0xff]   ;;  %v7410_v7 = vld [vmem:[#allocation5 + $0x828] ss:$16 sps:$4 sm:$0xff]  }
  0x4e   :  { %2713 = vmatprep.subr.bf16.mxu0 %v7405_v4  ;;  %2877 = vmatprep.subr.bf16.mxu1 %v7407_v5  ;;  %v7411_v8 = vld [vmem:[#allocation5 + $0x844] ss:$16 sps:$4 sm:$0xff]   ;;  %v7413_v9 = vld [vmem:[#allocation5 + $0x84c] ss:$16 sps:$4 sm:$0xff]   ;;  %v7415_v10 = vld [vmem:[#allocation5 + $0x840] ss:$16 sps:$4 sm:$0xff]  }
  0x4f   :  { %v7416_v11 = vld [vmem:[#allocation5 + $0x848] ss:$16 sps:$4 sm:$0xff]   ;;  %v7417_v12 = vld [vmem:[#allocation5 + $0x864] ss:$16 sps:$4 sm:$0xff]   ;;  %v7419_v13 = vld [vmem:[#allocation5 + $0x86c] ss:$16 sps:$4 sm:$0xff]  }
  0x50   :  { %v7421_v14 = vld [vmem:[#allocation5 + $0x860] ss:$16 sps:$4 sm:$0xff]   ;;  %v7422_v15 = vld [vmem:[#allocation5 + $0x868] ss:$16 sps:$4 sm:$0xff]   ;;  %v7423_v16 = vld [vmem:[#allocation5 + $0x884] ss:$16 sps:$4 sm:$0xff]  }
  0x51   :  { %2714 = vmatpush1.bf16.msra.mxu0 %v7409_v6  ;;  %2878 = vmatpush1.bf16.msra.mxu1 %v7410_v7  ;;  %v7425_v17 = vld [vmem:[#allocation5 + $0x88c] ss:$16 sps:$4 sm:$0xff]   ;;  %v7427_v18 = vld [vmem:[#allocation5 + $0x880] ss:$16 sps:$4 sm:$0xff]   ;;  %v7428_v19 = vld [vmem:[#allocation5 + $0x888] ss:$16 sps:$4 sm:$0xff]  }
  0x52   :  { %2715 = vmatprep.subr.bf16.mxu0 %v7411_v8  ;;  %2879 = vmatprep.subr.bf16.mxu1 %v7413_v9  ;;  %v7429_v20 = vld [vmem:[#allocation5 + $0x8a4] ss:$16 sps:$4 sm:$0xff]   ;;  %v7431_v21 = vld [vmem:[#allocation5 + $0x8ac] ss:$16 sps:$4 sm:$0xff]   ;;  %v7433_v22 = vld [vmem:[#allocation5 + $0x8a0] ss:$16 sps:$4 sm:$0xff]  }
  0x53   :  { %v7434_v23 = vld [vmem:[#allocation5 + $0x8a8] ss:$16 sps:$4 sm:$0xff]   ;;  %v7435_v24 = vld [vmem:[#allocation5 + $0x8c4] ss:$16 sps:$4 sm:$0xff]   ;;  %v7437_v25 = vld [vmem:[#allocation5 + $0x8cc] ss:$16 sps:$4 sm:$0xff]  }
  0x54   :  { %v7439_v26 = vld [vmem:[#allocation5 + $0x8c0] ss:$16 sps:$4 sm:$0xff]   ;;  %v7440_v27 = vld [vmem:[#allocation5 + $0x8c8] ss:$16 sps:$4 sm:$0xff]   ;;  %v7441_v28 = vld [vmem:[#allocation5 + $0x8e4] ss:$16 sps:$4 sm:$0xff]  }
  0x55   :  { %2716 = vmatpush1.bf16.msra.mxu0 %v7415_v10  ;;  %2880 = vmatpush1.bf16.msra.mxu1 %v7416_v11  ;;  %v7443_v29 = vld [vmem:[#allocation5 + $0x8ec] ss:$16 sps:$4 sm:$0xff]   ;;  %v7445_v30 = vld [vmem:[#allocation5 + $0x8e0] ss:$16 sps:$4 sm:$0xff]   ;;  %v7446_v31 = vld [vmem:[#allocation5 + $0x8e8] ss:$16 sps:$4 sm:$0xff]  }
  0x56   :  { %2717 = vmatprep.subr.bf16.mxu0 %v7417_v12  ;;  %2881 = vmatprep.subr.bf16.mxu1 %v7419_v13  ;;  %v7447_v32 = vld [vmem:[#allocation5 + $0x904] ss:$16 sps:$4 sm:$0xff]   ;;  %v7449_v33 = vld [vmem:[#allocation5 + $0x90c] ss:$16 sps:$4 sm:$0xff]   ;;  %v7451_v34 = vld [vmem:[#allocation5 + $0x900] ss:$16 sps:$4 sm:$0xff]  }
  0x57   :  { %v7452_v35 = vld [vmem:[#allocation5 + $0x908] ss:$16 sps:$4 sm:$0xff]   ;;  %v7453_v36 = vld [vmem:[#allocation5 + $0x924] ss:$16 sps:$4 sm:$0xff]   ;;  %v7455_v37 = vld [vmem:[#allocation5 + $0x92c] ss:$16 sps:$4 sm:$0xff]  }
  0x58   :  { %v7457_v38 = vld [vmem:[#allocation5 + $0x920] ss:$16 sps:$4 sm:$0xff]   ;;  %v7458_v39 = vld [vmem:[#allocation5 + $0x928] ss:$16 sps:$4 sm:$0xff]   ;;  %v7459_v40 = vld [vmem:[#allocation5 + $0x944] ss:$16 sps:$4 sm:$0xff]  }
  0x59   :  { %2718 = vmatpush1.bf16.msra.mxu0 %v7421_v14  ;;  %2882 = vmatpush1.bf16.msra.mxu1 %v7422_v15  ;;  %v7461_v41 = vld [vmem:[#allocation5 + $0x94c] ss:$16 sps:$4 sm:$0xff]   ;;  %v7463_v42 = vld [vmem:[#allocation5 + $0x940] ss:$16 sps:$4 sm:$0xff]   ;;  %v7464_v43 = vld [vmem:[#allocation5 + $0x948] ss:$16 sps:$4 sm:$0xff]  }
  0x5a   :  { %2719 = vmatprep.subr.bf16.mxu0 %v7423_v16  ;;  %2883 = vmatprep.subr.bf16.mxu1 %v7425_v17  ;;  %v7465_v44 = vld [vmem:[#allocation5 + $0x964] ss:$16 sps:$4 sm:$0xff]   ;;  %v7467_v45 = vld [vmem:[#allocation5 + $0x96c] ss:$16 sps:$4 sm:$0xff]   ;;  %v7469_v46 = vld [vmem:[#allocation5 + $0x960] ss:$16 sps:$4 sm:$0xff]  }
  0x5b   :  { %v7470_v47 = vld [vmem:[#allocation5 + $0x968] ss:$16 sps:$4 sm:$0xff]   ;;  %v7471_v50 = vld [vmem:[#allocation5 + $0x984] ss:$16 sps:$4 sm:$0xff]   ;;  %v7473_v51 = vld [vmem:[#allocation5 + $0x98c] ss:$16 sps:$4 sm:$0xff]  }
  0x5c   :  { %v469_v48 = vld [vmem:[%s9475_s1] sm:$0xff]  ;;  %vm249_vm0 = vcmask 1040384   ;;  %v7477_v6 = vld [vmem:[#allocation5 + $0x9a4] ss:$16 sps:$4 sm:$0xff]   ;;  %vm1406_vm1 = vcmask 1041409  }
  0x5d   :  { %2720 = vmatpush1.bf16.msra.mxu0 %v7427_v18  ;;  %2884 = vmatpush1.bf16.msra.mxu1 %v7428_v19  ;;  %v473_v49 = vld [vmem:[%s9475_s1 + $0x20] sm:$0xff]  ;;  %v525_v61 = vunpack.c.l.bf16 %v469_v48  ;;  %v526_v62 = vunpack.c.h.bf16 %v469_v48 }
  0x5e   :  { %2721 = vmatprep.subr.bf16.mxu0 %v7429_v20  ;;  %2885 = vmatprep.subr.bf16.mxu1 %v7431_v21  ;;  %v477_v52 = vld [vmem:[%s9475_s1 + $0x40] sm:$0xff]  ;;  %v533_v63 = vunpack.c.l.bf16 %v473_v49  ;;  %v534_v0 = vunpack.c.h.bf16 %v473_v49 }
  0x5f   :  { %v8719_v53 = vld [vmem:[%s9475_s1 + $0x60] sm:$0xff]  ;;  %v541_v8 = vunpack.c.l.bf16 %v477_v52  ;;  %v542_v9 = vunpack.c.h.bf16 %v477_v52 }
  0x60   :  { %v497_v54 = vld [vmem:[%s9475_s1 + $0xe0] sm:$0xff]  ;;  %v549_v10 = vunpack.c.l.bf16 %v8719_v53  ;;  %v550_v11 = vunpack.c.h.bf16 %v8719_v53 }
  0x61   :  { %2722 = vmatpush1.bf16.msra.mxu0 %v7433_v22  ;;  %2886 = vmatpush1.bf16.msra.mxu1 %v7434_v23  ;;  %v501_v55 = vld [vmem:[%s9475_s1 + $0x100] sm:$0xff]  ;;  %v581_v2 = vunpack.c.l.bf16 %v497_v54  ;;  %v582_v3 = vunpack.c.h.bf16 %v497_v54  ;;  %v650_v22 = vadd.f32 %v534_v0, %v526_v62 }
  0x62   :  { %2723 = vmatprep.subr.bf16.mxu0 %v7435_v24  ;;  %2887 = vmatprep.subr.bf16.mxu1 %v7437_v25  ;;  %v7475_v56 = vld [vmem:[#allocation5 + $0x980] ss:$16 sps:$4 sm:$0xff]   ;;  %v7476_v57 = vld [vmem:[#allocation5 + $0x988] ss:$16 sps:$4 sm:$0xff]   ;;  %v589_v4 = vunpack.c.l.bf16 %v501_v55  ;;  %v590_v5 = vunpack.c.h.bf16 %v501_v55  ;;  %v7479_v7 = vld [vmem:[#allocation5 + $0x9ac] ss:$16 sps:$4 sm:$0xff]  }
  0x63   :  { %v8730_v58 = vld [vmem:[%s9475_s1 + $0x80] sm:$0xff] }
  0x64   :  { %v8735_v59 = vld [vmem:[%s9475_s1 + $0xa0] sm:$0xff]  ;;  %v557_v14 = vunpack.c.l.bf16 %v8730_v58  ;;  %v558_v15 = vunpack.c.h.bf16 %v8730_v58  ;;  %v754_v25 = vadd.f32 %v590_v5, %v582_v3  ;;  %v7497_v3 = vld [vmem:[#allocation5 + $0xa04] ss:$16 sps:$4 sm:$0xff]  }
  0x65   :  { %2724 = vmatpush1.bf16.msra.mxu0 %v7439_v26  ;;  %2888 = vmatpush1.bf16.msra.mxu1 %v7440_v27  ;;  %v505_v60 = vld [vmem:[%s9475_s1 + $0x120] sm:$0xff]  ;;  %v565_v19 = vunpack.c.l.bf16 %v8735_v59  ;;  %v566_v20 = vunpack.c.h.bf16 %v8735_v59  ;;  %v637_v26 = vadd.f32 %v533_v63, %v525_v61  ;;  %v741_v27 = vadd.f32 %v589_v4, %v581_v2 }
  0x66   :  { %2725 = vmatprep.subr.bf16.mxu0 %v7441_v28  ;;  %2889 = vmatprep.subr.bf16.mxu1 %v7443_v29  ;;  %v509_v1 = vld [vmem:[%s9475_s1 + $0x140] sm:$0xff]  ;;  %v597_v16 = vunpack.c.l.bf16 %v505_v60  ;;  %v598_v17 = vunpack.c.h.bf16 %v505_v60 }
  0x67   :  { %v493_v12 = vld [vmem:[%s9475_s1 + $0xc0] sm:$0x11]  ;;  %v605_v21 = vunpack.c.l.bf16 %v509_v1  ;;  %v606_v24 = vunpack.c.h.bf16 %v509_v1  ;;  %v7481_v28 = vld [vmem:[#allocation5 + $0x9a0] ss:$16 sps:$4 sm:$0xff]  }
  0x68   :  { %v513_v13 = vld [vmem:[%s9475_s1 + $0x160] sm:$0xff] }
  0x69   :  { %2726 = vmatpush1.bf16.msra.mxu0 %v7445_v30  ;;  %2890 = vmatpush1.bf16.msra.mxu1 %v7446_v31  ;;  %v517_v18 = vld [vmem:[%s9475_s1 + $0x180] sm:$0xff]  ;;  %v7483_v30 = vld [vmem:[#allocation5 + $0x9c4] ss:$16 sps:$4 sm:$0xff]   ;;  %v573_v31 = vunpack.c.l.bf16 %v493_v12 }
  0x6a   :  { %2727 = vmatprep.subr.bf16.mxu0 %v7447_v32  ;;  %2891 = vmatprep.subr.bf16.mxu1 %v7449_v33  ;;  %v521_v23 = vld [vmem:[%s9475_s1 + $0x1a0] sm:$0x11]  ;;  %v574_v32 = vunpack.c.h.bf16 %v493_v12  ;;  %v613_v33 = vunpack.c.l.bf16 %v513_v13  ;;  %v7493_v61 = vld [vmem:[#allocation5 + $0x9e0] ss:$16 sps:$4 sm:$0xff]  }
  0x6b   :  { %v7482_v29 = vld [vmem:[#allocation5 + $0x9a8] ss:$16 sps:$4 sm:$0xff]   ;;  %v7491_v52 = vld [vmem:[#allocation5 + $0x9ec] ss:$16 sps:$4 sm:$0xff]   ;;  %v642_v59 = vsel %vm249_vm0, %v573_v31, 0.0 }
  0x6c   :  { %v7488_v49 = vld [vmem:[#allocation5 + $0x9c8] ss:$16 sps:$4 sm:$0xff]   ;;  %v655_v53 = vsel %vm249_vm0, %v574_v32, 0.0  ;;  %v7500_v5 = vld [vmem:[#allocation5 + $0xa0c] ss:$16 sps:$4 sm:$0xff]  }
  0x6d   :  { %2728 = vmatpush1.bf16.msra.mxu0 %v7451_v34  ;;  %2892 = vmatpush1.bf16.msra.mxu1 %v7452_v35  ;;  %v651_v34 = vadd.f32 %v650_v22, %v542_v9  ;;  %v7485_v35 = vld [vmem:[#allocation5 + $0x9cc] ss:$16 sps:$4 sm:$0xff]   ;;  %v7494_v1 = vld [vmem:[#allocation5 + $0x9e8] ss:$16 sps:$4 sm:$0xff]  }
  0x6e   :  { %2729 = vmatprep.subr.bf16.mxu0 %v7453_v36  ;;  %2893 = vmatprep.subr.bf16.mxu1 %v7455_v37  ;;  %v614_v36 = vunpack.c.h.bf16 %v513_v13  ;;  %v755_v37 = vadd.f32 %v754_v25, %v598_v17 }
  0x71   :  { %2730 = vmatpush1.bf16.msra.mxu0 %v7457_v38  ;;  %2894 = vmatpush1.bf16.msra.mxu1 %v7458_v39  ;;  %v638_v38 = vadd.f32 %v637_v26, %v541_v8  ;;  %v742_v39 = vadd.f32 %v741_v27, %v597_v16 }
  0x72   :  { %2731 = vmatprep.subr.bf16.mxu0 %v7459_v40  ;;  %2895 = vmatprep.subr.bf16.mxu1 %v7461_v41  ;;  %v621_v40 = vunpack.c.l.bf16 %v517_v18  ;;  %v629_v41 = vunpack.c.l.bf16 %v521_v23 }
  0x73   :  { %v743_v48 = vadd.f32 %v742_v39, %v605_v21 }
  0x74   :  { %v746_v60 = vsel %vm249_vm0, %v629_v41, 0.0  ;;  %v7495_v41 = vld [vmem:[#allocation5 + $0xa00] ss:$16 sps:$4 sm:$0xff]  }
  0x75   :  { %2732 = vmatpush1.bf16.msra.mxu0 %v7463_v42  ;;  %2896 = vmatpush1.bf16.msra.mxu1 %v7464_v43  ;;  %v630_v42 = vunpack.c.h.bf16 %v521_v23  ;;  %v652_v43 = vadd.f32 %v651_v34, %v550_v11 }
  0x76   :  { %2733 = vmatprep.subr.bf16.mxu0 %v7465_v44  ;;  %2897 = vmatprep.subr.bf16.mxu1 %v7467_v45  ;;  %v7487_v44 = vld [vmem:[#allocation5 + $0x9c0] ss:$16 sps:$4 sm:$0xff]   ;;  %v622_v45 = vunpack.c.h.bf16 %v517_v18 }
  0x77   :  { %v759_v58 = vsel %vm249_vm0, %v630_v42, 0.0 }
  0x79   :  { %2734 = vmatpush1.bf16.msra.mxu0 %v7469_v46  ;;  %2898 = vmatpush1.bf16.msra.mxu1 %v7470_v47  ;;  %v756_v46 = vadd.f32 %v755_v37, %v606_v24  ;;  %v639_v47 = vadd.f32 %v638_v38, %v549_v10 }
  0x7a   :  { %2735 = vmatprep.subr.bf16.mxu0 %v7471_v50  ;;  %2899 = vmatprep.subr.bf16.mxu1 %v7473_v51  ;;  %v7489_v50 = vld [vmem:[#allocation5 + $0x9e4] ss:$16 sps:$4 sm:$0xff]   ;;  %v653_v51 = vadd.f32 %v652_v43, %v558_v15 }
  0x7b   :  { %v757_v54 = vadd.f32 %v756_v46, %v614_v36  ;;  %v640_v55 = vadd.f32 %v639_v47, %v557_v14  ;;  %v7503_v46 = vld [vmem:[#allocation5 + $0xa24] ss:$16 sps:$4 sm:$0xff]   ;;  %v7506_v47 = vld [vmem:[#allocation5 + $0xa2c] ss:$16 sps:$4 sm:$0xff]  }
  0x7d   :  { %2736 = vmatpush1.bf16.msra.mxu0 %v7475_v56  ;;  %2900 = vmatpush1.bf16.msra.mxu1 %v7476_v57  ;;  %v744_v56 = vadd.f32 %v743_v48, %v613_v33  ;;  %v654_v57 = vadd.f32 %v653_v51, %v566_v20  ;;  %v758_v62 = vadd.f32 %v757_v54, %v622_v45  ;;  %v7501_v48 = vld [vmem:[#allocation5 + $0xa20] ss:$16 sps:$4 sm:$0xff]   ;;  %v7512_v51 = vld [vmem:[#allocation5 + $0xa4c] ss:$16 sps:$4 sm:$0xff]   ;;  %v7515_v54 = vld [vmem:[#allocation5 + $0xa64] ss:$16 sps:$4 sm:$0xff]  }
  0x7e   :  { %2737 = vmatprep.subr.bf16.mxu0 %v7477_v6  ;;  %2901 = vmatprep.subr.bf16.mxu1 %v7479_v7  ;;  %v641_v63 = vadd.f32 %v640_v55, %v565_v19  ;;  %v7518_v55 = vld [vmem:[#allocation5 + $0xa6c] ss:$16 sps:$4 sm:$0xff]  }
  0x7f   :  { %v745_v0 = vadd.f32 %v744_v56, %v621_v40  ;;  %v656_v2 = vadd.f32 %v655_v53, %v654_v57  ;;  %v760_v4 = vadd.f32 %v759_v58, %v758_v62  ;;  %v7510_v53 = vld [vmem:[#allocation5 + $0xa48] ss:$16 sps:$4 sm:$0xff]   ;;  %v7513_v56 = vld [vmem:[#allocation5 + $0xa60] ss:$16 sps:$4 sm:$0xff]   ;;  %v7524_v62 = vld [vmem:[#allocation5 + $0xa8c] ss:$16 sps:$4 sm:$0xff]  }
  0x80   :  { %v643_v6 = vadd.f32 %v642_v59, %v641_v63  ;;  %v7516_v57 = vld [vmem:[#allocation5 + $0xa68] ss:$16 sps:$4 sm:$0xff]   ;;  %v7521_v59 = vld [vmem:[#allocation5 + $0xa84] ss:$16 sps:$4 sm:$0xff]  }
  0x81   :  { %2738 = vmatpush1.bf16.msra.mxu0 %v7481_v28  ;;  %2902 = vmatpush1.bf16.msra.mxu1 %v7482_v29  ;;  %v747_v7 = vadd.f32 %v746_v60, %v745_v0  ;;  %v657_v8 = vrot.slane %v656_v2, 4  ;;  %v761_v9 = vrot.slane %v760_v4, 4  ;;  %v470_v58 = vld [vmem:[%s9475_s1 + $0x8] sm:$0xff] }
  0x82   :  { %2739 = vmatprep.subr.bf16.mxu0 %v7483_v30  ;;  %2903 = vmatprep.subr.bf16.mxu1 %v7485_v35  ;;  %v644_v10 = vrot.slane %v643_v6, 4  ;;  %v474_v60 = vld [vmem:[%s9475_s1 + $0x28] sm:$0xff] }
  0x83   :  { %v748_v11 = vrot.slane %v747_v7, 4  ;;  %v658_v12 = vadd.f32 %v657_v8, %v656_v2  ;;  %v762_v13 = vadd.f32 %v761_v9, %v760_v4  ;;  %v498_v63 = vld [vmem:[%s9475_s1 + $0xe8] sm:$0xff] }
  0x84   :  { %v645_v14 = vadd.f32 %v644_v10, %v643_v6  ;;  %v502_v0 = vld [vmem:[%s9475_s1 + $0x108] sm:$0xff]  ;;  %v527_v6 = vunpack.c.l.bf16 %v470_v58  ;;  %v535_v10 = vunpack.c.l.bf16 %v474_v60 }
  0x85   :  { %2740 = vmatpush1.bf16.msra.mxu0 %v7487_v44  ;;  %2904 = vmatpush1.bf16.msra.mxu1 %v7488_v49  ;;  %v749_v15 = vadd.f32 %v748_v11, %v747_v7  ;;  %v659_v16 = vrot.slane %v658_v12, 2  ;;  %v763_v17 = vrot.slane %v762_v13, 2  ;;  %v7498_v44 = vld [vmem:[#allocation5 + $0xa08] ss:$16 sps:$4 sm:$0xff]   ;;  %v528_v7 = vunpack.c.h.bf16 %v470_v58  ;;  %v7527_v8 = vld [vmem:[#allocation5 + $0xaa4] ss:$16 sps:$4 sm:$0xff]  }
  0x86   :  { %2741 = vmatprep.subr.bf16.mxu0 %v7489_v50  ;;  %2905 = vmatprep.subr.bf16.mxu1 %v7491_v52  ;;  %v646_v18 = vrot.slane %v645_v14, 2  ;;  %v7504_v49 = vld [vmem:[#allocation5 + $0xa28] ss:$16 sps:$4 sm:$0xff]   ;;  %v7509_v50 = vld [vmem:[#allocation5 + $0xa44] ss:$16 sps:$4 sm:$0xff]   ;;  %v536_v11 = vunpack.c.h.bf16 %v474_v60 }
  0x87   :  { %v750_v19 = vrot.slane %v749_v15, 2  ;;  %v660_v20 = vadd.f32 %v659_v16, %v658_v12  ;;  %v764_v21 = vadd.f32 %v763_v17, %v762_v13  ;;  %v7507_v52 = vld [vmem:[#allocation5 + $0xa40] ss:$16 sps:$4 sm:$0xff]   ;;  %v7522_v2 = vld [vmem:[#allocation5 + $0xa88] ss:$16 sps:$4 sm:$0xff]   ;;  %v584_v13 = vunpack.c.h.bf16 %v498_v63 }
  0x88   :  { %v647_v22 = vadd.f32 %v646_v18, %v645_v14  ;;  %v8790_v4 = vld [vmem:[%s9475_s1 + $0x88] sm:$0xff]  ;;  %v7530_v14 = vld [vmem:[#allocation5 + $0xaac] ss:$16 sps:$4 sm:$0xff]   ;;  %v583_v17 = vunpack.c.l.bf16 %v498_v63  ;;  %v591_v18 = vunpack.c.l.bf16 %v502_v0 }
  0x89   :  { %2742 = vmatpush1.bf16.msra.mxu0 %v7493_v61  ;;  %2906 = vmatpush1.bf16.msra.mxu1 %v7494_v1  ;;  %v751_v23 = vadd.f32 %v750_v19, %v749_v15  ;;  %v661_v24 = vrot.slane %v660_v20, 1  ;;  %v765_v25 = vrot.slane %v764_v21, 1  ;;  %v478_v61 = vld [vmem:[%s9475_s1 + $0x48] sm:$0xff]  ;;  %v592_v19 = vunpack.c.h.bf16 %v502_v0 }
  0x8a   :  { %2752 = vmatprep.subr.bf16.mxu0 %v7497_v3  ;;  %2916 = vmatprep.subr.bf16.mxu1 %v7500_v5  ;;  %v648_v26 = vrot.slane %v647_v22, 1  ;;  %v7519_v1 = vld [vmem:[#allocation5 + $0xa80] ss:$16 sps:$4 sm:$0xff]   ;;  %v543_v12 = vunpack.c.l.bf16 %v478_v61  ;;  %v544_v16 = vunpack.c.h.bf16 %v478_v61  ;;  %v7539_v58 = vld [vmem:[#allocation5 + $0xae4] ss:$16 sps:$4 sm:$0xff]  }
  0x8b   :  { %v752_v27 = vrot.slane %v751_v23, 1  ;;  %v662_v28 = vadd.f32 %v661_v24, %v660_v20  ;;  %v766_v29 = vadd.f32 %v765_v25, %v764_v21  ;;  %v8785_v3 = vld [vmem:[%s9475_s1 + $0x68] sm:$0xff]  ;;  %v7542_v61 = vld [vmem:[#allocation5 + $0xaec] ss:$16 sps:$4 sm:$0xff]  }
  0x8c   :  { %v649_v30 = vadd.f32 %v648_v26, %v647_v22  ;;  %v506_v5 = vld [vmem:[%s9475_s1 + $0x128] sm:$0xff]  ;;  %v551_v21 = vunpack.c.l.bf16 %v8785_v3  ;;  %v552_v22 = vunpack.c.h.bf16 %v8785_v3 }
  0x8d   :  { %v753_v31 = vadd.f32 %v752_v27, %v751_v23  ;;  %v846_v32 = vpack.c.bf16 %v662_v28, %v662_v28  ;;  %v854_v33 = vpack.c.bf16 %v766_v29, %v766_v29  ;;  %v8798_v9 = vld [vmem:[%s9475_s1 + $0xa8] sm:$0xff]  ;;  %v559_v23 = vunpack.c.l.bf16 %v8790_v4 }
  0x8e   :  { %v845_v34 = vpack.c.bf16 %v649_v30, %v649_v30  ;;  %v510_v15 = vld [vmem:[%s9475_s1 + $0x148] sm:$0xff]  ;;  %v600_v24 = vunpack.c.h.bf16 %v506_v5  ;;  %v560_v27 = vunpack.c.h.bf16 %v8790_v4  ;;  %v567_v28 = vunpack.c.l.bf16 %v8798_v9 }
  0x8f   :  { %v853_v35 = vpack.c.bf16 %v753_v31, %v753_v31  ;;  %v1391_v36 = vunpack.c.l.b16 %v846_v32  ;;  %v1399_v37 = vunpack.c.l.b16 %v854_v33  ;;  %v494_v20 = vld [vmem:[%s9475_s1 + $0xc8] sm:$0x11]  ;;  %v568_v29 = vunpack.c.h.bf16 %v8798_v9 }
  0x90   :  { %v1390_v38 = vunpack.c.l.b16 %v845_v34  ;;  %v7525_v25 = vld [vmem:[#allocation5 + $0xaa0] ss:$16 sps:$4 sm:$0xff]   ;;  %v599_v30 = vunpack.c.l.bf16 %v506_v5  ;;  %v608_v33 = vunpack.c.h.bf16 %v510_v15  ;;  %v676_v34 = vadd.f32 %v536_v11, %v528_v7  ;;  %v7545_v11 = vld [vmem:[#allocation5 + $0xb04] ss:$16 sps:$4 sm:$0xff]  }
  0x91   :  { %v1398_v39 = vunpack.c.l.b16 %v853_v35  ;;  %v1408_v40 = vsel %vm1406_vm1, %v1399_v37, %v1391_v36  ;;  %v514_v26 = vld [vmem:[%s9475_s1 + $0x168] sm:$0xff]  ;;  %v780_v35 = vadd.f32 %v592_v19, %v584_v13  ;;  %v663_v36 = vadd.f32 %v535_v10, %v527_v6  ;;  %v7548_v13 = vld [vmem:[#allocation5 + $0xb0c] ss:$16 sps:$4 sm:$0xff]  }
  0x92   :  { %v1416_v43 = vpack.c.b16 %v1408_v40, %v1408_v40  ;;  %v518_v31 = vld [vmem:[%s9475_s1 + $0x188] sm:$0xff]  ;;  %v576_v40 = vunpack.c.h.bf16 %v494_v20 }
  0x93   :  { %v1407_v42 = vsel %vm1406_vm1, %v1398_v39, %v1390_v38  ;;  %v522_v32 = vld [vmem:[%s9475_s1 + $0x1a8] sm:$0x11]  ;;  %v7528_v37 = vld [vmem:[#allocation5 + $0xaa8] ss:$16 sps:$4 sm:$0xff]   ;;  %v575_v39 = vunpack.c.l.bf16 %v494_v20 }
  0x94   :  { %v1415_v45 = vpack.c.b16 %v1407_v42, %v1407_v42  ;;  %2743 = vmatprep.mubr.bf16.mxu0 %v1416_v43  ;;  %2907 = vmatprep.mubr.bf16.mxu1 %v1416_v43  ;;  %v7533_v38 = vld [vmem:[#allocation5 + $0xac4] ss:$16 sps:$4 sm:$0xff]   ;;  %v767_v42 = vadd.f32 %v591_v18, %v583_v17  ;;  %v7536_v43 = vld [vmem:[#allocation5 + $0xacc] ss:$16 sps:$4 sm:$0xff]   ;;  %v7537_v5 = vld [vmem:[#allocation5 + $0xae0] ss:$16 sps:$4 sm:$0xff]  }
  0x95   :  { %v668_v3 = vsel %vm249_vm0, %v575_v39, 0.0  ;;  %v7540_v6 = vld [vmem:[#allocation5 + $0xae8] ss:$16 sps:$4 sm:$0xff]   ;;  %v7543_v18 = vld [vmem:[#allocation5 + $0xb00] ss:$16 sps:$4 sm:$0xff]  }
  0x96   :  { %2744 = vmatmul.mubr.bf16.vlgmr.msra.gmra.mrb[0].mxu0 %v1415_v45  ;;  %2908 = vmatmul.mubr.bf16.vlgmr.msra.gmra.mrb[0].mxu1 %v1415_v45  ;;  %v677_v45 = vadd.f32 %v676_v34, %v544_v16  ;;  %v7552_v34 = vld [vmem:[#allocation5 + $0xb28] ss:$16 sps:$4 sm:$0xff]  }
  0x97   :  { %2753 = vmatpush1.bf16.msra.mxu0 %v7495_v41  ;;  %2917 = vmatpush1.bf16.msra.mxu1 %v7498_v44  ;;  %v607_v41 = vunpack.c.l.bf16 %v510_v15  ;;  %v616_v44 = vunpack.c.h.bf16 %v514_v26 }
  0x98   :  { %2754 = vmatprep.subr.bf16.mxu0 %v7503_v46  ;;  %2918 = vmatprep.subr.bf16.mxu1 %v7506_v47  ;;  %v781_v46 = vadd.f32 %v780_v35, %v600_v24  ;;  %v664_v47 = vadd.f32 %v663_v36, %v543_v12  ;;  %v7551_v24 = vld [vmem:[#allocation5 + $0xb24] ss:$16 sps:$4 sm:$0xff]  }
  0x99   :  { %v7557_v36 = vld [vmem:[#allocation5 + $0xb44] ss:$16 sps:$4 sm:$0xff]  }
  0x9b   :  { %2755 = vmatpush1.bf16.msra.mxu0 %v7501_v48  ;;  %2919 = vmatpush1.bf16.msra.mxu1 %v7504_v49  ;;  %v615_v48 = vunpack.c.l.bf16 %v514_v26  ;;  %v624_v49 = vunpack.c.h.bf16 %v518_v31 }
  0x9c   :  { %2756 = vmatprep.subr.bf16.mxu0 %v7509_v50  ;;  %2920 = vmatprep.subr.bf16.mxu1 %v7512_v51  ;;  %v632_v50 = vunpack.c.h.bf16 %v522_v32  ;;  %v768_v51 = vadd.f32 %v767_v42, %v599_v30 }
  0x9e   :  { %v769_v60 = vadd.f32 %v768_v51, %v607_v41 }
  0x9f   :  { %2757 = vmatpush1.bf16.msra.mxu0 %v7507_v52  ;;  %2921 = vmatpush1.bf16.msra.mxu1 %v7510_v53  ;;  %v7531_v52 = vld [vmem:[#allocation5 + $0xac0] ss:$16 sps:$4 sm:$0xff]   ;;  %v7534_v53 = vld [vmem:[#allocation5 + $0xac8] ss:$16 sps:$4 sm:$0xff]  }
  0xa0   :  { %2758 = vmatprep.subr.bf16.mxu0 %v7515_v54  ;;  %2922 = vmatprep.subr.bf16.mxu1 %v7518_v55  ;;  %v631_v54 = vunpack.c.l.bf16 %v522_v32  ;;  %v678_v55 = vadd.f32 %v677_v45, %v552_v22  ;;  %v770_v4 = vadd.f32 %v769_v60, %v615_v48  ;;  %v7546_v22 = vld [vmem:[#allocation5 + $0xb08] ss:$16 sps:$4 sm:$0xff]   ;;  %v7567_v60 = vld [vmem:[#allocation5 + $0xb80] ss:$16 sps:$4 sm:$0xff]  }
  0xa1   :  { %v7558_v45 = vld [vmem:[#allocation5 + $0xb48] ss:$16 sps:$4 sm:$0xff]  }
  0xa2   :  { %v772_v10 = vsel %vm249_vm0, %v631_v54, 0.0 }
  0xa3   :  { %2759 = vmatpush1.bf16.msra.mxu0 %v7513_v56  ;;  %2923 = vmatpush1.bf16.msra.mxu1 %v7516_v57  ;;  %v782_v56 = vadd.f32 %v781_v46, %v608_v33  ;;  %v665_v57 = vadd.f32 %v664_v47, %v551_v21  ;;  %v7549_v33 = vld [vmem:[#allocation5 + $0xb20] ss:$16 sps:$4 sm:$0xff]   ;;  %v7563_v46 = vld [vmem:[#allocation5 + $0xb64] ss:$16 sps:$4 sm:$0xff]   ;;  %v7566_v47 = vld [vmem:[#allocation5 + $0xb6c] ss:$16 sps:$4 sm:$0xff]  }
  0xa4   :  { %2760 = vmatprep.subr.bf16.mxu0 %v7521_v59  ;;  %2924 = vmatprep.subr.bf16.mxu1 %v7524_v62  ;;  %v623_v59 = vunpack.c.l.bf16 %v518_v31  ;;  %v679_v62 = vadd.f32 %v678_v55, %v560_v27  ;;  %v7564_v55 = vld [vmem:[#allocation5 + $0xb68] ss:$16 sps:$4 sm:$0xff]  }
  0xa5   :  { %v783_v63 = vadd.f32 %v782_v56, %v616_v44  ;;  %v666_v0 = vadd.f32 %v665_v57, %v559_v23  ;;  %v7555_v44 = vld [vmem:[#allocation5 + $0xb40] ss:$16 sps:$4 sm:$0xff]   ;;  %v7569_v56 = vld [vmem:[#allocation5 + $0xb84] ss:$16 sps:$4 sm:$0xff]   ;;  %v7572_v57 = vld [vmem:[#allocation5 + $0xb8c] ss:$16 sps:$4 sm:$0xff]  }
  0xa6   :  { %v680_v7 = vadd.f32 %v679_v62, %v568_v29  ;;  %v771_v12 = vadd.f32 %v770_v4, %v623_v59  ;;  %v7573_v4 = vld [vmem:[#allocation5 + $0xba0] ss:$16 sps:$4 sm:$0xff]  }
  0xa7   :  { %2761 = vmatpush1.bf16.msra.mxu0 %v7519_v1  ;;  %2925 = vmatpush1.bf16.msra.mxu1 %v7522_v2  ;;  %v681_v1 = vsel %vm249_vm0, %v576_v40, 0.0  ;;  %v785_v2 = vsel %vm249_vm0, %v632_v50, 0.0  ;;  %v667_v9 = vadd.f32 %v666_v0, %v567_v28  ;;  %v7561_v50 = vld [vmem:[#allocation5 + $0xb60] ss:$16 sps:$4 sm:$0xff]   ;;  %v7570_v0 = vld [vmem:[#allocation5 + $0xb88] ss:$16 sps:$4 sm:$0xff]  }
  0xa8   :  { %2762 = vmatprep.subr.bf16.mxu0 %v7527_v8  ;;  %2926 = vmatprep.subr.bf16.mxu1 %v7530_v14  ;;  %v784_v8 = vadd.f32 %v783_v63, %v624_v49  ;;  %v682_v14 = vadd.f32 %v681_v1, %v680_v7  ;;  %v773_v17 = vadd.f32 %v772_v10, %v771_v12  ;;  %v7576_v7 = vld [vmem:[#allocation5 + $0xba8] ss:$16 sps:$4 sm:$0xff]   ;;  %v7579_v10 = vld [vmem:[#allocation5 + $0xbc0] ss:$16 sps:$4 sm:$0xff]  }
  0xa9   :  { %v669_v16 = vadd.f32 %v668_v3, %v667_v9  ;;  %v7578_v3 = vld [vmem:[#allocation5 + $0xbac] ss:$16 sps:$4 sm:$0xff]  }
  0xaa   :  { %v786_v15 = vadd.f32 %v785_v2, %v784_v8  ;;  %v683_v19 = vrot.slane %v682_v14, 4  ;;  %v774_v23 = vrot.slane %v773_v17, 4  ;;  %v7575_v2 = vld [vmem:[#allocation5 + $0xba4] ss:$16 sps:$4 sm:$0xff]   ;;  %v7584_v9 = vld [vmem:[#allocation5 + $0xbcc] ss:$16 sps:$4 sm:$0xff]  }
  0xab   :  { %2763 = vmatpush1.bf16.msra.mxu0 %v7525_v25  ;;  %2927 = vmatpush1.bf16.msra.mxu1 %v7528_v37  ;;  %v670_v21 = vrot.slane %v669_v16, 4  ;;  %v7554_v25 = vld [vmem:[#allocation5 + $0xb2c] ss:$16 sps:$4 sm:$0xff]   ;;  %v7581_v8 = vld [vmem:[#allocation5 + $0xbc4] ss:$16 sps:$4 sm:$0xff]  }
  0xac   :  { %2764 = vmatprep.subr.bf16.mxu0 %v7533_v38  ;;  %2928 = vmatprep.subr.bf16.mxu1 %v7536_v43  ;;  %v787_v20 = vrot.slane %v786_v15, 4  ;;  %v684_v26 = vadd.f32 %v683_v19, %v682_v14  ;;  %v775_v29 = vadd.f32 %v774_v23, %v773_v17  ;;  %v7560_v37 = vld [vmem:[#allocation5 + $0xb4c] ss:$16 sps:$4 sm:$0xff]   ;;  %v7587_v14 = vld [vmem:[#allocation5 + $0xbe4] ss:$16 sps:$4 sm:$0xff]  }
  0xad   :  { %v671_v28 = vadd.f32 %v670_v21, %v669_v16  ;;  %v7585_v16 = vld [vmem:[#allocation5 + $0xbe0] ss:$16 sps:$4 sm:$0xff]   ;;  %v7588_v17 = vld [vmem:[#allocation5 + $0xbe8] ss:$16 sps:$4 sm:$0xff]   ;;  %v7593_v19 = vld [vmem:[#allocation5 + $0xc04] ss:$16 sps:$4 sm:$0xff]  }
  0xae   :  { %v788_v27 = vadd.f32 %v787_v20, %v786_v15  ;;  %v685_v30 = vrot.slane %v684_v26, 2  ;;  %v776_v35 = vrot.slane %v775_v29, 2  ;;  %v7590_v15 = vld [vmem:[#allocation5 + $0xbec] ss:$16 sps:$4 sm:$0xff]  }
  0xaf   :  { %2765 = vmatpush1.bf16.msra.mxu0 %v7531_v52  ;;  %2929 = vmatpush1.bf16.msra.mxu1 %v7534_v53  ;;  %v672_v32 = vrot.slane %v671_v28, 2  ;;  %v471_v20 = vld [vmem:[%s9475_s1 + $0x10] sm:$0xff] }
  0xb0   :  { %2766 = vmatprep.subr.bf16.mxu0 %v7539_v58  ;;  %2930 = vmatprep.subr.bf16.mxu1 %v7542_v61  ;;  %v789_v31 = vrot.slane %v788_v27, 2  ;;  %v686_v38 = vadd.f32 %v685_v30, %v684_v26  ;;  %v777_v43 = vadd.f32 %v776_v35, %v775_v29  ;;  %v475_v21 = vld [vmem:[%s9475_s1 + $0x30] sm:$0xff]  ;;  %v7599_v30 = vld [vmem:[#allocation5 + $0xc24] ss:$16 sps:$4 sm:$0xff]  }
  0xb1   :  { %v673_v42 = vadd.f32 %v672_v32, %v671_v28  ;;  %v499_v23 = vld [vmem:[%s9475_s1 + $0xf0] sm:$0xff]  ;;  %v529_v32 = vunpack.c.l.bf16 %v471_v20 }
  0xb2   :  { %v790_v39 = vadd.f32 %v789_v31, %v788_v27  ;;  %v687_v40 = vrot.slane %v686_v38, 1  ;;  %v778_v54 = vrot.slane %v777_v43, 1  ;;  %v7594_v26 = vld [vmem:[#allocation5 + $0xc08] ss:$16 sps:$4 sm:$0xff]   ;;  %v7602_v31 = vld [vmem:[#allocation5 + $0xc2c] ss:$16 sps:$4 sm:$0xff]   ;;  %v586_v35 = vunpack.c.h.bf16 %v499_v23 }
  0xb3   :  { %2767 = vmatpush1.bf16.msra.mxu0 %v7537_v5  ;;  %2931 = vmatpush1.bf16.msra.mxu1 %v7540_v6  ;;  %v674_v53 = vrot.slane %v673_v42, 1  ;;  %v479_v28 = vld [vmem:[%s9475_s1 + $0x50] sm:$0xff] }
  0xb4   :  { %2768 = vmatprep.subr.bf16.mxu0 %v7545_v11  ;;  %2932 = vmatprep.subr.bf16.mxu1 %v7548_v13  ;;  %v791_v41 = vrot.slane %v790_v39, 1  ;;  %v688_v48 = vadd.f32 %v687_v40, %v686_v38  ;;  %v779_v63 = vadd.f32 %v778_v54, %v777_v43  ;;  %v7582_v13 = vld [vmem:[#allocation5 + $0xbc8] ss:$16 sps:$4 sm:$0xff]   ;;  %v537_v38 = vunpack.c.l.bf16 %v475_v21 }
  0xb5   :  { %v675_v62 = vadd.f32 %v674_v53, %v673_v42  ;;  %v507_v29 = vld [vmem:[%s9475_s1 + $0x130] sm:$0xff]  ;;  %v546_v43 = vunpack.c.h.bf16 %v479_v28 }
  0xb6   :  { %v792_v49 = vadd.f32 %v791_v41, %v790_v39  ;;  %v848_v51 = vpack.c.bf16 %v688_v48, %v688_v48  ;;  %v855_v6 = vpack.c.bf16 %v779_v63, %v779_v63  ;;  %v585_v39 = vunpack.c.l.bf16 %v499_v23  ;;  %v8858_v42 = vld [vmem:[%s9475_s1 + $0x90] sm:$0xff]  ;;  %v7605_v48 = vld [vmem:[#allocation5 + $0xc44] ss:$16 sps:$4 sm:$0xff]  }
  0xb7   :  { %2769 = vmatpush1.bf16.msra.mxu0 %v7543_v18  ;;  %2933 = vmatpush1.bf16.msra.mxu1 %v7546_v22  ;;  %v847_v5 = vpack.c.bf16 %v675_v62, %v675_v62  ;;  %v7596_v22 = vld [vmem:[#allocation5 + $0xc0c] ss:$16 sps:$4 sm:$0xff]   ;;  %v562_v62 = vunpack.c.h.bf16 %v8858_v42 }
  0xb8   :  { %2770 = vmatprep.subr.bf16.mxu0 %v7551_v24  ;;  %2934 = vmatprep.subr.bf16.mxu1 %v7554_v25  ;;  %v856_v52 = vpack.c.bf16 %v792_v49, %v792_v49  ;;  %v1393_v58 = vunpack.c.l.b16 %v848_v51  ;;  %v1400_v12 = vunpack.c.l.b16 %v855_v6  ;;  %v503_v24 = vld [vmem:[%s9475_s1 + $0x110] sm:$0xff] }
  0xb9   :  { %v1392_v11 = vunpack.c.l.b16 %v847_v5  ;;  %v7591_v25 = vld [vmem:[#allocation5 + $0xc00] ss:$16 sps:$4 sm:$0xff]   ;;  %v593_v40 = vunpack.c.l.bf16 %v503_v24  ;;  %v594_v41 = vunpack.c.h.bf16 %v503_v24  ;;  %v8868_v49 = vld [vmem:[%s9475_s1 + $0xd0] sm:$0x11]  ;;  %v7617_v24 = vld [vmem:[#allocation5 + $0xc84] ss:$16 sps:$4 sm:$0xff]  }
  0xba   :  { %v1401_v59 = vunpack.c.l.b16 %v856_v52  ;;  %v7606_v5 = vld [vmem:[#allocation5 + $0xc48] ss:$16 sps:$4 sm:$0xff]  }
  0xbb   :  { %2771 = vmatpush1.bf16.msra.mxu0 %v7549_v33  ;;  %2935 = vmatpush1.bf16.msra.mxu1 %v7552_v34  ;;  %v1409_v18 = vsel %vm1406_vm1, %v1400_v12, %v1392_v11  ;;  %v530_v33 = vunpack.c.h.bf16 %v471_v20  ;;  %v538_v34 = vunpack.c.h.bf16 %v475_v21  ;;  %v806_v54 = vadd.f32 %v594_v41, %v586_v35  ;;  %v7609_v20 = vld [vmem:[#allocation5 + $0xc60] ss:$16 sps:$4 sm:$0xff]   ;;  %v7612_v21 = vld [vmem:[#allocation5 + $0xc68] ss:$16 sps:$4 sm:$0xff]   ;;  %v7626_v41 = vld [vmem:[#allocation5 + $0xcac] ss:$16 sps:$4 sm:$0xff]  }
  0xbc   :  { %2772 = vmatprep.subr.bf16.mxu0 %v7557_v36  ;;  %2936 = vmatprep.subr.bf16.mxu1 %v7560_v37  ;;  %v1410_v61 = vsel %vm1406_vm1, %v1401_v59, %v1393_v58  ;;  %v1417_v27 = vpack.c.b16 %v1409_v18, %v1409_v18  ;;  %v8848_v36 = vld [vmem:[%s9475_s1 + $0x70] sm:$0xff]  ;;  %v601_v58 = vunpack.c.l.bf16 %v507_v29  ;;  %v689_v59 = vadd.f32 %v537_v38, %v529_v32 }
  0xbd   :  { %v1418_v1 = vpack.c.b16 %v1410_v61, %v1410_v61  ;;  %v8853_v37 = vld [vmem:[%s9475_s1 + $0x150] sm:$0xff]  ;;  %v554_v51 = vunpack.c.h.bf16 %v8848_v36  ;;  %v702_v53 = vadd.f32 %v538_v34, %v530_v33  ;;  %v553_v11 = vunpack.c.l.bf16 %v8848_v36 }
  0xbe   :  { %v610_v52 = vunpack.c.h.bf16 %v8853_v37  ;;  %v7608_v61 = vld [vmem:[#allocation5 + $0xc4c] ss:$16 sps:$4 sm:$0xff]   ;;  %v609_v12 = vunpack.c.l.bf16 %v8853_v37  ;;  %v7615_v32 = vld [vmem:[#allocation5 + $0xc80] ss:$16 sps:$4 sm:$0xff]   ;;  %v7618_v35 = vld [vmem:[#allocation5 + $0xc88] ss:$16 sps:$4 sm:$0xff]  }
  0xbf   :  { %2773 = vmatpush1.bf16.msra.mxu0 %v7555_v44  ;;  %2937 = vmatpush1.bf16.msra.mxu1 %v7558_v45  ;;  %v602_v44 = vunpack.c.h.bf16 %v507_v29  ;;  %v7597_v45 = vld [vmem:[#allocation5 + $0xc20] ss:$16 sps:$4 sm:$0xff]   ;;  %v7620_v29 = vld [vmem:[#allocation5 + $0xc8c] ss:$16 sps:$4 sm:$0xff]  }
  0xc0   :  { %2774 = vmatprep.subr.bf16.mxu0 %v7563_v46  ;;  %2938 = vmatprep.subr.bf16.mxu1 %v7566_v47  ;;  %v7600_v46 = vld [vmem:[#allocation5 + $0xc28] ss:$16 sps:$4 sm:$0xff]  }
  0xc1   :  { %2784 = vmatprep.mubr.bf16.mxu0 %v1418_v1  ;;  %2948 = vmatprep.mubr.bf16.mxu1 %v1418_v1  ;;  %v8863_v47 = vld [vmem:[%s9475_s1 + $0x170] sm:$0xff]  ;;  %v807_v1 = vadd.f32 %v806_v54, %v602_v44 }
  0xc2   :  { %v618_v63 = vunpack.c.h.bf16 %v8863_v47 }
  0xc3   :  { %2775 = vmatpush1.bf16.msra.mxu0 %v7561_v50  ;;  %2939 = vmatpush1.bf16.msra.mxu1 %v7564_v55  ;;  %v8873_v50 = vld [vmem:[%s9475_s1 + $0x1b0] sm:$0x11] }
  0xc4   :  { %2776 = vmatprep.subr.bf16.mxu0 %v7569_v56  ;;  %2940 = vmatprep.subr.bf16.mxu1 %v7572_v57  ;;  %v8880_v55 = vld [vmem:[%s9475_s1 + $0xb0] sm:$0xff]  ;;  %v545_v57 = vunpack.c.l.bf16 %v479_v28 }
  0xc5   :  { %v8885_v56 = vld [vmem:[%s9475_s1 + $0x190] sm:$0xff]  ;;  %v570_v6 = vunpack.c.h.bf16 %v8880_v55  ;;  %v569_v36 = vunpack.c.l.bf16 %v8880_v55 }
  0xc6   :  { %v625_v37 = vunpack.c.l.bf16 %v8885_v56  ;;  %v7632_v55 = vld [vmem:[#allocation5 + $0xccc] ss:$16 sps:$4 sm:$0xff]  }
  0xc7   :  { %2777 = vmatpush1.bf16.msra.mxu0 %v7567_v60  ;;  %2941 = vmatpush1.bf16.msra.mxu1 %v7570_v0  ;;  %v793_v60 = vadd.f32 %v593_v40, %v585_v39  ;;  %v703_v0 = vadd.f32 %v702_v53, %v546_v43  ;;  %v7623_v40 = vld [vmem:[#allocation5 + $0xca4] ss:$16 sps:$4 sm:$0xff]   ;;  %v633_v43 = vunpack.c.l.bf16 %v8873_v50 }
  0xc8   :  { %2778 = vmatprep.subr.bf16.mxu0 %v7575_v2  ;;  %2942 = vmatprep.subr.bf16.mxu1 %v7578_v3  ;;  %v578_v2 = vunpack.c.h.bf16 %v8868_v49  ;;  %v634_v3 = vunpack.c.h.bf16 %v8873_v50 }
  0xc9   :  { %v798_v50 = vsel %vm249_vm0, %v633_v43, 0.0  ;;  %v8924_v43 = vld [vmem:[%s9475_s1 + $0x118] sm:$0xff] }
  0xca   :  { %v707_v18 = vsel %vm249_vm0, %v578_v2, 0.0 }
  0xcb   :  { %2779 = vmatpush1.bf16.msra.mxu0 %v7573_v4  ;;  %2943 = vmatpush1.bf16.msra.mxu1 %v7576_v7  ;;  %v7603_v4 = vld [vmem:[#allocation5 + $0xc40] ss:$16 sps:$4 sm:$0xff]   ;;  %v626_v7 = vunpack.c.h.bf16 %v8885_v56 }
  0xcc   :  { %2780 = vmatprep.subr.bf16.mxu0 %v7581_v8  ;;  %2944 = vmatprep.subr.bf16.mxu1 %v7584_v9  ;;  %v704_v8 = vadd.f32 %v703_v0, %v554_v51  ;;  %v808_v9 = vadd.f32 %v807_v1, %v610_v52  ;;  %v7624_v51 = vld [vmem:[#allocation5 + $0xca8] ss:$16 sps:$4 sm:$0xff]   ;;  %v7629_v52 = vld [vmem:[#allocation5 + $0xcc4] ss:$16 sps:$4 sm:$0xff]   ;;  %v7638_v1 = vld [vmem:[#allocation5 + $0xcec] ss:$16 sps:$4 sm:$0xff]  }
  0xcd   :  { %v7635_v0 = vld [vmem:[#allocation5 + $0xce4] ss:$16 sps:$4 sm:$0xff]  }
  0xcf   :  { %2781 = vmatpush1.bf16.msra.mxu0 %v7579_v10  ;;  %2945 = vmatpush1.bf16.msra.mxu1 %v7582_v13  ;;  %v7611_v10 = vld [vmem:[#allocation5 + $0xc64] ss:$16 sps:$4 sm:$0xff]   ;;  %v690_v13 = vadd.f32 %v689_v59, %v545_v57 }
  0xd0   :  { %2782 = vmatprep.subr.bf16.mxu0 %v7587_v14  ;;  %2946 = vmatprep.subr.bf16.mxu1 %v7590_v15  ;;  %v794_v14 = vadd.f32 %v793_v60, %v601_v58  ;;  %v7614_v15 = vld [vmem:[#allocation5 + $0xc6c] ss:$16 sps:$4 sm:$0xff]   ;;  %v7627_v60 = vld [vmem:[#allocation5 + $0xcc0] ss:$16 sps:$4 sm:$0xff]  }
  0xd2   :  { %v795_v28 = vadd.f32 %v794_v14, %v609_v12  ;;  %v7639_v14 = vld [vmem:[#allocation5 + $0xd00] ss:$16 sps:$4 sm:$0xff]  }
  0xd3   :  { %2783 = vmatpush1.bf16.msra.mxu0 %v7585_v16  ;;  %2947 = vmatpush1.bf16.msra.mxu1 %v7588_v17  ;;  %v705_v16 = vadd.f32 %v704_v8, %v562_v62  ;;  %v809_v17 = vadd.f32 %v808_v9, %v618_v63 }
  0xd4   :  { %2793 = vmatprep.subr.bf16.mxu0 %v7593_v19  ;;  %2957 = vmatprep.subr.bf16.mxu1 %v7596_v22  ;;  %v811_v19 = vsel %vm249_vm0, %v634_v3, 0.0 }
  0xd5   :  { %v706_v22 = vadd.f32 %v705_v16, %v570_v6  ;;  %v810_v23 = vadd.f32 %v809_v17, %v626_v7  ;;  %v7636_v7 = vld [vmem:[#allocation5 + $0xce8] ss:$16 sps:$4 sm:$0xff]  }
  0xd6   :  { %2785 = vmatmul.mubr.bf16.vlgmr.msra.gmra.mrb[0].mxu0 %v1417_v27  ;;  %2949 = vmatmul.mubr.bf16.vlgmr.msra.gmra.mrb[0].mxu1 %v1417_v27  ;;  %v691_v27 = vadd.f32 %v690_v13, %v553_v11  ;;  %v7644_v11 = vld [vmem:[#allocation5 + $0xd0c] ss:$16 sps:$4 sm:$0xff]   ;;  %v7642_v16 = vld [vmem:[#allocation5 + $0xd08] ss:$16 sps:$4 sm:$0xff]  }
  0xd7   :  { %2794 = vmatpush1.bf16.msra.mxu0 %v7591_v25  ;;  %2958 = vmatpush1.bf16.msra.mxu1 %v7594_v26  ;;  %v561_v25 = vunpack.c.l.bf16 %v8858_v42  ;;  %v617_v26 = vunpack.c.l.bf16 %v8863_v47  ;;  %v577_v42 = vunpack.c.l.bf16 %v8868_v49 }
  0xd8   :  { %2795 = vmatprep.subr.bf16.mxu0 %v7599_v30  ;;  %2959 = vmatprep.subr.bf16.mxu1 %v7602_v31  ;;  %v708_v30 = vadd.f32 %v707_v18, %v706_v22  ;;  %v812_v31 = vadd.f32 %v811_v19, %v810_v23  ;;  %v7645_v22 = vld [vmem:[#allocation5 + $0xd20] ss:$16 sps:$4 sm:$0xff]   ;;  %v7648_v23 = vld [vmem:[#allocation5 + $0xd28] ss:$16 sps:$4 sm:$0xff]  }
  0xd9   :  { %v692_v38 = vadd.f32 %v691_v27, %v561_v25  ;;  %v796_v39 = vadd.f32 %v795_v28, %v617_v26  ;;  %v694_v49 = vsel %vm249_vm0, %v577_v42, 0.0  ;;  %v7653_v26 = vld [vmem:[#allocation5 + $0xd44] ss:$16 sps:$4 sm:$0xff]   ;;  %v7656_v27 = vld [vmem:[#allocation5 + $0xd4c] ss:$16 sps:$4 sm:$0xff]  }
  0xda   :  { %v709_v33 = vrot.slane %v708_v30, 4  ;;  %v813_v34 = vrot.slane %v812_v31, 4  ;;  %v7651_v28 = vld [vmem:[#allocation5 + $0xd40] ss:$16 sps:$4 sm:$0xff]  }
  0xdb   :  { %2796 = vmatpush1.bf16.msra.mxu0 %v7597_v45  ;;  %2960 = vmatpush1.bf16.msra.mxu1 %v7600_v46  ;;  %v7621_v46 = vld [vmem:[#allocation5 + $0xca0] ss:$16 sps:$4 sm:$0xff]   ;;  %v693_v53 = vadd.f32 %v692_v38, %v569_v36  ;;  %v797_v54 = vadd.f32 %v796_v39, %v625_v37  ;;  %v7665_v36 = vld [vmem:[#allocation5 + $0xd84] ss:$16 sps:$4 sm:$0xff]  }
  0xdc   :  { %2797 = vmatprep.subr.bf16.mxu0 %v7605_v48  ;;  %2961 = vmatprep.subr.bf16.mxu1 %v7608_v61  ;;  %v710_v44 = vadd.f32 %v709_v33, %v708_v30  ;;  %v814_v45 = vadd.f32 %v813_v34, %v812_v31  ;;  %v7630_v61 = vld [vmem:[#allocation5 + $0xcc8] ss:$16 sps:$4 sm:$0xff]   ;;  %v7662_v33 = vld [vmem:[#allocation5 + $0xd6c] ss:$16 sps:$4 sm:$0xff]   ;;  %v7657_v34 = vld [vmem:[#allocation5 + $0xd60] ss:$16 sps:$4 sm:$0xff]  }
  0xdd   :  { %v695_v62 = vadd.f32 %v694_v49, %v693_v53  ;;  %v799_v63 = vadd.f32 %v798_v50, %v797_v54  ;;  %v8909_v39 = vld [vmem:[%s9475_s1 + $0x18] sm:$0xff]  ;;  %v596_v50 = vunpack.c.h.bf16 %v8924_v43 }
  0xde   :  { %v711_v47 = vrot.slane %v710_v44, 2  ;;  %v815_v48 = vrot.slane %v814_v45, 2  ;;  %v8919_v42 = vld [vmem:[%s9475_s1 + $0xf8] sm:$0xff] }
  0xdf   :  { %2798 = vmatpush1.bf16.msra.mxu0 %v7603_v4  ;;  %2962 = vmatpush1.bf16.msra.mxu1 %v7606_v5  ;;  %v7633_v4 = vld [vmem:[#allocation5 + $0xce0] ss:$16 sps:$4 sm:$0xff]   ;;  %v696_v8 = vrot.slane %v695_v62, 4  ;;  %v800_v9 = vrot.slane %v799_v63, 4  ;;  %v588_v54 = vunpack.c.h.bf16 %v8919_v42 }
  0xe0   :  { %2799 = vmatprep.subr.bf16.mxu0 %v7611_v10  ;;  %2963 = vmatprep.subr.bf16.mxu1 %v7614_v15  ;;  %v712_v56 = vadd.f32 %v711_v47, %v710_v44  ;;  %v816_v57 = vadd.f32 %v815_v48, %v814_v45  ;;  %v7641_v10 = vld [vmem:[#allocation5 + $0xd04] ss:$16 sps:$4 sm:$0xff]   ;;  %v7663_v44 = vld [vmem:[#allocation5 + $0xd80] ss:$16 sps:$4 sm:$0xff]   ;;  %v7666_v45 = vld [vmem:[#allocation5 + $0xd88] ss:$16 sps:$4 sm:$0xff]  }
  0xe1   :  { %v697_v18 = vadd.f32 %v696_v8, %v695_v62  ;;  %v801_v19 = vadd.f32 %v800_v9, %v799_v63  ;;  %v8934_v47 = vld [vmem:[%s9475_s1 + $0x138] sm:$0xff] }
  0xe2   :  { %v713_v58 = vrot.slane %v712_v56, 1  ;;  %v817_v59 = vrot.slane %v816_v57, 1  ;;  %v7671_v48 = vld [vmem:[#allocation5 + $0xda4] ss:$16 sps:$4 sm:$0xff]   ;;  %v7672_v62 = vld [vmem:[#allocation5 + $0xda8] ss:$16 sps:$4 sm:$0xff]  }
  0xe3   :  { %2800 = vmatpush1.bf16.msra.mxu0 %v7609_v20  ;;  %2964 = vmatpush1.bf16.msra.mxu1 %v7612_v21  ;;  %v7647_v20 = vld [vmem:[#allocation5 + $0xd24] ss:$16 sps:$4 sm:$0xff]   ;;  %v7650_v21 = vld [vmem:[#allocation5 + $0xd2c] ss:$16 sps:$4 sm:$0xff]   ;;  %v802_v25 = vrot.slane %v801_v19, 2 }
  0xe4   :  { %2801 = vmatprep.subr.bf16.mxu0 %v7617_v24  ;;  %2965 = vmatprep.subr.bf16.mxu1 %v7620_v29  ;;  %v714_v2 = vadd.f32 %v713_v58, %v712_v56  ;;  %v818_v3 = vadd.f32 %v817_v59, %v816_v57  ;;  %v698_v24 = vrot.slane %v697_v18, 2  ;;  %v7654_v29 = vld [vmem:[#allocation5 + $0xd48] ss:$16 sps:$4 sm:$0xff]  }
  0xe5   :  { %v803_v31 = vadd.f32 %v802_v25, %v801_v19  ;;  %v8942_v57 = vld [vmem:[%s9475_s1 + $0x78] sm:$0xff] }
  0xe6   :  { %v850_v5 = vpack.c.bf16 %v714_v2, %v714_v2  ;;  %v858_v6 = vpack.c.bf16 %v818_v3, %v818_v3  ;;  %v699_v30 = vadd.f32 %v698_v24, %v697_v18  ;;  %v8947_v49 = vld [vmem:[%s9475_s1 + $0x158] sm:$0xff]  ;;  %v556_v3 = vunpack.c.h.bf16 %v8942_v57 }
  0xe7   :  { %2802 = vmatpush1.bf16.msra.mxu0 %v7615_v32  ;;  %2966 = vmatpush1.bf16.msra.mxu1 %v7618_v35  ;;  %v7659_v32 = vld [vmem:[#allocation5 + $0xd64] ss:$16 sps:$4 sm:$0xff]   ;;  %v7660_v35 = vld [vmem:[#allocation5 + $0xd68] ss:$16 sps:$4 sm:$0xff]   ;;  %v804_v38 = vrot.slane %v803_v31, 1 }
  0xe8   :  { %2803 = vmatprep.subr.bf16.mxu0 %v7623_v40  ;;  %2967 = vmatprep.subr.bf16.mxu1 %v7626_v41  ;;  %v1395_v12 = vunpack.c.l.b16 %v850_v5  ;;  %v1403_v13 = vunpack.c.l.b16 %v858_v6  ;;  %v700_v37 = vrot.slane %v699_v30, 1  ;;  %v8914_v40 = vld [vmem:[%s9475_s1 + $0x38] sm:$0xff]  ;;  %v7668_v41 = vld [vmem:[#allocation5 + $0xd8c] ss:$16 sps:$4 sm:$0xff]   ;;  %v832_v6 = vadd.f32 %v596_v50, %v588_v54 }
  0xe9   :  { %v540_v53 = vunpack.c.h.bf16 %v8914_v40  ;;  %v805_v56 = vadd.f32 %v804_v38, %v803_v31  ;;  %v8953_v58 = vld [vmem:[%s9475_s1 + $0x98] sm:$0xff]  ;;  %v7692_v38 = vld [vmem:[#allocation5 + $0xe0c] ss:$16 sps:$4 sm:$0xff]   ;;  %v531_v54 = vunpack.c.l.bf16 %v8909_v39  ;;  %v595_v50 = vunpack.c.l.bf16 %v8924_v43 }
  0xea   :  { %v1412_v15 = vsel %vm1406_vm1, %v1403_v13, %v1395_v12  ;;  %v8960_v63 = vld [vmem:[%s9475_s1 + $0x178] sm:$0xff]  ;;  %v564_v12 = vunpack.c.h.bf16 %v8953_v58 }
  0xeb   :  { %2804 = vmatpush1.bf16.msra.mxu0 %v7621_v46  ;;  %2968 = vmatpush1.bf16.msra.mxu1 %v7624_v51  ;;  %v1420_v17 = vpack.c.b16 %v1412_v15, %v1412_v15  ;;  %v8929_v46 = vld [vmem:[%s9475_s1 + $0x58] sm:$0xff]  ;;  %v7674_v51 = vld [vmem:[#allocation5 + $0xdac] ss:$16 sps:$4 sm:$0xff]   ;;  %v857_v8 = vpack.c.bf16 %v805_v56, %v805_v56  ;;  %v620_v13 = vunpack.c.h.bf16 %v8960_v63  ;;  %v587_v56 = vunpack.c.l.bf16 %v8919_v42 }
  0xec   :  { %2805 = vmatprep.subr.bf16.mxu0 %v7629_v52  ;;  %2969 = vmatprep.subr.bf16.mxu1 %v7632_v55  ;;  %v532_v52 = vunpack.c.h.bf16 %v8909_v39  ;;  %v701_v55 = vadd.f32 %v700_v37, %v699_v30  ;;  %v548_v59 = vunpack.c.h.bf16 %v8929_v46  ;;  %v8970_v2 = vld [vmem:[%s9475_s1 + $0x1b8] sm:$0x11]  ;;  %v7678_v19 = vld [vmem:[#allocation5 + $0xdc8] ss:$16 sps:$4 sm:$0xff]   ;;  %v603_v42 = vunpack.c.l.bf16 %v8934_v47 }
  0xed   :  { %2825 = vmatprep.mubr.bf16.mxu0 %v1420_v17  ;;  %2989 = vmatprep.mubr.bf16.mxu1 %v1420_v17  ;;  %v8977_v9 = vld [vmem:[%s9475_s1 + $0xb8] sm:$0xff]  ;;  %v636_v17 = vunpack.c.h.bf16 %v8970_v2  ;;  %v819_v43 = vadd.f32 %v595_v50, %v587_v56 }
  0xee   :  { %v728_v5 = vadd.f32 %v540_v53, %v532_v52  ;;  %v7675_v18 = vld [vmem:[#allocation5 + $0xdc0] ss:$16 sps:$4 sm:$0xff]   ;;  %v7683_v24 = vld [vmem:[#allocation5 + $0xde4] ss:$16 sps:$4 sm:$0xff]   ;;  %v7690_v53 = vld [vmem:[#allocation5 + $0xe08] ss:$16 sps:$4 sm:$0xff]  }
  0xef   :  { %2806 = vmatpush1.bf16.msra.mxu0 %v7627_v60  ;;  %2970 = vmatpush1.bf16.msra.mxu1 %v7630_v61  ;;  %v604_v60 = vunpack.c.h.bf16 %v8934_v47  ;;  %v7669_v61 = vld [vmem:[#allocation5 + $0xda0] ss:$16 sps:$4 sm:$0xff]   ;;  %v837_v31 = vsel %vm249_vm0, %v636_v17, 0.0  ;;  %v7696_v39 = vld [vmem:[#allocation5 + $0xe28] ss:$16 sps:$4 sm:$0xff]   ;;  %v820_v47 = vadd.f32 %v819_v43, %v603_v42 }
  0xf0   :  { %2807 = vmatprep.subr.bf16.mxu0 %v7635_v0  ;;  %2971 = vmatprep.subr.bf16.mxu1 %v7638_v1  ;;  %v7677_v0 = vld [vmem:[#allocation5 + $0xdc4] ss:$16 sps:$4 sm:$0xff]   ;;  %v7723_v56 = vld [vmem:[#allocation5 + $0xec0] ss:$16 sps:$4 sm:$0xff]   ;;  %v7740_v42 = vld [vmem:[#allocation5 + $0xf0c] ss:$16 sps:$4 sm:$0xff]  }
  0xf1   :  { %v8965_v1 = vld [vmem:[%s9475_s1 + $0xd8] sm:$0x11]  ;;  %v833_v15 = vadd.f32 %v832_v6, %v604_v60  ;;  %v7698_v60 = vld [vmem:[#allocation5 + $0xe2c] ss:$16 sps:$4 sm:$0xff]  }
  0xf2   :  { %v7701_v6 = vld [vmem:[#allocation5 + $0xe44] ss:$16 sps:$4 sm:$0xff]   ;;  %v9028_v43 = vld [vmem:[%s9474_s0 + $0x100] sm:$0xff] }
  0xf3   :  { %2808 = vmatpush1.bf16.msra.mxu0 %v7633_v4  ;;  %2972 = vmatpush1.bf16.msra.mxu1 %v7636_v7  ;;  %v612_v4 = vunpack.c.h.bf16 %v8947_v49  ;;  %v849_v7 = vpack.c.bf16 %v701_v55, %v701_v55  ;;  %v539_v55 = vunpack.c.l.bf16 %v8914_v40  ;;  %v547_v40 = vunpack.c.l.bf16 %v8929_v46 }
  0xf4   :  { %2809 = vmatprep.subr.bf16.mxu0 %v7641_v10  ;;  %2973 = vmatprep.subr.bf16.mxu1 %v7644_v11  ;;  %v8982_v10 = vld [vmem:[%s9475_s1 + $0x198] sm:$0xff]  ;;  %v7680_v11 = vld [vmem:[#allocation5 + $0xdcc] ss:$16 sps:$4 sm:$0xff]   ;;  %v611_v46 = vunpack.c.l.bf16 %v8947_v49 }
  0xf5   :  { %v1394_v25 = vunpack.c.l.b16 %v849_v7  ;;  %v7704_v7 = vld [vmem:[#allocation5 + $0xe4c] ss:$16 sps:$4 sm:$0xff]  }
  0xf6   :  { %v821_v49 = vadd.f32 %v820_v47, %v611_v46  ;;  %v9046_v47 = vld [vmem:[%s9474_s0 + $0x60] sm:$0xff] }
  0xf7   :  { %2810 = vmatpush1.bf16.msra.mxu0 %v7639_v14  ;;  %2974 = vmatpush1.bf16.msra.mxu1 %v7642_v16  ;;  %v729_v14 = vadd.f32 %v728_v5, %v548_v59  ;;  %v580_v16 = vunpack.c.h.bf16 %v8965_v1  ;;  %v7695_v59 = vld [vmem:[#allocation5 + $0xe24] ss:$16 sps:$4 sm:$0xff]   ;;  %v715_v5 = vadd.f32 %v539_v55, %v531_v54 }
  0xf8   :  { %2811 = vmatprep.subr.bf16.mxu0 %v7647_v20  ;;  %2975 = vmatprep.subr.bf16.mxu1 %v7650_v21  ;;  %v572_v20 = vunpack.c.h.bf16 %v8977_v9  ;;  %v628_v21 = vunpack.c.h.bf16 %v8982_v10 }
  0xf9   :  { %v733_v30 = vsel %vm249_vm0, %v580_v16, 0.0  ;;  %v555_v16 = vunpack.c.l.bf16 %v8942_v57  ;;  %v716_v17 = vadd.f32 %v715_v5, %v547_v40  ;;  %v619_v57 = vunpack.c.l.bf16 %v8960_v63  ;;  %v9018_v40 = vld [vmem:[%s9474_s0 + $0x20] sm:$0xff] }
  0xfa   :  { %v9023_v5 = vld [vmem:[%s9474_s0 + $0xe0] sm:$0xff] }
  0xfb   :  { %2812 = vmatpush1.bf16.msra.mxu0 %v7645_v22  ;;  %2976 = vmatpush1.bf16.msra.mxu1 %v7648_v23  ;;  %v730_v22 = vadd.f32 %v729_v14, %v556_v3  ;;  %v834_v23 = vadd.f32 %v833_v15, %v612_v4  ;;  %v7693_v4 = vld [vmem:[#allocation5 + $0xe20] ss:$16 sps:$4 sm:$0xff]   ;;  %v7702_v15 = vld [vmem:[#allocation5 + $0xe48] ss:$16 sps:$4 sm:$0xff]  }
  0xfc   :  { %2813 = vmatprep.subr.bf16.mxu0 %v7653_v26  ;;  %2977 = vmatprep.subr.bf16.mxu1 %v7656_v27  ;;  %v1402_v26 = vunpack.c.l.b16 %v857_v8  ;;  %v7686_v27 = vld [vmem:[#allocation5 + $0xdec] ss:$16 sps:$4 sm:$0xff]   ;;  %v7699_v14 = vld [vmem:[#allocation5 + $0xe40] ss:$16 sps:$4 sm:$0xff]  }
  0xfe   :  { %v1411_v37 = vsel %vm1406_vm1, %v1402_v26, %v1394_v25  ;;  %v7708_v25 = vld [vmem:[#allocation5 + $0xe68] ss:$16 sps:$4 sm:$0xff]   ;;  %v563_v26 = vunpack.c.l.bf16 %v8953_v58  ;;  %v627_v58 = vunpack.c.l.bf16 %v8982_v10 }
  0xff   :  { %2814 = vmatpush1.bf16.msra.mxu0 %v7651_v28  ;;  %2978 = vmatpush1.bf16.msra.mxu1 %v7654_v29  ;;  %v731_v28 = vadd.f32 %v730_v22, %v564_v12  ;;  %v835_v29 = vadd.f32 %v834_v23, %v620_v13  ;;  %v7705_v22 = vld [vmem:[#allocation5 + $0xe60] ss:$16 sps:$4 sm:$0xff]  }
 0x100   :  { %2815 = vmatprep.subr.bf16.mxu0 %v7659_v32  ;;  %2979 = vmatprep.subr.bf16.mxu1 %v7662_v33  ;;  %v7681_v32 = vld [vmem:[#allocation5 + $0xde0] ss:$16 sps:$4 sm:$0xff]   ;;  %v7684_v33 = vld [vmem:[#allocation5 + $0xde8] ss:$16 sps:$4 sm:$0xff]  }
 0x103   :  { %2816 = vmatpush1.bf16.msra.mxu0 %v7657_v34  ;;  %2980 = vmatpush1.bf16.msra.mxu1 %v7660_v35  ;;  %v732_v34 = vadd.f32 %v731_v28, %v572_v20  ;;  %v836_v35 = vadd.f32 %v835_v29, %v628_v21  ;;  %v7713_v28 = vld [vmem:[#allocation5 + $0xe84] ss:$16 sps:$4 sm:$0xff]   ;;  %v7716_v29 = vld [vmem:[#allocation5 + $0xe8c] ss:$16 sps:$4 sm:$0xff]  }
 0x104   :  { %2817 = vmatprep.subr.bf16.mxu0 %v7665_v36  ;;  %2981 = vmatprep.subr.bf16.mxu1 %v7668_v41  ;;  %v7689_v36 = vld [vmem:[#allocation5 + $0xe04] ss:$16 sps:$4 sm:$0xff]  }
 0x105   :  { %v734_v41 = vadd.f32 %v733_v30, %v732_v34 }
 0x107   :  { %2818 = vmatpush1.bf16.msra.mxu0 %v7663_v44  ;;  %2982 = vmatpush1.bf16.msra.mxu1 %v7666_v45  ;;  %v838_v44 = vadd.f32 %v837_v31, %v836_v35  ;;  %v7687_v45 = vld [vmem:[#allocation5 + $0xe00] ss:$16 sps:$4 sm:$0xff]   ;;  %v7714_v35 = vld [vmem:[#allocation5 + $0xe88] ss:$16 sps:$4 sm:$0xff]  }
 0x108   :  { %2819 = vmatprep.subr.bf16.mxu0 %v7671_v48  ;;  %2983 = vmatprep.subr.bf16.mxu1 %v7674_v51  ;;  %v1419_v48 = vpack.c.b16 %v1411_v37, %v1411_v37  ;;  %v735_v51 = vrot.slane %v734_v41, 4  ;;  %v822_v37 = vadd.f32 %v821_v49, %v619_v57  ;;  %v9069_v57 = vld [vmem:[%s9474_s0 + $0xc0] sm:$0x11]  ;;  %v157_v49 = vunpack.c.h.bf16 %v9046_v47 }
 0x109   :  { %v839_v52 = vrot.slane %v838_v44, 4 }
 0x10a   :  { %v823_v10 = vadd.f32 %v822_v37, %v627_v58 }
 0x10b   :  { %2820 = vmatpush1.bf16.msra.mxu0 %v7669_v61  ;;  %2984 = vmatpush1.bf16.msra.mxu1 %v7672_v62  ;;  %v736_v61 = vadd.f32 %v735_v51, %v734_v41  ;;  %v840_v62 = vadd.f32 %v839_v52, %v838_v44  ;;  %v7722_v41 = vld [vmem:[#allocation5 + $0xeac] ss:$16 sps:$4 sm:$0xff]   ;;  %v579_v44 = vunpack.c.l.bf16 %v8965_v1  ;;  %v7725_v51 = vld [vmem:[#allocation5 + $0xec4] ss:$16 sps:$4 sm:$0xff]   ;;  %v7726_v1 = vld [vmem:[#allocation5 + $0xec8] ss:$16 sps:$4 sm:$0xff]  }
 0x10c   :  { %2821 = vmatprep.subr.bf16.mxu0 %v7677_v0  ;;  %2985 = vmatprep.subr.bf16.mxu1 %v7680_v11 }
 0x10d   :  { %v737_v0 = vrot.slane %v736_v61, 2  ;;  %v841_v3 = vrot.slane %v840_v62, 2  ;;  %v720_v54 = vsel %vm249_vm0, %v579_v44, 0.0  ;;  %v7747_v44 = vld [vmem:[#allocation5 + $0xf40] ss:$16 sps:$4 sm:$0xff]  }
 0x10f   :  { %2822 = vmatpush1.bf16.msra.mxu0 %v7675_v18  ;;  %2986 = vmatpush1.bf16.msra.mxu1 %v7678_v19  ;;  %v738_v8 = vadd.f32 %v737_v0, %v736_v61  ;;  %v842_v11 = vadd.f32 %v841_v3, %v840_v62  ;;  %v7707_v18 = vld [vmem:[#allocation5 + $0xe64] ss:$16 sps:$4 sm:$0xff]   ;;  %v7710_v19 = vld [vmem:[#allocation5 + $0xe6c] ss:$16 sps:$4 sm:$0xff]   ;;  %v7729_v61 = vld [vmem:[#allocation5 + $0xee0] ss:$16 sps:$4 sm:$0xff]  }
 0x110   :  { %2823 = vmatprep.subr.bf16.mxu0 %v7683_v24  ;;  %2987 = vmatprep.subr.bf16.mxu1 %v7686_v27  ;;  %v717_v27 = vadd.f32 %v716_v17, %v555_v16  ;;  %v7732_v62 = vld [vmem:[#allocation5 + $0xee8] ss:$16 sps:$4 sm:$0xff]   ;;  %v7737_v0 = vld [vmem:[#allocation5 + $0xf04] ss:$16 sps:$4 sm:$0xff]   ;;  %v189_v16 = vunpack.c.h.bf16 %v9023_v5 }
 0x111   :  { %v739_v12 = vrot.slane %v738_v8, 1  ;;  %v843_v13 = vrot.slane %v842_v11, 1 }
 0x112   :  { %v718_v63 = vadd.f32 %v717_v27, %v563_v26  ;;  %v7749_v26 = vld [vmem:[#allocation5 + $0xf44] ss:$16 sps:$4 sm:$0xff]   ;;  %v9074_v27 = vld [vmem:[%s9474_s0 + $0x1a0] sm:$0x11] }
 0x113   :  { %2824 = vmatpush1.bf16.msra.mxu0 %v7681_v32  ;;  %2988 = vmatpush1.bf16.msra.mxu1 %v7684_v33  ;;  %v740_v20 = vadd.f32 %v739_v12, %v738_v8  ;;  %v844_v21 = vadd.f32 %v843_v13, %v842_v11  ;;  %v7711_v32 = vld [vmem:[#allocation5 + $0xe80] ss:$16 sps:$4 sm:$0xff]   ;;  %v571_v33 = vunpack.c.l.bf16 %v8977_v9  ;;  %v7720_v9 = vld [vmem:[#allocation5 + $0xea8] ss:$16 sps:$4 sm:$0xff]   ;;  %v7743_v12 = vld [vmem:[#allocation5 + $0xf24] ss:$16 sps:$4 sm:$0xff]  }
 0x114   :  { %2834 = vmatprep.subr.bf16.mxu0 %v7689_v36  ;;  %2998 = vmatprep.subr.bf16.mxu1 %v7692_v38  ;;  %v7719_v38 = vld [vmem:[#allocation5 + $0xea4] ss:$16 sps:$4 sm:$0xff]   ;;  %v9033_v8 = vld [vmem:[%s9474_s0 + $0x40] sm:$0xff] }
 0x115   :  { %v852_v23 = vpack.c.bf16 %v740_v20, %v740_v20  ;;  %v860_v24 = vpack.c.bf16 %v844_v21, %v844_v21  ;;  %v719_v52 = vadd.f32 %v718_v63, %v571_v33  ;;  %v9038_v11 = vld [vmem:[%s9474_s0 + $0x120] sm:$0xff]  ;;  %v149_v21 = vunpack.c.h.bf16 %v9033_v8 }
 0x116   :  { %2826 = vmatmul.mubr.bf16.vlgmr.msra.gmra.mrb[0].mxu0 %v1419_v48  ;;  %2990 = vmatmul.mubr.bf16.vlgmr.msra.gmra.mrb[0].mxu1 %v1419_v48  ;;  %v7717_v48 = vld [vmem:[#allocation5 + $0xea0] ss:$16 sps:$4 sm:$0xff]   ;;  %v7746_v13 = vld [vmem:[#allocation5 + $0xf2c] ss:$16 sps:$4 sm:$0xff]  }
 0x117   :  { %2835 = vmatpush1.bf16.msra.mxu0 %v7687_v45  ;;  %2999 = vmatpush1.bf16.msra.mxu1 %v7690_v53  ;;  %v1397_v30 = vunpack.c.l.b16 %v852_v23  ;;  %v1405_v31 = vunpack.c.l.b16 %v860_v24  ;;  %v635_v45 = vunpack.c.l.bf16 %v8970_v2  ;;  %v7728_v53 = vld [vmem:[#allocation5 + $0xecc] ss:$16 sps:$4 sm:$0xff]   ;;  %v721_v2 = vadd.f32 %v720_v54, %v719_v52  ;;  %v7741_v23 = vld [vmem:[#allocation5 + $0xf20] ss:$16 sps:$4 sm:$0xff]   ;;  %v7744_v24 = vld [vmem:[#allocation5 + $0xf28] ss:$16 sps:$4 sm:$0xff]  }
 0x118   :  { %2836 = vmatprep.subr.bf16.mxu0 %v7695_v59  ;;  %3000 = vmatprep.subr.bf16.mxu1 %v7698_v60  ;;  %v7731_v59 = vld [vmem:[#allocation5 + $0xee4] ss:$16 sps:$4 sm:$0xff]   ;;  %v7734_v60 = vld [vmem:[#allocation5 + $0xeec] ss:$16 sps:$4 sm:$0xff]  }
 0x119   :  { %v1414_v34 = vsel %vm1406_vm1, %v1405_v31, %v1397_v30  ;;  %v824_v55 = vsel %vm249_vm0, %v635_v45, 0.0  ;;  %v722_v3 = vrot.slane %v721_v2, 4  ;;  %v9057_v20 = vld [vmem:[%s9474_s0 + $0x80] sm:$0xff] }
 0x11a   :  { %v1422_v36 = vpack.c.b16 %v1414_v34, %v1414_v34  ;;  %v825_v50 = vadd.f32 %v824_v55, %v823_v10  ;;  %v9081_v33 = vld [vmem:[%s9474_s0 + $0xa0] sm:$0xff]  ;;  %v165_v58 = vunpack.c.h.bf16 %v9057_v20  ;;  %v7755_v10 = vld [vmem:[#allocation5 + $0xf64] ss:$16 sps:$4 sm:$0xff]  }
 0x11b   :  { %2837 = vmatpush1.bf16.msra.mxu0 %v7693_v4  ;;  %3001 = vmatpush1.bf16.msra.mxu1 %v7696_v39  ;;  %v9013_v39 = vld [vmem:[%s9474_s0] sm:$0xff]  ;;  %v723_v46 = vadd.f32 %v722_v3, %v721_v2 }
 0x11c   :  { %2838 = vmatprep.subr.bf16.mxu0 %v7701_v6  ;;  %3002 = vmatprep.subr.bf16.mxu1 %v7704_v7  ;;  %v826_v4 = vrot.slane %v825_v50, 4  ;;  %v7735_v6 = vld [vmem:[#allocation5 + $0xf00] ss:$16 sps:$4 sm:$0xff]   ;;  %v7738_v7 = vld [vmem:[#allocation5 + $0xf08] ss:$16 sps:$4 sm:$0xff]  }
 0x11d   :  { %2866 = vmatprep.mubr.bf16.mxu0 %v1422_v36  ;;  %3030 = vmatprep.mubr.bf16.mxu1 %v1422_v36  ;;  %v724_v31 = vrot.slane %v723_v46, 2  ;;  %v9086_v34 = vld [vmem:[%s9474_s0 + $0x180] sm:$0xff] }
 0x11e   :  { %v827_v17 = vadd.f32 %v826_v4, %v825_v50  ;;  %v7750_v45 = vld [vmem:[#allocation5 + $0xf48] ss:$16 sps:$4 sm:$0xff]   ;;  %v7758_v55 = vld [vmem:[#allocation5 + $0xf6c] ss:$16 sps:$4 sm:$0xff]  }
 0x11f   :  { %2839 = vmatpush1.bf16.msra.mxu0 %v7699_v14  ;;  %3003 = vmatpush1.bf16.msra.mxu1 %v7702_v15  ;;  %v133_v14 = vunpack.c.h.bf16 %v9013_v39  ;;  %v141_v15 = vunpack.c.h.bf16 %v9018_v40 }
 0x120   :  { %2840 = vmatprep.subr.bf16.mxu0 %v7707_v18  ;;  %3004 = vmatprep.subr.bf16.mxu1 %v7710_v19  ;;  %v9051_v18 = vld [vmem:[%s9474_s0 + $0x140] sm:$0xff]  ;;  %v197_v19 = vunpack.c.h.bf16 %v9028_v43 }
 0x122   :  { %v362_v30 = vadd.f32 %v197_v19, %v189_v16  ;;  %v7770_v19 = vld [vmem:[#allocation5 + $0xfac] ss:$16 sps:$4 sm:$0xff]  }
 0x123   :  { %2841 = vmatpush1.bf16.msra.mxu0 %v7705_v22  ;;  %3005 = vmatpush1.bf16.msra.mxu1 %v7708_v25  ;;  %v205_v22 = vunpack.c.h.bf16 %v9038_v11  ;;  %v9064_v25 = vld [vmem:[%s9474_s0 + $0x160] sm:$0xff] }
 0x124   :  { %2842 = vmatprep.subr.bf16.mxu0 %v7713_v28  ;;  %3006 = vmatprep.subr.bf16.mxu1 %v7716_v29  ;;  %v213_v28 = vunpack.c.h.bf16 %v9051_v18  ;;  %v258_v29 = vadd.f32 %v141_v15, %v133_v14  ;;  %v221_v36 = vunpack.c.h.bf16 %v9064_v25  ;;  %v7762_v15 = vld [vmem:[#allocation5 + $0xf88] ss:$16 sps:$4 sm:$0xff]  }
 0x125   :  { %v363_v37 = vadd.f32 %v362_v30, %v205_v22  ;;  %v7773_v30 = vld [vmem:[#allocation5 + $0xfc4] ss:$16 sps:$4 sm:$0xff]  }
 0x126   :  { %v259_v63 = vadd.f32 %v258_v29, %v149_v21 }
 0x127   :  { %2843 = vmatpush1.bf16.msra.mxu0 %v7711_v32  ;;  %3007 = vmatpush1.bf16.msra.mxu1 %v7714_v35  ;;  %v828_v32 = vrot.slane %v827_v17, 2  ;;  %v7752_v35 = vld [vmem:[#allocation5 + $0xf4c] ss:$16 sps:$4 sm:$0xff]   ;;  %v364_v52 = vadd.f32 %v363_v37, %v213_v28  ;;  %v7774_v37 = vld [vmem:[#allocation5 + $0xfc8] ss:$16 sps:$4 sm:$0xff]  }
 0x128   :  { %2844 = vmatprep.subr.bf16.mxu0 %v7719_v38  ;;  %3008 = vmatprep.subr.bf16.mxu1 %v7722_v41  ;;  %v181_v38 = vunpack.c.h.bf16 %v9069_v57  ;;  %v237_v41 = vunpack.c.h.bf16 %v9074_v27 }
 0x129   :  { %v829_v54 = vadd.f32 %v828_v32, %v827_v17  ;;  %v7767_v17 = vld [vmem:[#allocation5 + $0xfa4] ss:$16 sps:$4 sm:$0xff]  }
 0x12a   :  { %v263_v2 = vsel %vm249_vm0, %v181_v38, 0.0  ;;  %v367_v50 = vsel %vm249_vm0, %v237_v41, 0.0 }
 0x12b   :  { %2845 = vmatpush1.bf16.msra.mxu0 %v7717_v48  ;;  %3009 = vmatpush1.bf16.msra.mxu1 %v7720_v9  ;;  %v173_v48 = vunpack.c.h.bf16 %v9081_v33  ;;  %v229_v9 = vunpack.c.h.bf16 %v9086_v34  ;;  %v830_v4 = vrot.slane %v829_v54, 1 }
 0x12c   :  { %2846 = vmatprep.subr.bf16.mxu0 %v7725_v51  ;;  %3010 = vmatprep.subr.bf16.mxu1 %v7728_v53  ;;  %v260_v51 = vadd.f32 %v259_v63, %v157_v49  ;;  %v725_v53 = vadd.f32 %v724_v31, %v723_v46  ;;  %v7768_v49 = vld [vmem:[#allocation5 + $0xfa8] ss:$16 sps:$4 sm:$0xff]   ;;  %v7776_v31 = vld [vmem:[#allocation5 + $0xfcc] ss:$16 sps:$4 sm:$0xff]   ;;  %v7771_v63 = vld [vmem:[#allocation5 + $0xfc0] ss:$16 sps:$4 sm:$0xff]  }
 0x12d   :  { %v831_v46 = vadd.f32 %v830_v4, %v829_v54  ;;  %v196_v4 = vunpack.c.l.bf16 %v9028_v43  ;;  %v7800_v43 = vld [vmem:[#allocation5 + $0x4c] ss:$16 sps:$4 sm:$0xff]  }
 0x12e   :  { %v726_v3 = vrot.slane %v725_v53, 1 }
 0x12f   :  { %2847 = vmatpush1.bf16.msra.mxu0 %v7723_v56  ;;  %3011 = vmatpush1.bf16.msra.mxu1 %v7726_v1  ;;  %v261_v56 = vadd.f32 %v260_v51, %v165_v58  ;;  %v365_v1 = vadd.f32 %v364_v52, %v221_v36  ;;  %v859_v29 = vpack.c.bf16 %v831_v46, %v831_v46  ;;  %v7777_v51 = vld [vmem:[#allocation5 + $0xfe0] ss:$16 sps:$4 sm:$0xff]   ;;  %v7798_v46 = vld [vmem:[#allocation5 + $0x48] ss:$16 sps:$4 sm:$0xff]  }
 0x130   :  { %2848 = vmatprep.subr.bf16.mxu0 %v7731_v59  ;;  %3012 = vmatprep.subr.bf16.mxu1 %v7734_v60  ;;  %v7753_v59 = vld [vmem:[#allocation5 + $0xf60] ss:$16 sps:$4 sm:$0xff]   ;;  %v7756_v60 = vld [vmem:[#allocation5 + $0xf68] ss:$16 sps:$4 sm:$0xff]   ;;  %v727_v16 = vadd.f32 %v726_v3, %v725_v53  ;;  %v188_v3 = vunpack.c.l.bf16 %v9023_v5  ;;  %v7797_v5 = vld [vmem:[#allocation5 + $0x44] ss:$16 sps:$4 sm:$0xff]  }
 0x131   :  { %v1404_v41 = vunpack.c.l.b16 %v859_v29  ;;  %v7780_v53 = vld [vmem:[#allocation5 + $0xfe8] ss:$16 sps:$4 sm:$0xff]  }
 0x132   :  { %v851_v28 = vpack.c.bf16 %v727_v16, %v727_v16  ;;  %v7795_v16 = vld [vmem:[#allocation5 + $0x40] ss:$16 sps:$4 sm:$0xff]  }
 0x133   :  { %2849 = vmatpush1.bf16.msra.mxu0 %v7729_v61  ;;  %3013 = vmatpush1.bf16.msra.mxu1 %v7732_v62  ;;  %v262_v61 = vadd.f32 %v261_v56, %v173_v48  ;;  %v366_v62 = vadd.f32 %v365_v1, %v229_v9  ;;  %v7788_v56 = vld [vmem:[#allocation5 + $0xc] ss:$16 sps:$4 sm:$0xff]  }
 0x134   :  { %2850 = vmatprep.subr.bf16.mxu0 %v7737_v0  ;;  %3014 = vmatprep.subr.bf16.mxu1 %v7740_v42  ;;  %v7761_v0 = vld [vmem:[#allocation5 + $0xf84] ss:$16 sps:$4 sm:$0xff]   ;;  %v7764_v42 = vld [vmem:[#allocation5 + $0xf8c] ss:$16 sps:$4 sm:$0xff]   ;;  %v1396_v38 = vunpack.c.l.b16 %v851_v28  ;;  %v220_v28 = vunpack.c.l.bf16 %v9064_v25 }
 0x135   :  { %v9126_v25 = vld [vmem:[%s9474_s0 + $0x108] sm:$0xff] }
 0x136   :  { %v1413_v54 = vsel %vm1406_vm1, %v1404_v41, %v1396_v38  ;;  %v7815_v38 = vld [vmem:[#allocation5 + $0xa4] ss:$16 sps:$4 sm:$0xff]   ;;  %v7818_v41 = vld [vmem:[#allocation5 + $0xac] ss:$16 sps:$4 sm:$0xff]  }
 0x137   :  { %2851 = vmatpush1.bf16.msra.mxu0 %v7735_v6  ;;  %3015 = vmatpush1.bf16.msra.mxu1 %v7738_v7  ;;  %v264_v6 = vadd.f32 %v263_v2, %v262_v61  ;;  %v368_v7 = vadd.f32 %v367_v50, %v366_v62  ;;  %v7783_v50 = vld [vmem:[#allocation5] ss:$16 sps:$4 sm:$0xff]   ;;  %v7786_v61 = vld [vmem:[#allocation5 + $0x8] ss:$16 sps:$4 sm:$0xff]   ;;  %v132_v62 = vunpack.c.l.bf16 %v9013_v39  ;;  %v204_v39 = vunpack.c.l.bf16 %v9038_v11  ;;  %v7803_v11 = vld [vmem:[#allocation5 + $0x64] ss:$16 sps:$4 sm:$0xff]  }
 0x138   :  { %2852 = vmatprep.subr.bf16.mxu0 %v7743_v12  ;;  %3016 = vmatprep.subr.bf16.mxu1 %v7746_v13  ;;  %v7759_v12 = vld [vmem:[#allocation5 + $0xf80] ss:$16 sps:$4 sm:$0xff]  }
 0x139   :  { %v265_v13 = vrot.slane %v264_v6, 4  ;;  %v369_v14 = vrot.slane %v368_v7, 4 }
 0x13b   :  { %2853 = vmatpush1.bf16.msra.mxu0 %v7741_v23  ;;  %3017 = vmatpush1.bf16.msra.mxu1 %v7744_v24  ;;  %v266_v21 = vadd.f32 %v265_v13, %v264_v6  ;;  %v370_v22 = vadd.f32 %v369_v14, %v368_v7  ;;  %v7794_v6 = vld [vmem:[#allocation5 + $0x2c] ss:$16 sps:$4 sm:$0xff]   ;;  %v7792_v13 = vld [vmem:[#allocation5 + $0x28] ss:$16 sps:$4 sm:$0xff]   ;;  %v148_v14 = vunpack.c.l.bf16 %v9033_v8 }
 0x13c   :  { %2854 = vmatprep.subr.bf16.mxu0 %v7749_v26  ;;  %3018 = vmatprep.subr.bf16.mxu1 %v7752_v35  ;;  %v7765_v26 = vld [vmem:[#allocation5 + $0xfa0] ss:$16 sps:$4 sm:$0xff]  }
 0x13d   :  { %v267_v23 = vrot.slane %v266_v21, 2  ;;  %v371_v24 = vrot.slane %v370_v22, 2 }
 0x13f   :  { %2855 = vmatpush1.bf16.msra.mxu0 %v7747_v44  ;;  %3019 = vmatpush1.bf16.msra.mxu1 %v7750_v45  ;;  %v268_v32 = vadd.f32 %v267_v23, %v266_v21  ;;  %v372_v35 = vadd.f32 %v371_v24, %v370_v22  ;;  %v7779_v44 = vld [vmem:[#allocation5 + $0xfe4] ss:$16 sps:$4 sm:$0xff]   ;;  %v7782_v45 = vld [vmem:[#allocation5 + $0xfec] ss:$16 sps:$4 sm:$0xff]   ;;  %v7801_v23 = vld [vmem:[#allocation5 + $0x60] ss:$16 sps:$4 sm:$0xff]  }
 0x140   :  { %2856 = vmatprep.subr.bf16.mxu0 %v7755_v10  ;;  %3020 = vmatprep.subr.bf16.mxu1 %v7758_v55  ;;  %v7785_v55 = vld [vmem:[#allocation5 + $0x4] ss:$16 sps:$4 sm:$0xff]   ;;  %v7806_v22 = vld [vmem:[#allocation5 + $0x6c] ss:$16 sps:$4 sm:$0xff]   ;;  %v7804_v24 = vld [vmem:[#allocation5 + $0x68] ss:$16 sps:$4 sm:$0xff]  }
 0x141   :  { %v269_v58 = vrot.slane %v268_v32, 1  ;;  %v373_v36 = vrot.slane %v372_v35, 1 }
 0x143   :  { %2857 = vmatpush1.bf16.msra.mxu0 %v7753_v59  ;;  %3021 = vmatpush1.bf16.msra.mxu1 %v7756_v60  ;;  %v270_v48 = vadd.f32 %v269_v58, %v268_v32  ;;  %v374_v9 = vadd.f32 %v373_v36, %v372_v35  ;;  %v1421_v59 = vpack.c.b16 %v1413_v54, %v1413_v54  ;;  %v7807_v32 = vld [vmem:[#allocation5 + $0x80] ss:$16 sps:$4 sm:$0xff]   ;;  %v7810_v35 = vld [vmem:[#allocation5 + $0x88] ss:$16 sps:$4 sm:$0xff]   ;;  %v172_v58 = vunpack.c.l.bf16 %v9081_v33 }
 0x144   :  { %2858 = vmatprep.subr.bf16.mxu0 %v7761_v0  ;;  %3022 = vmatprep.subr.bf16.mxu1 %v7764_v42  ;;  %v140_v0 = vunpack.c.l.bf16 %v9018_v40  ;;  %v7791_v42 = vld [vmem:[#allocation5 + $0x24] ss:$16 sps:$4 sm:$0xff]   ;;  %v180_v36 = vunpack.c.l.bf16 %v9069_v57 }
 0x145   :  { %v454_v52 = vpack.c.bf16 %v270_v48, %v270_v48  ;;  %v462_v10 = vpack.c.bf16 %v374_v9, %v374_v9  ;;  %v236_v48 = vunpack.c.l.bf16 %v9074_v27  ;;  %v9159_v27 = vld [vmem:[%s9474_s0 + $0x88] sm:$0xff] }
 0x146   :  { %v244_v40 = vadd.f32 %v140_v0, %v132_v62 }
 0x147   :  { %2859 = vmatpush1.bf16.msra.mxu0 %v7759_v12  ;;  %3023 = vmatpush1.bf16.msra.mxu1 %v7762_v15  ;;  %v3056_v1 = vunpack.c.l.b16 %v454_v52  ;;  %v3064_v2 = vunpack.c.l.b16 %v462_v10  ;;  %v7789_v12 = vld [vmem:[#allocation5 + $0x20] ss:$16 sps:$4 sm:$0xff]   ;;  %v349_v15 = vadd.f32 %v196_v4, %v188_v3  ;;  %v199_v10 = vunpack.c.h.bf16 %v9126_v25 }
 0x148   :  { %2860 = vmatprep.subr.bf16.mxu0 %v7767_v17  ;;  %3024 = vmatprep.subr.bf16.mxu1 %v7770_v19  ;;  %v156_v17 = vunpack.c.l.bf16 %v9046_v47  ;;  %v212_v19 = vunpack.c.l.bf16 %v9051_v18  ;;  %v245_v21 = vadd.f32 %v244_v40, %v148_v14  ;;  %v9111_v47 = vld [vmem:[%s9474_s0 + $0x8] sm:$0xff]  ;;  %v250_v4 = vsel %vm249_vm0, %v180_v36, 0.0 }
 0x149   :  { %v3072_v60 = vsel %vm1406_vm1, %v3064_v2, %v3056_v1  ;;  %v350_v8 = vadd.f32 %v349_v15, %v204_v39  ;;  %v9116_v18 = vld [vmem:[%s9474_s0 + $0x28] sm:$0xff]  ;;  %v167_v14 = vunpack.c.h.bf16 %v9159_v27 }
 0x14a   :  { %v3080_v7 = vpack.c.b16 %v3072_v60, %v3072_v60  ;;  %v246_v29 = vadd.f32 %v245_v21, %v156_v17  ;;  %v143_v33 = vunpack.c.h.bf16 %v9116_v18  ;;  %v9148_v52 = vld [vmem:[%s9474_s0 + $0x68] sm:$0xff] }
 0x14b   :  { %2861 = vmatpush1.bf16.msra.mxu0 %v7765_v26  ;;  %3025 = vmatpush1.bf16.msra.mxu1 %v7768_v49  ;;  %v7809_v26 = vld [vmem:[#allocation5 + $0x84] ss:$16 sps:$4 sm:$0xff]   ;;  %v164_v49 = vunpack.c.l.bf16 %v9057_v20  ;;  %v159_v60 = vunpack.c.h.bf16 %v9148_v52 }
 0x14c   :  { %2862 = vmatprep.subr.bf16.mxu0 %v7773_v30  ;;  %3026 = vmatprep.subr.bf16.mxu1 %v7776_v31  ;;  %v351_v30 = vadd.f32 %v350_v8, %v212_v19  ;;  %v7812_v31 = vld [vmem:[#allocation5 + $0x8c] ss:$16 sps:$4 sm:$0xff]   ;;  %v9121_v20 = vld [vmem:[%s9474_s0 + $0xe8] sm:$0xff] }
 0x14d   :  { %v191_v57 = vunpack.c.h.bf16 %v9121_v20  ;;  %v247_v9 = vadd.f32 %v246_v29, %v164_v49  ;;  %v9166_v1 = vld [vmem:[%s9474_s0 + $0x168] sm:$0xff] }
 0x14e   :  { %v7821_v2 = vld [vmem:[#allocation5 + $0xc4] ss:$16 sps:$4 sm:$0xff]   ;;  %v223_v39 = vunpack.c.h.bf16 %v9166_v1 }
 0x14f   :  { %2863 = vmatpush1.bf16.msra.mxu0 %v7771_v63  ;;  %3027 = vmatpush1.bf16.msra.mxu1 %v7774_v37  ;;  %v9133_v63 = vld [vmem:[%s9474_s0 + $0x48] sm:$0xff]  ;;  %v388_v0 = vadd.f32 %v199_v10, %v191_v57  ;;  %v248_v3 = vadd.f32 %v247_v9, %v172_v58 }
 0x150   :  { %2864 = vmatprep.subr.bf16.mxu0 %v7779_v44  ;;  %3028 = vmatprep.subr.bf16.mxu1 %v7782_v45  ;;  %v9138_v37 = vld [vmem:[%s9474_s0 + $0x128] sm:$0xff]  ;;  %v228_v44 = vunpack.c.l.bf16 %v9086_v34  ;;  %v135_v45 = vunpack.c.h.bf16 %v9111_v47 }
 0x151   :  { %v9153_v34 = vld [vmem:[%s9474_s0 + $0x148] sm:$0xff]  ;;  %v207_v54 = vunpack.c.h.bf16 %v9138_v37 }
 0x152   :  { %v284_v62 = vadd.f32 %v143_v33, %v135_v45  ;;  %v7833_v58 = vld [vmem:[#allocation5 + $0x104] ss:$16 sps:$4 sm:$0xff]   ;;  %v7831_v33 = vld [vmem:[#allocation5 + $0x100] ss:$16 sps:$4 sm:$0xff]   ;;  %v7834_v9 = vld [vmem:[#allocation5 + $0x108] ss:$16 sps:$4 sm:$0xff]  }
 0x153   :  { %2865 = vmatpush1.bf16.msra.mxu0 %v7777_v51  ;;  %3029 = vmatpush1.bf16.msra.mxu1 %v7780_v53  ;;  %v352_v51 = vadd.f32 %v351_v30, %v220_v28  ;;  %v151_v53 = vunpack.c.h.bf16 %v9133_v63  ;;  %v389_v15 = vadd.f32 %v388_v0, %v207_v54  ;;  %v7825_v30 = vld [vmem:[#allocation5 + $0xe0] ss:$16 sps:$4 sm:$0xff]   ;;  %v7842_v54 = vld [vmem:[#allocation5 + $0x12c] ss:$16 sps:$4 sm:$0xff]   ;;  %v7845_v0 = vld [vmem:[#allocation5 + $0x144] ss:$16 sps:$4 sm:$0xff]  }
 0x154   :  { %4375 = vmatprep.subr.bf16.mxu0 %v7785_v55  ;;  %4539 = vmatprep.subr.bf16.mxu1 %v7788_v56  ;;  %v7813_v55 = vld [vmem:[#allocation5 + $0xa0] ss:$16 sps:$4 sm:$0xff]   ;;  %v7816_v56 = vld [vmem:[#allocation5 + $0xa8] ss:$16 sps:$4 sm:$0xff]  }
 0x155   :  { %v285_v40 = vadd.f32 %v284_v62, %v151_v53  ;;  %v7839_v53 = vld [vmem:[#allocation5 + $0x124] ss:$16 sps:$4 sm:$0xff]  }
 0x156   :  { %2867 = vmatmul.mubr.bf16.vlgmr.msra.gmra.mrb[0].mxu0 %v1421_v59  ;;  %3031 = vmatmul.mubr.bf16.vlgmr.msra.gmra.mrb[0].mxu1 %v1421_v59  ;;  %v9176_v59 = vld [vmem:[%s9474_s0 + $0x1a8] sm:$0x11] }
 0x157   :  { %4376 = vmatpush1.bf16.msra.mxu0 %v7783_v50  ;;  %4540 = vmatpush1.bf16.msra.mxu1 %v7786_v61  ;;  %v9171_v50 = vld [vmem:[%s9474_s0 + $0xc8] sm:$0x11]  ;;  %v215_v61 = vunpack.c.h.bf16 %v9153_v34  ;;  %v286_v21 = vadd.f32 %v285_v40, %v159_v60  ;;  %v7840_v60 = vld [vmem:[#allocation5 + $0x128] ss:$16 sps:$4 sm:$0xff]  }
 0x158   :  { %4377 = vmatprep.subr.bf16.mxu0 %v7791_v42  ;;  %4541 = vmatprep.subr.bf16.mxu1 %v7794_v6  ;;  %v353_v42 = vadd.f32 %v352_v51, %v228_v44  ;;  %v354_v6 = vsel %vm249_vm0, %v236_v48, 0.0  ;;  %v7851_v40 = vld [vmem:[#allocation5 + $0x164] ss:$16 sps:$4 sm:$0xff]  }
 0x159   :  { %4407 = vmatprep.mubr.bf16.mxu0 %v3080_v7  ;;  %4571 = vmatprep.mubr.bf16.mxu1 %v3080_v7  ;;  %v9185_v7 = vld [vmem:[%s9474_s0 + $0xa8] sm:$0xff]  ;;  %v390_v8 = vadd.f32 %v389_v15, %v215_v61  ;;  %v7854_v15 = vld [vmem:[#allocation5 + $0x16c] ss:$16 sps:$4 sm:$0xff]  }
 0x15a   :  { %v175_v17 = vunpack.c.h.bf16 %v9185_v7 }
 0x15b   :  { %4378 = vmatpush1.bf16.msra.mxu0 %v7789_v12  ;;  %4542 = vmatpush1.bf16.msra.mxu1 %v7792_v13  ;;  %v9190_v12 = vld [vmem:[%s9474_s0 + $0x188] sm:$0xff]  ;;  %v7824_v13 = vld [vmem:[#allocation5 + $0xcc] ss:$16 sps:$4 sm:$0xff]   ;;  %v391_v49 = vadd.f32 %v390_v8, %v223_v39 }
 0x15c   :  { %4379 = vmatprep.subr.bf16.mxu0 %v7797_v5  ;;  %4543 = vmatprep.subr.bf16.mxu1 %v7800_v43  ;;  %v183_v5 = vunpack.c.h.bf16 %v9171_v50  ;;  %v239_v43 = vunpack.c.h.bf16 %v9176_v59  ;;  %v231_v19 = vunpack.c.h.bf16 %v9190_v12  ;;  %v7860_v8 = vld [vmem:[#allocation5 + $0x18c] ss:$16 sps:$4 sm:$0xff]  }
 0x15e   :  { %v289_v28 = vsel %vm249_vm0, %v183_v5, 0.0  ;;  %v393_v29 = vsel %vm249_vm0, %v239_v43, 0.0  ;;  %v7849_v5 = vld [vmem:[#allocation5 + $0x160] ss:$16 sps:$4 sm:$0xff]  }
 0x15f   :  { %4380 = vmatpush1.bf16.msra.mxu0 %v7795_v16  ;;  %4544 = vmatpush1.bf16.msra.mxu1 %v7798_v46  ;;  %v7819_v16 = vld [vmem:[#allocation5 + $0xc0] ss:$16 sps:$4 sm:$0xff]   ;;  %v7822_v46 = vld [vmem:[#allocation5 + $0xc8] ss:$16 sps:$4 sm:$0xff]  }
 0x160   :  { %4381 = vmatprep.subr.bf16.mxu0 %v7803_v11  ;;  %4545 = vmatprep.subr.bf16.mxu1 %v7806_v22  ;;  %v7827_v11 = vld [vmem:[#allocation5 + $0xe4] ss:$16 sps:$4 sm:$0xff]   ;;  %v251_v22 = vadd.f32 %v250_v4, %v248_v3  ;;  %v7848_v3 = vld [vmem:[#allocation5 + $0x14c] ss:$16 sps:$4 sm:$0xff]  }
 0x162   :  { %v252_v36 = vrot.slane %v251_v22, 4 }
 0x163   :  { %4382 = vmatpush1.bf16.msra.mxu0 %v7801_v23  ;;  %4546 = vmatpush1.bf16.msra.mxu1 %v7804_v24  ;;  %v355_v23 = vadd.f32 %v354_v6, %v353_v42  ;;  %v7830_v24 = vld [vmem:[#allocation5 + $0xec] ss:$16 sps:$4 sm:$0xff]   ;;  %v7843_v6 = vld [vmem:[#allocation5 + $0x140] ss:$16 sps:$4 sm:$0xff]  }
 0x164   :  { %4383 = vmatprep.subr.bf16.mxu0 %v7809_v26  ;;  %4547 = vmatprep.subr.bf16.mxu1 %v7812_v31  ;;  %v287_v26 = vadd.f32 %v286_v21, %v167_v14  ;;  %v7828_v31 = vld [vmem:[#allocation5 + $0xe8] ss:$16 sps:$4 sm:$0xff]   ;;  %v253_v51 = vadd.f32 %v252_v36, %v251_v22  ;;  %v7857_v21 = vld [vmem:[#allocation5 + $0x184] ss:$16 sps:$4 sm:$0xff]  }
 0x166   :  { %v254_v61 = vrot.slane %v253_v51, 2 }
 0x167   :  { %4384 = vmatpush1.bf16.msra.mxu0 %v7807_v32  ;;  %4548 = vmatpush1.bf16.msra.mxu1 %v7810_v35  ;;  %v288_v32 = vadd.f32 %v287_v26, %v175_v17  ;;  %v392_v35 = vadd.f32 %v391_v49, %v231_v19 }
 0x168   :  { %4385 = vmatprep.subr.bf16.mxu0 %v7815_v38  ;;  %4549 = vmatprep.subr.bf16.mxu1 %v7818_v41  ;;  %v356_v38 = vrot.slane %v355_v23, 4  ;;  %v7836_v41 = vld [vmem:[#allocation5 + $0x10c] ss:$16 sps:$4 sm:$0xff]   ;;  %v255_v14 = vadd.f32 %v254_v61, %v253_v51  ;;  %v7875_v51 = vld [vmem:[#allocation5 + $0x1e4] ss:$16 sps:$4 sm:$0xff]  }
 0x169   :  { %v290_v44 = vadd.f32 %v289_v28, %v288_v32  ;;  %v394_v45 = vadd.f32 %v393_v29, %v392_v35  ;;  %v7863_v28 = vld [vmem:[#allocation5 + $0x1a4] ss:$16 sps:$4 sm:$0xff]   ;;  %v7866_v29 = vld [vmem:[#allocation5 + $0x1ac] ss:$16 sps:$4 sm:$0xff]   ;;  %v7861_v32 = vld [vmem:[#allocation5 + $0x1a0] ss:$16 sps:$4 sm:$0xff]  }
 0x16a   :  { %v357_v10 = vadd.f32 %v356_v38, %v355_v23  ;;  %v256_v17 = vrot.slane %v255_v14, 1  ;;  %v7864_v35 = vld [vmem:[#allocation5 + $0x1a8] ss:$16 sps:$4 sm:$0xff]   ;;  %v7869_v38 = vld [vmem:[#allocation5 + $0x1c4] ss:$16 sps:$4 sm:$0xff]  }
 0x16b   :  { %4386 = vmatpush1.bf16.msra.mxu0 %v7813_v55  ;;  %4550 = vmatpush1.bf16.msra.mxu1 %v7816_v56  ;;  %v291_v57 = vrot.slane %v290_v44, 4  ;;  %v395_v48 = vrot.slane %v394_v45, 4  ;;  %v7837_v55 = vld [vmem:[#allocation5 + $0x120] ss:$16 sps:$4 sm:$0xff]   ;;  %v7884_v61 = vld [vmem:[#allocation5 + $0x20c] ss:$16 sps:$4 sm:$0xff]  }
 0x16c   :  { %4387 = vmatprep.subr.bf16.mxu0 %v7821_v2  ;;  %4551 = vmatprep.subr.bf16.mxu1 %v7824_v13  ;;  %v358_v62 = vrot.slane %v357_v10, 2  ;;  %v7846_v13 = vld [vmem:[#allocation5 + $0x148] ss:$16 sps:$4 sm:$0xff]   ;;  %v257_v26 = vadd.f32 %v256_v17, %v255_v14  ;;  %v134_v14 = vunpack.c.l.bf16 %v9111_v47  ;;  %v7885_v47 = vld [vmem:[#allocation5 + $0x220] ss:$16 sps:$4 sm:$0xff]  }
 0x16d   :  { %v292_v56 = vadd.f32 %v291_v57, %v290_v44  ;;  %v396_v2 = vadd.f32 %v395_v48, %v394_v45  ;;  %v7870_v57 = vld [vmem:[#allocation5 + $0x1c8] ss:$16 sps:$4 sm:$0xff]  }
 0x16e   :  { %v359_v39 = vadd.f32 %v358_v62, %v357_v10  ;;  %v7878_v10 = vld [vmem:[#allocation5 + $0x1ec] ss:$16 sps:$4 sm:$0xff]   ;;  %v7879_v62 = vld [vmem:[#allocation5 + $0x200] ss:$16 sps:$4 sm:$0xff]  }
 0x16f   :  { %4388 = vmatpush1.bf16.msra.mxu0 %v7819_v16  ;;  %4552 = vmatpush1.bf16.msra.mxu1 %v7822_v46  ;;  %v293_v4 = vrot.slane %v292_v56, 2  ;;  %v397_v42 = vrot.slane %v396_v2, 2  ;;  %v7852_v46 = vld [vmem:[#allocation5 + $0x168] ss:$16 sps:$4 sm:$0xff]  }
 0x170   :  { %4389 = vmatprep.subr.bf16.mxu0 %v7827_v11  ;;  %4553 = vmatprep.subr.bf16.mxu1 %v7830_v24  ;;  %v360_v19 = vrot.slane %v359_v39, 1  ;;  %v7855_v11 = vld [vmem:[#allocation5 + $0x180] ss:$16 sps:$4 sm:$0xff]   ;;  %v7858_v24 = vld [vmem:[#allocation5 + $0x188] ss:$16 sps:$4 sm:$0xff]  }
 0x171   :  { %v294_v43 = vadd.f32 %v293_v4, %v292_v56  ;;  %v398_v16 = vadd.f32 %v397_v42, %v396_v2  ;;  %v7876_v56 = vld [vmem:[#allocation5 + $0x1e8] ss:$16 sps:$4 sm:$0xff]   ;;  %v7887_v4 = vld [vmem:[#allocation5 + $0x224] ss:$16 sps:$4 sm:$0xff]  }
 0x172   :  { %v361_v49 = vadd.f32 %v360_v19, %v359_v39  ;;  %v142_v39 = vunpack.c.l.bf16 %v9116_v18 }
 0x173   :  { %4390 = vmatpush1.bf16.msra.mxu0 %v7825_v30  ;;  %4554 = vmatpush1.bf16.msra.mxu1 %v7828_v31  ;;  %v295_v22 = vrot.slane %v294_v43, 1  ;;  %v399_v23 = vrot.slane %v398_v16, 1 }
 0x174   :  { %4391 = vmatprep.subr.bf16.mxu0 %v7833_v58  ;;  %4555 = vmatprep.subr.bf16.mxu1 %v7836_v41  ;;  %v453_v58 = vpack.c.bf16 %v257_v26, %v257_v26  ;;  %v461_v36 = vpack.c.bf16 %v361_v49, %v361_v49  ;;  %v7872_v41 = vld [vmem:[#allocation5 + $0x1cc] ss:$16 sps:$4 sm:$0xff]   ;;  %v7893_v26 = vld [vmem:[#allocation5 + $0x244] ss:$16 sps:$4 sm:$0xff]  }
 0x175   :  { %v296_v30 = vadd.f32 %v295_v22, %v294_v43  ;;  %v400_v31 = vadd.f32 %v399_v23, %v398_v16  ;;  %v9224_v43 = vld [vmem:[%s9474_s0 + $0x110] sm:$0xff] }
 0x176   :  { %v3055_v48 = vunpack.c.l.b16 %v453_v58  ;;  %v7890_v16 = vld [vmem:[#allocation5 + $0x22c] ss:$16 sps:$4 sm:$0xff]   ;;  %v201_v19 = vunpack.c.h.bf16 %v9224_v43 }
 0x177   :  { %4392 = vmatpush1.bf16.msra.mxu0 %v7831_v33  ;;  %4556 = vmatpush1.bf16.msra.mxu1 %v7834_v9  ;;  %v456_v44 = vpack.c.bf16 %v296_v30, %v296_v30  ;;  %v464_v45 = vpack.c.bf16 %v400_v31, %v400_v31  ;;  %v7867_v33 = vld [vmem:[#allocation5 + $0x1c0] ss:$16 sps:$4 sm:$0xff]   ;;  %v3063_v9 = vunpack.c.l.b16 %v461_v36  ;;  %v7896_v49 = vld [vmem:[#allocation5 + $0x24c] ss:$16 sps:$4 sm:$0xff]  }
 0x178   :  { %4393 = vmatprep.subr.bf16.mxu0 %v7839_v53  ;;  %4557 = vmatprep.subr.bf16.mxu1 %v7842_v54  ;;  %v9235_v23 = vld [vmem:[%s9474_s0 + $0x50] sm:$0xff] }
 0x179   :  { %v3058_v53 = vunpack.c.l.b16 %v456_v44  ;;  %v3066_v54 = vunpack.c.l.b16 %v464_v45  ;;  %v3071_v2 = vsel %vm1406_vm1, %v3063_v9, %v3055_v48  ;;  %v7899_v44 = vld [vmem:[#allocation5 + $0x264] ss:$16 sps:$4 sm:$0xff]   ;;  %v7902_v45 = vld [vmem:[#allocation5 + $0x26c] ss:$16 sps:$4 sm:$0xff]  }
 0x17b   :  { %4394 = vmatpush1.bf16.msra.mxu0 %v7837_v55  ;;  %4558 = vmatpush1.bf16.msra.mxu1 %v7840_v60  ;;  %v7873_v55 = vld [vmem:[#allocation5 + $0x1e0] ss:$16 sps:$4 sm:$0xff]   ;;  %v7881_v60 = vld [vmem:[#allocation5 + $0x204] ss:$16 sps:$4 sm:$0xff]   ;;  %v3074_v42 = vsel %vm1406_vm1, %v3066_v54, %v3058_v53 }
 0x17c   :  { %4395 = vmatprep.subr.bf16.mxu0 %v7845_v0  ;;  %4559 = vmatprep.subr.bf16.mxu1 %v7848_v3  ;;  %v7882_v0 = vld [vmem:[#allocation5 + $0x208] ss:$16 sps:$4 sm:$0xff]   ;;  %v3079_v3 = vpack.c.b16 %v3071_v2, %v3071_v2  ;;  %v3082_v18 = vpack.c.b16 %v3074_v42, %v3074_v42  ;;  %v7905_v2 = vld [vmem:[#allocation5 + $0x284] ss:$16 sps:$4 sm:$0xff]  }
 0x17f   :  { %4396 = vmatpush1.bf16.msra.mxu0 %v7843_v6  ;;  %4560 = vmatpush1.bf16.msra.mxu1 %v7846_v13  ;;  %v9205_v6 = vld [vmem:[%s9474_s0 + $0x10] sm:$0xff] }
 0x180   :  { %4397 = vmatprep.subr.bf16.mxu0 %v7851_v40  ;;  %4561 = vmatprep.subr.bf16.mxu1 %v7854_v15  ;;  %v9210_v13 = vld [vmem:[%s9474_s0 + $0x30] sm:$0xff]  ;;  %v190_v40 = vunpack.c.l.bf16 %v9121_v20  ;;  %v198_v15 = vunpack.c.l.bf16 %v9126_v25  ;;  %v137_v20 = vunpack.c.h.bf16 %v9205_v6 }
 0x181   :  { %v145_v25 = vunpack.c.h.bf16 %v9210_v13 }
 0x182   :  { %v375_v22 = vadd.f32 %v198_v15, %v190_v40 }
 0x183   :  { %4398 = vmatpush1.bf16.msra.mxu0 %v7849_v5  ;;  %4562 = vmatpush1.bf16.msra.mxu1 %v7852_v46  ;;  %v9219_v5 = vld [vmem:[%s9474_s0 + $0xf0] sm:$0xff]  ;;  %v310_v30 = vadd.f32 %v145_v25, %v137_v20 }
 0x184   :  { %4399 = vmatprep.subr.bf16.mxu0 %v7857_v21  ;;  %4563 = vmatprep.subr.bf16.mxu1 %v7860_v8  ;;  %v7888_v46 = vld [vmem:[#allocation5 + $0x228] ss:$16 sps:$4 sm:$0xff]   ;;  %v193_v17 = vunpack.c.h.bf16 %v9219_v5  ;;  %v150_v21 = vunpack.c.l.bf16 %v9133_v63  ;;  %v206_v8 = vunpack.c.l.bf16 %v9138_v37  ;;  %v153_v37 = vunpack.c.h.bf16 %v9235_v23  ;;  %v7909_v20 = vld [vmem:[#allocation5 + $0x2a0] ss:$16 sps:$4 sm:$0xff]  }
 0x185   :  { %v7894_v63 = vld [vmem:[#allocation5 + $0x248] ss:$16 sps:$4 sm:$0xff]  }
 0x186   :  { %v414_v31 = vadd.f32 %v201_v19, %v193_v17  ;;  %v376_v36 = vadd.f32 %v375_v22, %v206_v8  ;;  %v311_v48 = vadd.f32 %v310_v30, %v153_v37  ;;  %v7915_v37 = vld [vmem:[#allocation5 + $0x2c0] ss:$16 sps:$4 sm:$0xff]  }
 0x187   :  { %4400 = vmatpush1.bf16.msra.mxu0 %v7855_v11  ;;  %4564 = vmatpush1.bf16.msra.mxu1 %v7858_v24  ;;  %v271_v11 = vadd.f32 %v142_v39, %v134_v14  ;;  %v9240_v24 = vld [vmem:[%s9474_s0 + $0x130] sm:$0xff]  ;;  %v174_v14 = vunpack.c.l.bf16 %v9185_v7  ;;  %v230_v39 = vunpack.c.l.bf16 %v9190_v12  ;;  %v238_v7 = vunpack.c.l.bf16 %v9176_v59  ;;  %v7917_v59 = vld [vmem:[#allocation5 + $0x2c4] ss:$16 sps:$4 sm:$0xff]  }
 0x188   :  { %4401 = vmatprep.subr.bf16.mxu0 %v7863_v28  ;;  %4565 = vmatprep.subr.bf16.mxu1 %v7866_v29  ;;  %v7891_v28 = vld [vmem:[#allocation5 + $0x240] ss:$16 sps:$4 sm:$0xff]   ;;  %v209_v29 = vunpack.c.h.bf16 %v9240_v24  ;;  %v9289_v12 = vld [vmem:[%s9474_s0 + $0xd0] sm:$0x11] }
 0x189   :  { %v272_v58 = vadd.f32 %v271_v11, %v150_v21  ;;  %v185_v22 = vunpack.c.h.bf16 %v9289_v12 }
 0x18a   :  { %v415_v9 = vadd.f32 %v414_v31, %v209_v29  ;;  %v7918_v31 = vld [vmem:[#allocation5 + $0x2c8] ss:$16 sps:$4 sm:$0xff]  }
 0x18b   :  { %4402 = vmatpush1.bf16.msra.mxu0 %v7861_v32  ;;  %4566 = vmatpush1.bf16.msra.mxu1 %v7864_v35  ;;  %v158_v32 = vunpack.c.l.bf16 %v9148_v52  ;;  %v214_v35 = vunpack.c.l.bf16 %v9153_v34  ;;  %v7900_v52 = vld [vmem:[#allocation5 + $0x268] ss:$16 sps:$4 sm:$0xff]  }
 0x18c   :  { %4403 = vmatprep.subr.bf16.mxu0 %v7869_v38  ;;  %4567 = vmatprep.subr.bf16.mxu1 %v7872_v41  ;;  %v9249_v38 = vld [vmem:[%s9474_s0 + $0x70] sm:$0xff] }
 0x18d   :  { %v9254_v41 = vld [vmem:[%s9474_s0 + $0x150] sm:$0xff]  ;;  %v161_v34 = vunpack.c.h.bf16 %v9249_v38  ;;  %v273_v53 = vadd.f32 %v272_v58, %v158_v32  ;;  %v377_v54 = vadd.f32 %v376_v36, %v214_v35  ;;  %v315_v58 = vsel %vm249_vm0, %v185_v22, 0.0 }
 0x18e   :  { %v7948_v22 = vld [vmem:[#allocation5 + $0x368] ss:$16 sps:$4 sm:$0xff]  }
 0x18f   :  { %4404 = vmatpush1.bf16.msra.mxu0 %v7867_v33  ;;  %4568 = vmatpush1.bf16.msra.mxu1 %v7870_v57  ;;  %v7897_v33 = vld [vmem:[#allocation5 + $0x260] ss:$16 sps:$4 sm:$0xff]   ;;  %v217_v57 = vunpack.c.h.bf16 %v9254_v41 }
 0x190   :  { %4405 = vmatprep.subr.bf16.mxu0 %v7875_v51  ;;  %4569 = vmatprep.subr.bf16.mxu1 %v7878_v10  ;;  %v166_v51 = vunpack.c.l.bf16 %v9159_v27  ;;  %v222_v10 = vunpack.c.l.bf16 %v9166_v1  ;;  %v7906_v27 = vld [vmem:[#allocation5 + $0x288] ss:$16 sps:$4 sm:$0xff]   ;;  %v7914_v1 = vld [vmem:[#allocation5 + $0x2ac] ss:$16 sps:$4 sm:$0xff]  }
 0x191   :  { %v416_v42 = vadd.f32 %v415_v9, %v217_v57  ;;  %v7924_v57 = vld [vmem:[#allocation5 + $0x2e8] ss:$16 sps:$4 sm:$0xff]  }
 0x192   :  { %v274_v40 = vadd.f32 %v273_v53, %v166_v51  ;;  %v378_v15 = vadd.f32 %v377_v54, %v222_v10  ;;  %v7929_v51 = vld [vmem:[#allocation5 + $0x304] ss:$16 sps:$4 sm:$0xff]   ;;  %v7932_v10 = vld [vmem:[#allocation5 + $0x30c] ss:$16 sps:$4 sm:$0xff]  }
 0x193   :  { %4406 = vmatpush1.bf16.msra.mxu0 %v7873_v55  ;;  %4570 = vmatpush1.bf16.msra.mxu1 %v7876_v56  ;;  %v9263_v55 = vld [vmem:[%s9474_s0 + $0x90] sm:$0xff] }
 0x194   :  { %4416 = vmatprep.subr.bf16.mxu0 %v7881_v60  ;;  %4580 = vmatprep.subr.bf16.mxu1 %v7884_v61  ;;  %v9268_v56 = vld [vmem:[%s9474_s0 + $0x170] sm:$0xff]  ;;  %v275_v8 = vadd.f32 %v274_v40, %v174_v14  ;;  %v379_v11 = vadd.f32 %v378_v15, %v230_v39  ;;  %v7941_v40 = vld [vmem:[#allocation5 + $0x344] ss:$16 sps:$4 sm:$0xff]  }
 0x195   :  { %v7908_v60 = vld [vmem:[#allocation5 + $0x28c] ss:$16 sps:$4 sm:$0xff]   ;;  %v7903_v61 = vld [vmem:[#allocation5 + $0x280] ss:$16 sps:$4 sm:$0xff]  }
 0x196   :  { %4408 = vmatmul.mubr.bf16.vlgmr.msra.gmra.mrb[0].mxu0 %v3079_v3  ;;  %4572 = vmatmul.mubr.bf16.vlgmr.msra.gmra.mrb[0].mxu1 %v3079_v3  ;;  %v225_v3 = vunpack.c.h.bf16 %v9268_v56  ;;  %v7944_v15 = vld [vmem:[#allocation5 + $0x34c] ss:$16 sps:$4 sm:$0xff]  }
 0x197   :  { %4417 = vmatpush1.bf16.msra.mxu0 %v7879_v62  ;;  %4581 = vmatpush1.bf16.msra.mxu1 %v7882_v0  ;;  %v7911_v62 = vld [vmem:[#allocation5 + $0x2a4] ss:$16 sps:$4 sm:$0xff]   ;;  %v169_v0 = vunpack.c.h.bf16 %v9263_v55 }
 0x198   :  { %4418 = vmatprep.subr.bf16.mxu0 %v7887_v4  ;;  %4582 = vmatprep.subr.bf16.mxu1 %v7890_v16  ;;  %v312_v4 = vadd.f32 %v311_v48, %v161_v34  ;;  %v9277_v16 = vld [vmem:[%s9474_s0 + $0xb0] sm:$0xff]  ;;  %v417_v21 = vadd.f32 %v416_v42, %v225_v3 }
 0x199   :  { %4448 = vmatprep.mubr.bf16.mxu0 %v3082_v18  ;;  %4612 = vmatprep.mubr.bf16.mxu1 %v3082_v18  ;;  %v9294_v18 = vld [vmem:[%s9474_s0 + $0x1b0] sm:$0x11]  ;;  %v177_v25 = vunpack.c.h.bf16 %v9277_v16 }
 0x19a   :  { %v313_v19 = vadd.f32 %v312_v4, %v169_v0  ;;  %v7933_v0 = vld [vmem:[#allocation5 + $0x320] ss:$16 sps:$4 sm:$0xff]   ;;  %v7936_v42 = vld [vmem:[#allocation5 + $0x328] ss:$16 sps:$4 sm:$0xff]  }
 0x19b   :  { %4419 = vmatpush1.bf16.msra.mxu0 %v7885_v47  ;;  %4583 = vmatpush1.bf16.msra.mxu1 %v7888_v46  ;;  %v9282_v47 = vld [vmem:[%s9474_s0 + $0x190] sm:$0xff]  ;;  %v182_v46 = vunpack.c.l.bf16 %v9171_v50 }
 0x19c   :  { %4420 = vmatprep.subr.bf16.mxu0 %v7893_v26  ;;  %4584 = vmatprep.subr.bf16.mxu1 %v7896_v49  ;;  %v233_v17 = vunpack.c.h.bf16 %v9282_v47  ;;  %v7912_v50 = vld [vmem:[#allocation5 + $0x2a8] ss:$16 sps:$4 sm:$0xff]   ;;  %v241_v26 = vunpack.c.h.bf16 %v9294_v18  ;;  %v7920_v49 = vld [vmem:[#allocation5 + $0x2cc] ss:$16 sps:$4 sm:$0xff]   ;;  %v314_v29 = vadd.f32 %v313_v19, %v177_v25 }
 0x19d   :  { %v7942_v25 = vld [vmem:[#allocation5 + $0x348] ss:$16 sps:$4 sm:$0xff]  }
 0x19e   :  { %v418_v30 = vadd.f32 %v417_v21, %v233_v17  ;;  %v419_v36 = vsel %vm249_vm0, %v241_v26, 0.0  ;;  %v7947_v21 = vld [vmem:[#allocation5 + $0x364] ss:$16 sps:$4 sm:$0xff]  }
 0x19f   :  { %4421 = vmatpush1.bf16.msra.mxu0 %v7891_v28  ;;  %4585 = vmatpush1.bf16.msra.mxu1 %v7894_v63  ;;  %v276_v28 = vsel %vm249_vm0, %v182_v46, 0.0  ;;  %v380_v63 = vsel %vm249_vm0, %v238_v7, 0.0 }
 0x1a0   :  { %4422 = vmatprep.subr.bf16.mxu0 %v7899_v44  ;;  %4586 = vmatprep.subr.bf16.mxu1 %v7902_v45  ;;  %v277_v32 = vadd.f32 %v276_v28, %v275_v8  ;;  %v381_v35 = vadd.f32 %v380_v63, %v379_v11  ;;  %v7923_v44 = vld [vmem:[#allocation5 + $0x2e4] ss:$16 sps:$4 sm:$0xff]   ;;  %v7926_v45 = vld [vmem:[#allocation5 + $0x2ec] ss:$16 sps:$4 sm:$0xff]   ;;  %v420_v34 = vadd.f32 %v419_v36, %v418_v30  ;;  %v7951_v30 = vld [vmem:[#allocation5 + $0x380] ss:$16 sps:$4 sm:$0xff]  }
 0x1a1   :  { %v7953_v28 = vld [vmem:[#allocation5 + $0x384] ss:$16 sps:$4 sm:$0xff]   ;;  %v7956_v63 = vld [vmem:[#allocation5 + $0x38c] ss:$16 sps:$4 sm:$0xff]  }
 0x1a2   :  { %v278_v48 = vrot.slane %v277_v32, 4  ;;  %v382_v9 = vrot.slane %v381_v35, 4  ;;  %v421_v54 = vrot.slane %v420_v34, 4  ;;  %v7962_v36 = vld [vmem:[#allocation5 + $0x3ac] ss:$16 sps:$4 sm:$0xff]  }
 0x1a3   :  { %4423 = vmatpush1.bf16.msra.mxu0 %v7897_v33  ;;  %4587 = vmatpush1.bf16.msra.mxu1 %v7900_v52  ;;  %v7921_v33 = vld [vmem:[#allocation5 + $0x2e0] ss:$16 sps:$4 sm:$0xff]   ;;  %v316_v52 = vadd.f32 %v315_v58, %v314_v29  ;;  %v7959_v58 = vld [vmem:[#allocation5 + $0x3a4] ss:$16 sps:$4 sm:$0xff]  }
 0x1a4   :  { %4424 = vmatprep.subr.bf16.mxu0 %v7905_v2  ;;  %4588 = vmatprep.subr.bf16.mxu1 %v7908_v60  ;;  %v7927_v2 = vld [vmem:[#allocation5 + $0x300] ss:$16 sps:$4 sm:$0xff]   ;;  %v7930_v60 = vld [vmem:[#allocation5 + $0x308] ss:$16 sps:$4 sm:$0xff]   ;;  %v422_v4 = vadd.f32 %v421_v54, %v420_v34 }
 0x1a5   :  { %v317_v53 = vrot.slane %v316_v52, 4  ;;  %v7966_v54 = vld [vmem:[#allocation5 + $0x3c8] ss:$16 sps:$4 sm:$0xff]  }
 0x1a6   :  { %v423_v7 = vrot.slane %v422_v4, 2 }
 0x1a7   :  { %4425 = vmatpush1.bf16.msra.mxu0 %v7903_v61  ;;  %4589 = vmatpush1.bf16.msra.mxu1 %v7906_v27  ;;  %v279_v61 = vadd.f32 %v278_v48, %v277_v32  ;;  %v383_v27 = vadd.f32 %v382_v9, %v381_v35  ;;  %v318_v3 = vadd.f32 %v317_v53, %v316_v52  ;;  %v7960_v52 = vld [vmem:[#allocation5 + $0x3a8] ss:$16 sps:$4 sm:$0xff]   ;;  %v7965_v48 = vld [vmem:[#allocation5 + $0x3c4] ss:$16 sps:$4 sm:$0xff]   ;;  %v7968_v9 = vld [vmem:[#allocation5 + $0x3cc] ss:$16 sps:$4 sm:$0xff]  }
 0x1a8   :  { %4426 = vmatprep.subr.bf16.mxu0 %v7911_v62  ;;  %4590 = vmatprep.subr.bf16.mxu1 %v7914_v1  ;;  %v7935_v62 = vld [vmem:[#allocation5 + $0x324] ss:$16 sps:$4 sm:$0xff]   ;;  %v7938_v1 = vld [vmem:[#allocation5 + $0x32c] ss:$16 sps:$4 sm:$0xff]   ;;  %v424_v11 = vadd.f32 %v423_v7, %v422_v4  ;;  %v7963_v53 = vld [vmem:[#allocation5 + $0x3c0] ss:$16 sps:$4 sm:$0xff]  }
 0x1a9   :  { %v280_v14 = vrot.slane %v279_v61, 2  ;;  %v384_v39 = vrot.slane %v383_v27, 2  ;;  %v319_v46 = vrot.slane %v318_v3, 2 }
 0x1aa   :  { %v425_v29 = vrot.slane %v424_v11, 1 }
 0x1ab   :  { %4427 = vmatpush1.bf16.msra.mxu0 %v7909_v20  ;;  %4591 = vmatpush1.bf16.msra.mxu1 %v7912_v50  ;;  %v7939_v20 = vld [vmem:[#allocation5 + $0x340] ss:$16 sps:$4 sm:$0xff]   ;;  %v281_v17 = vadd.f32 %v280_v14, %v279_v61  ;;  %v385_v19 = vadd.f32 %v384_v39, %v383_v27  ;;  %v7950_v50 = vld [vmem:[#allocation5 + $0x36c] ss:$16 sps:$4 sm:$0xff]   ;;  %v320_v8 = vadd.f32 %v319_v46, %v318_v3  ;;  %v7971_v61 = vld [vmem:[#allocation5 + $0x3e4] ss:$16 sps:$4 sm:$0xff]  }
 0x1ac   :  { %4428 = vmatprep.subr.bf16.mxu0 %v7917_v59  ;;  %4592 = vmatprep.subr.bf16.mxu1 %v7920_v49  ;;  %v7945_v59 = vld [vmem:[#allocation5 + $0x360] ss:$16 sps:$4 sm:$0xff]   ;;  %v7974_v27 = vld [vmem:[#allocation5 + $0x3ec] ss:$16 sps:$4 sm:$0xff]   ;;  %v7972_v3 = vld [vmem:[#allocation5 + $0x3e8] ss:$16 sps:$4 sm:$0xff]  }
 0x1ad   :  { %v282_v26 = vrot.slane %v281_v17, 1  ;;  %v386_v49 = vrot.slane %v385_v19, 1  ;;  %v7980_v14 = vld [vmem:[#allocation5 + $0x40c] ss:$16 sps:$4 sm:$0xff]   ;;  %v7975_v39 = vld [vmem:[#allocation5 + $0x400] ss:$16 sps:$4 sm:$0xff]  }
 0x1ae   :  { %v9313_v46 = vld [vmem:[%s9474_s0 + $0x38] sm:$0xff] }
 0x1af   :  { %4429 = vmatpush1.bf16.msra.mxu0 %v7915_v37  ;;  %4593 = vmatpush1.bf16.msra.mxu1 %v7918_v31  ;;  %v321_v37 = vrot.slane %v320_v8, 1  ;;  %v7954_v31 = vld [vmem:[#allocation5 + $0x388] ss:$16 sps:$4 sm:$0xff]   ;;  %v283_v32 = vadd.f32 %v282_v26, %v281_v17  ;;  %v387_v35 = vadd.f32 %v386_v49, %v385_v19  ;;  %v144_v17 = vunpack.c.l.bf16 %v9210_v13 }
 0x1b0   :  { %4430 = vmatprep.subr.bf16.mxu0 %v7923_v44  ;;  %4594 = vmatprep.subr.bf16.mxu1 %v7926_v45  ;;  %v426_v45 = vadd.f32 %v425_v29, %v424_v11  ;;  %v192_v19 = vunpack.c.l.bf16 %v9219_v5  ;;  %v7981_v11 = vld [vmem:[#allocation5 + $0x420] ss:$16 sps:$4 sm:$0xff]   ;;  %v7984_v13 = vld [vmem:[#allocation5 + $0x428] ss:$16 sps:$4 sm:$0xff]  }
 0x1b1   :  { %v322_v44 = vadd.f32 %v321_v37, %v320_v8  ;;  %v455_v34 = vpack.c.bf16 %v283_v32, %v283_v32  ;;  %v7983_v8 = vld [vmem:[#allocation5 + $0x424] ss:$16 sps:$4 sm:$0xff]  }
 0x1b2   :  { %v7989_v32 = vld [vmem:[#allocation5 + $0x444] ss:$16 sps:$4 sm:$0xff]  }
 0x1b3   :  { %4431 = vmatpush1.bf16.msra.mxu0 %v7921_v33  ;;  %4595 = vmatpush1.bf16.msra.mxu1 %v7924_v57  ;;  %v7957_v33 = vld [vmem:[#allocation5 + $0x3a0] ss:$16 sps:$4 sm:$0xff]   ;;  %v463_v57 = vpack.c.bf16 %v387_v35, %v387_v35  ;;  %v7992_v35 = vld [vmem:[#allocation5 + $0x44c] ss:$16 sps:$4 sm:$0xff]  }
 0x1b4   :  { %4432 = vmatprep.subr.bf16.mxu0 %v7929_v51  ;;  %4596 = vmatprep.subr.bf16.mxu1 %v7932_v10  ;;  %v458_v51 = vpack.c.bf16 %v322_v44, %v322_v44  ;;  %v466_v10 = vpack.c.bf16 %v426_v45, %v426_v45 }
 0x1b7   :  { %4433 = vmatpush1.bf16.msra.mxu0 %v7927_v2  ;;  %4597 = vmatpush1.bf16.msra.mxu1 %v7930_v60  ;;  %v3057_v2 = vunpack.c.l.b16 %v455_v34  ;;  %v3065_v60 = vunpack.c.l.b16 %v463_v57 }
 0x1b8   :  { %4434 = vmatprep.subr.bf16.mxu0 %v7935_v62  ;;  %4598 = vmatprep.subr.bf16.mxu1 %v7938_v1  ;;  %v3060_v62 = vunpack.c.l.b16 %v458_v51  ;;  %v3068_v1 = vunpack.c.l.b16 %v466_v10  ;;  %v7995_v51 = vld [vmem:[#allocation5 + $0x464] ss:$16 sps:$4 sm:$0xff]   ;;  %v7998_v10 = vld [vmem:[#allocation5 + $0x46c] ss:$16 sps:$4 sm:$0xff]  }
 0x1b9   :  { %v3073_v4 = vsel %vm1406_vm1, %v3065_v60, %v3057_v2 }
 0x1ba   :  { %v3081_v7 = vpack.c.b16 %v3073_v4, %v3073_v4  ;;  %v8001_v4 = vld [vmem:[#allocation5 + $0x484] ss:$16 sps:$4 sm:$0xff]  }
 0x1bb   :  { %4435 = vmatpush1.bf16.msra.mxu0 %v7933_v0  ;;  %4599 = vmatpush1.bf16.msra.mxu1 %v7936_v42  ;;  %v7969_v0 = vld [vmem:[#allocation5 + $0x3e0] ss:$16 sps:$4 sm:$0xff]   ;;  %v7977_v42 = vld [vmem:[#allocation5 + $0x404] ss:$16 sps:$4 sm:$0xff]  }
 0x1bc   :  { %4436 = vmatprep.subr.bf16.mxu0 %v7941_v40  ;;  %4600 = vmatprep.subr.bf16.mxu1 %v7944_v15  ;;  %v7978_v40 = vld [vmem:[#allocation5 + $0x408] ss:$16 sps:$4 sm:$0xff]  }
 0x1bd   :  { %v9308_v15 = vld [vmem:[%s9474_s0 + $0x18] sm:$0xff] }
 0x1be   :  { %v139_v5 = vunpack.c.h.bf16 %v9308_v15 }
 0x1bf   :  { %4437 = vmatpush1.bf16.msra.mxu0 %v7939_v20  ;;  %4601 = vmatpush1.bf16.msra.mxu1 %v7942_v25  ;;  %v3076_v20 = vsel %vm1406_vm1, %v3068_v1, %v3060_v62  ;;  %v136_v25 = vunpack.c.l.bf16 %v9205_v6  ;;  %v7986_v6 = vld [vmem:[#allocation5 + $0x42c] ss:$16 sps:$4 sm:$0xff]  }
 0x1c0   :  { %4438 = vmatprep.subr.bf16.mxu0 %v7947_v21  ;;  %4602 = vmatprep.subr.bf16.mxu1 %v7950_v50  ;;  %v200_v21 = vunpack.c.l.bf16 %v9224_v43  ;;  %v9323_v50 = vld [vmem:[%s9474_s0 + $0xf8] sm:$0xff]  ;;  %v147_v43 = vunpack.c.h.bf16 %v9313_v46 }
 0x1c1   :  { %v195_v26 = vunpack.c.h.bf16 %v9323_v50  ;;  %v297_v37 = vadd.f32 %v144_v17, %v136_v25  ;;  %v176_v17 = vunpack.c.l.bf16 %v9277_v16  ;;  %v240_v16 = vunpack.c.l.bf16 %v9294_v18  ;;  %v8013_v18 = vld [vmem:[#allocation5 + $0x4c4] ss:$16 sps:$4 sm:$0xff]  }
 0x1c2   :  { %v401_v29 = vadd.f32 %v200_v21, %v192_v19  ;;  %v336_v44 = vadd.f32 %v147_v43, %v139_v5  ;;  %v232_v19 = vunpack.c.l.bf16 %v9282_v47  ;;  %v9393_v47 = vld [vmem:[%s9474_s0 + $0xd8] sm:$0x11] }
 0x1c3   :  { %4439 = vmatpush1.bf16.msra.mxu0 %v7945_v59  ;;  %4603 = vmatpush1.bf16.msra.mxu1 %v7948_v22  ;;  %v9328_v59 = vld [vmem:[%s9474_s0 + $0x118] sm:$0xff]  ;;  %v3084_v22 = vpack.c.b16 %v3076_v20, %v3076_v20 }
 0x1c4   :  { %4440 = vmatprep.subr.bf16.mxu0 %v7953_v28  ;;  %4604 = vmatprep.subr.bf16.mxu1 %v7956_v63  ;;  %v203_v49 = vunpack.c.h.bf16 %v9328_v59  ;;  %v152_v28 = vunpack.c.l.bf16 %v9235_v23  ;;  %v208_v63 = vunpack.c.l.bf16 %v9240_v24  ;;  %v7990_v23 = vld [vmem:[#allocation5 + $0x448] ss:$16 sps:$4 sm:$0xff]   ;;  %v8005_v5 = vld [vmem:[#allocation5 + $0x4a0] ss:$16 sps:$4 sm:$0xff]  }
 0x1c6   :  { %v440_v45 = vadd.f32 %v203_v49, %v195_v26  ;;  %v298_v34 = vadd.f32 %v297_v37, %v152_v28  ;;  %v402_v57 = vadd.f32 %v401_v29, %v208_v63  ;;  %v187_v29 = vunpack.c.h.bf16 %v9393_v47 }
 0x1c7   :  { %4441 = vmatpush1.bf16.msra.mxu0 %v7951_v30  ;;  %4605 = vmatpush1.bf16.msra.mxu1 %v7954_v31  ;;  %v9339_v30 = vld [vmem:[%s9474_s0 + $0x58] sm:$0xff] }
 0x1c8   :  { %4442 = vmatprep.subr.bf16.mxu0 %v7959_v58  ;;  %4606 = vmatprep.subr.bf16.mxu1 %v7962_v36  ;;  %v9344_v31 = vld [vmem:[%s9474_s0 + $0x138] sm:$0xff]  ;;  %v155_v24 = vunpack.c.h.bf16 %v9339_v30 }
 0x1c9   :  { %v7987_v58 = vld [vmem:[#allocation5 + $0x440] ss:$16 sps:$4 sm:$0xff]   ;;  %v211_v36 = vunpack.c.h.bf16 %v9344_v31 }
 0x1ca   :  { %v337_v2 = vadd.f32 %v336_v44, %v155_v24  ;;  %v8011_v24 = vld [vmem:[#allocation5 + $0x4c0] ss:$16 sps:$4 sm:$0xff]  }
 0x1cb   :  { %4443 = vmatpush1.bf16.msra.mxu0 %v7957_v33  ;;  %4607 = vmatpush1.bf16.msra.mxu1 %v7960_v52  ;;  %v160_v33 = vunpack.c.l.bf16 %v9249_v38  ;;  %v216_v52 = vunpack.c.l.bf16 %v9254_v41  ;;  %v7996_v38 = vld [vmem:[#allocation5 + $0x468] ss:$16 sps:$4 sm:$0xff]   ;;  %v441_v60 = vadd.f32 %v440_v45, %v211_v36 }
 0x1cc   :  { %4444 = vmatprep.subr.bf16.mxu0 %v7965_v48  ;;  %4608 = vmatprep.subr.bf16.mxu1 %v7968_v9  ;;  %v9353_v48 = vld [vmem:[%s9474_s0 + $0x78] sm:$0xff] }
 0x1cd   :  { %v9358_v9 = vld [vmem:[%s9474_s0 + $0x158] sm:$0xff]  ;;  %v163_v41 = vunpack.c.h.bf16 %v9353_v48  ;;  %v299_v62 = vadd.f32 %v298_v34, %v160_v33  ;;  %v403_v1 = vadd.f32 %v402_v57, %v216_v52  ;;  %v341_v34 = vsel %vm249_vm0, %v187_v29, 0.0 }
 0x1ce   :  { %v8014_v45 = vld [vmem:[#allocation5 + $0x4c8] ss:$16 sps:$4 sm:$0xff]  }
 0x1cf   :  { %4445 = vmatpush1.bf16.msra.mxu0 %v7963_v53  ;;  %4609 = vmatpush1.bf16.msra.mxu1 %v7966_v54  ;;  %v7993_v53 = vld [vmem:[#allocation5 + $0x460] ss:$16 sps:$4 sm:$0xff]   ;;  %v219_v54 = vunpack.c.h.bf16 %v9358_v9  ;;  %v338_v20 = vadd.f32 %v337_v2, %v163_v41  ;;  %v8044_v29 = vld [vmem:[#allocation5 + $0x568] ss:$16 sps:$4 sm:$0xff]  }
 0x1d0   :  { %4446 = vmatprep.subr.bf16.mxu0 %v7971_v61  ;;  %4610 = vmatprep.subr.bf16.mxu1 %v7974_v27  ;;  %v168_v61 = vunpack.c.l.bf16 %v9263_v55  ;;  %v224_v27 = vunpack.c.l.bf16 %v9268_v56  ;;  %v8002_v55 = vld [vmem:[#allocation5 + $0x488] ss:$16 sps:$4 sm:$0xff]   ;;  %v8010_v56 = vld [vmem:[#allocation5 + $0x4ac] ss:$16 sps:$4 sm:$0xff]  }
 0x1d1   :  { %v442_v25 = vadd.f32 %v441_v60, %v219_v54  ;;  %v8020_v54 = vld [vmem:[#allocation5 + $0x4e8] ss:$16 sps:$4 sm:$0xff]  }
 0x1d2   :  { %v300_v21 = vadd.f32 %v299_v62, %v168_v61  ;;  %v8025_v61 = vld [vmem:[#allocation5 + $0x504] ss:$16 sps:$4 sm:$0xff]  }
 0x1d3   :  { %4447 = vmatpush1.bf16.msra.mxu0 %v7969_v0  ;;  %4611 = vmatpush1.bf16.msra.mxu1 %v7972_v3  ;;  %v9367_v0 = vld [vmem:[%s9474_s0 + $0x98] sm:$0xff] }
 0x1d4   :  { %4457 = vmatprep.subr.bf16.mxu0 %v7977_v42  ;;  %4621 = vmatprep.subr.bf16.mxu1 %v7980_v14  ;;  %v9372_v3 = vld [vmem:[%s9474_s0 + $0x178] sm:$0xff]  ;;  %v8004_v42 = vld [vmem:[#allocation5 + $0x48c] ss:$16 sps:$4 sm:$0xff]   ;;  %v301_v63 = vadd.f32 %v300_v21, %v176_v17 }
 0x1d5   :  { %v7999_v14 = vld [vmem:[#allocation5 + $0x480] ss:$16 sps:$4 sm:$0xff]   ;;  %v8037_v21 = vld [vmem:[#allocation5 + $0x544] ss:$16 sps:$4 sm:$0xff]  }
 0x1d6   :  { %4449 = vmatmul.mubr.bf16.vlgmr.msra.gmra.mrb[0].mxu0 %v3081_v7  ;;  %4613 = vmatmul.mubr.bf16.vlgmr.msra.gmra.mrb[0].mxu1 %v3081_v7  ;;  %v227_v7 = vunpack.c.h.bf16 %v9372_v3 }
 0x1d7   :  { %4458 = vmatpush1.bf16.msra.mxu0 %v7975_v39  ;;  %4622 = vmatpush1.bf16.msra.mxu1 %v7978_v40  ;;  %v8007_v39 = vld [vmem:[#allocation5 + $0x4a4] ss:$16 sps:$4 sm:$0xff]   ;;  %v171_v40 = vunpack.c.h.bf16 %v9367_v0 }
 0x1d8   :  { %4459 = vmatprep.subr.bf16.mxu0 %v7983_v8  ;;  %4623 = vmatprep.subr.bf16.mxu1 %v7986_v6  ;;  %v404_v8 = vadd.f32 %v403_v1, %v224_v27  ;;  %v9381_v6 = vld [vmem:[%s9474_s0 + $0xb8] sm:$0xff]  ;;  %v443_v28 = vadd.f32 %v442_v25, %v227_v7  ;;  %v8028_v27 = vld [vmem:[#allocation5 + $0x50c] ss:$16 sps:$4 sm:$0xff]  }
 0x1d9   :  { %4489 = vmatprep.mubr.bf16.mxu0 %v3084_v22  ;;  %4653 = vmatprep.mubr.bf16.mxu1 %v3084_v22  ;;  %v9398_v22 = vld [vmem:[%s9474_s0 + $0x1b8] sm:$0x11]  ;;  %v179_v43 = vunpack.c.h.bf16 %v9381_v6  ;;  %v339_v49 = vadd.f32 %v338_v20, %v171_v40  ;;  %v8032_v25 = vld [vmem:[#allocation5 + $0x528] ss:$16 sps:$4 sm:$0xff]  }
 0x1da   :  { %v405_v37 = vadd.f32 %v404_v8, %v232_v19  ;;  %v8029_v40 = vld [vmem:[#allocation5 + $0x520] ss:$16 sps:$4 sm:$0xff]   ;;  %v8040_v8 = vld [vmem:[#allocation5 + $0x54c] ss:$16 sps:$4 sm:$0xff]  }
 0x1db   :  { %4460 = vmatpush1.bf16.msra.mxu0 %v7981_v11  ;;  %4624 = vmatpush1.bf16.msra.mxu1 %v7984_v13  ;;  %v9386_v11 = vld [vmem:[%s9474_s0 + $0x198] sm:$0xff]  ;;  %v184_v13 = vunpack.c.l.bf16 %v9289_v12  ;;  %v340_v36 = vadd.f32 %v339_v49, %v179_v43  ;;  %s8623_s0 = smov [#allocation10]  }
 0x1dc   :  { %4461 = vmatprep.subr.bf16.mxu0 %v7989_v32  ;;  %4625 = vmatprep.subr.bf16.mxu1 %v7992_v35  ;;  %v235_v26 = vunpack.c.h.bf16 %v9386_v11  ;;  %v8008_v12 = vld [vmem:[#allocation5 + $0x4a8] ss:$16 sps:$4 sm:$0xff]   ;;  %v243_v32 = vunpack.c.h.bf16 %v9398_v22  ;;  %v8016_v35 = vld [vmem:[#allocation5 + $0x4cc] ss:$16 sps:$4 sm:$0xff]   ;;  %s6517_s21 = sshll.u32 %s8623_s0, 4  ;;  %s6518_s21 = int_to_ptr.vmem [resolvable:$true] %s6517_s21 }
 0x1dd   :  { %v8038_v43 = vld [vmem:[#allocation5 + $0x548] ss:$16 sps:$4 sm:$0xff]   ;;  %s8584_s4 = scalar_lea.vmem %s6518_s21, 32  ;;  %p8589_p5 = scmp.lt.s32.totalorder %s6518_s21, %s6518_s21 }
 0x1de   :  { %v444_v44 = vadd.f32 %v443_v28, %v235_v26  ;;  %v445_v57 = vsel %vm249_vm0, %v243_v32, 0.0  ;;  %v8043_v28 = vld [vmem:[#allocation5 + $0x564] ss:$16 sps:$4 sm:$0xff]   ;;  %p8585_p4 = scmp.ne.s32.totalorder %s6518_s21, %s8584_s4  ;;  %p8590_p6 = scmp.lt.s32.totalorder %s8584_s4, %s8584_s4 }
 0x1df   :  { %4462 = vmatpush1.bf16.msra.mxu0 %v7987_v58  ;;  %4626 = vmatpush1.bf16.msra.mxu1 %v7990_v23  ;;  %v302_v58 = vsel %vm249_vm0, %v184_v13, 0.0  ;;  %v406_v23 = vsel %vm249_vm0, %v240_v16, 0.0 }
 0x1e0   :  { %4463 = vmatprep.subr.bf16.mxu0 %v7995_v51  ;;  %4627 = vmatprep.subr.bf16.mxu1 %v7998_v10  ;;  %v303_v33 = vadd.f32 %v302_v58, %v301_v63  ;;  %v407_v52 = vadd.f32 %v406_v23, %v405_v37  ;;  %v8019_v51 = vld [vmem:[#allocation5 + $0x4e4] ss:$16 sps:$4 sm:$0xff]   ;;  %v8022_v10 = vld [vmem:[#allocation5 + $0x4ec] ss:$16 sps:$4 sm:$0xff]   ;;  %v446_v41 = vadd.f32 %v445_v57, %v444_v44  ;;  %v8047_v44 = vld [vmem:[#allocation5 + $0x580] ss:$16 sps:$4 sm:$0xff]   ;;  %p8591_p7 = por %p8590_p6, %p8589_p5 }
 0x1e1   :  { %v8049_v58 = vld [vmem:[#allocation5 + $0x584] ss:$16 sps:$4 sm:$0xff]   ;;  %v8052_v23 = vld [vmem:[#allocation5 + $0x58c] ss:$16 sps:$4 sm:$0xff]  }
 0x1e2   :  { %v304_v2 = vrot.slane %v303_v33, 4  ;;  %v408_v60 = vrot.slane %v407_v52, 4  ;;  %v447_v1 = vrot.slane %v446_v41, 4  ;;  %v8058_v57 = vld [vmem:[#allocation5 + $0x5ac] ss:$16 sps:$4 sm:$0xff]   ;;  %p8592_p8 = pnand %p8591_p7, %p8585_p4 }
 0x1e3   :  { %4464 = vmatpush1.bf16.msra.mxu0 %v7993_v53  ;;  %4628 = vmatpush1.bf16.msra.mxu1 %v7996_v38  ;;  %v8017_v53 = vld [vmem:[#allocation5 + $0x4e0] ss:$16 sps:$4 sm:$0xff]   ;;  %v342_v38 = vadd.f32 %v341_v34, %v340_v36  ;;  %v8055_v34 = vld [vmem:[#allocation5 + $0x5a4] ss:$16 sps:$4 sm:$0xff]  }
 0x1e4   :  { %4465 = vmatprep.subr.bf16.mxu0 %v8001_v4  ;;  %4629 = vmatprep.subr.bf16.mxu1 %v8004_v42  ;;  %v8023_v4 = vld [vmem:[#allocation5 + $0x500] ss:$16 sps:$4 sm:$0xff]   ;;  %v8026_v42 = vld [vmem:[#allocation5 + $0x508] ss:$16 sps:$4 sm:$0xff]   ;;  %v448_v20 = vadd.f32 %v447_v1, %v446_v41 }
 0x1e5   :  { %v343_v62 = vrot.slane %v342_v38, 4  ;;  %v8062_v1 = vld [vmem:[#allocation5 + $0x5c8] ss:$16 sps:$4 sm:$0xff]  }
 0x1e6   :  { %v449_v16 = vrot.slane %v448_v20, 2 }
 0x1e7   :  { %4466 = vmatpush1.bf16.msra.mxu0 %v7999_v14  ;;  %4630 = vmatpush1.bf16.msra.mxu1 %v8002_v55  ;;  %v305_v14 = vadd.f32 %v304_v2, %v303_v33  ;;  %v409_v55 = vadd.f32 %v408_v60, %v407_v52  ;;  %v344_v7 = vadd.f32 %v343_v62, %v342_v38  ;;  %v8056_v38 = vld [vmem:[#allocation5 + $0x5a8] ss:$16 sps:$4 sm:$0xff]   ;;  %v8061_v2 = vld [vmem:[#allocation5 + $0x5c4] ss:$16 sps:$4 sm:$0xff]   ;;  %v8064_v60 = vld [vmem:[#allocation5 + $0x5cc] ss:$16 sps:$4 sm:$0xff]  }
 0x1e8   :  { %4467 = vmatprep.subr.bf16.mxu0 %v8007_v39  ;;  %4631 = vmatprep.subr.bf16.mxu1 %v8010_v56  ;;  %v8031_v39 = vld [vmem:[#allocation5 + $0x524] ss:$16 sps:$4 sm:$0xff]   ;;  %v8034_v56 = vld [vmem:[#allocation5 + $0x52c] ss:$16 sps:$4 sm:$0xff]   ;;  %v450_v37 = vadd.f32 %v449_v16, %v448_v20  ;;  %v8059_v62 = vld [vmem:[#allocation5 + $0x5c0] ss:$16 sps:$4 sm:$0xff]   ;;  %v138_v16 = vunpack.c.l.bf16 %v9308_v15  ;;  %v210_v15 = vunpack.c.l.bf16 %v9344_v31 }
 0x1e9   :  { %v306_v17 = vrot.slane %v305_v14, 2  ;;  %v410_v19 = vrot.slane %v409_v55, 2  ;;  %v345_v13 = vrot.slane %v344_v7, 2  ;;  %v8091_v31 = vld [vmem:[#allocation5 + $0x664] ss:$16 sps:$4 sm:$0xff]  }
 0x1ea   :  { %v451_v36 = vrot.slane %v450_v37, 1 }
 0x1eb   :  { %4468 = vmatpush1.bf16.msra.mxu0 %v8005_v5  ;;  %4632 = vmatpush1.bf16.msra.mxu1 %v8008_v12  ;;  %v8035_v5 = vld [vmem:[#allocation5 + $0x540] ss:$16 sps:$4 sm:$0xff]   ;;  %v307_v26 = vadd.f32 %v306_v17, %v305_v14  ;;  %v411_v49 = vadd.f32 %v410_v19, %v409_v55  ;;  %v8046_v12 = vld [vmem:[#allocation5 + $0x56c] ss:$16 sps:$4 sm:$0xff]   ;;  %v346_v63 = vadd.f32 %v345_v13, %v344_v7  ;;  %v8067_v14 = vld [vmem:[#allocation5 + $0x5e4] ss:$16 sps:$4 sm:$0xff]  }
 0x1ec   :  { %4469 = vmatprep.subr.bf16.mxu0 %v8013_v18  ;;  %4633 = vmatprep.subr.bf16.mxu1 %v8016_v35  ;;  %v8041_v18 = vld [vmem:[#allocation5 + $0x560] ss:$16 sps:$4 sm:$0xff]   ;;  %v8070_v55 = vld [vmem:[#allocation5 + $0x5ec] ss:$16 sps:$4 sm:$0xff]   ;;  %v8068_v7 = vld [vmem:[#allocation5 + $0x5e8] ss:$16 sps:$4 sm:$0xff]  }
 0x1ed   :  { %v308_v32 = vrot.slane %v307_v26, 1  ;;  %v412_v35 = vrot.slane %v411_v49, 1  ;;  %v8076_v17 = vld [vmem:[#allocation5 + $0x60c] ss:$16 sps:$4 sm:$0xff]   ;;  %v8074_v13 = vld [vmem:[#allocation5 + $0x608] ss:$16 sps:$4 sm:$0xff]  }
 0x1ef   :  { %4470 = vmatpush1.bf16.msra.mxu0 %v8011_v24  ;;  %4634 = vmatpush1.bf16.msra.mxu1 %v8014_v45  ;;  %v347_v24 = vrot.slane %v346_v63, 1  ;;  %v8050_v45 = vld [vmem:[#allocation5 + $0x588] ss:$16 sps:$4 sm:$0xff]   ;;  %v309_v33 = vadd.f32 %v308_v32, %v307_v26  ;;  %v413_v52 = vadd.f32 %v412_v35, %v411_v49  ;;  %v202_v26 = vunpack.c.l.bf16 %v9328_v59  ;;  %v8079_v49 = vld [vmem:[#allocation5 + $0x624] ss:$16 sps:$4 sm:$0xff]  }
 0x1f0   :  { %4471 = vmatprep.subr.bf16.mxu0 %v8019_v51  ;;  %4635 = vmatprep.subr.bf16.mxu1 %v8022_v10  ;;  %v452_v10 = vadd.f32 %v451_v36, %v450_v37  ;;  %v154_v37 = vunpack.c.l.bf16 %v9339_v30  ;;  %v8088_v59 = vld [vmem:[#allocation5 + $0x64c] ss:$16 sps:$4 sm:$0xff]   ;;  %v8083_v32 = vld [vmem:[#allocation5 + $0x640] ss:$16 sps:$4 sm:$0xff]   ;;  %v8086_v35 = vld [vmem:[#allocation5 + $0x648] ss:$16 sps:$4 sm:$0xff]  }
 0x1f1   :  { %v348_v51 = vadd.f32 %v347_v24, %v346_v63  ;;  %v457_v41 = vpack.c.bf16 %v309_v33, %v309_v33  ;;  %v8080_v63 = vld [vmem:[#allocation5 + $0x628] ss:$16 sps:$4 sm:$0xff]   ;;  %v8094_v36 = vld [vmem:[#allocation5 + $0x66c] ss:$16 sps:$4 sm:$0xff]   ;;  %v170_v33 = vunpack.c.l.bf16 %v9367_v0  ;;  %v8103_v0 = vld [vmem:[#allocation5 + $0x6a4] ss:$16 sps:$4 sm:$0xff]  }
 0x1f3   :  { %4472 = vmatpush1.bf16.msra.mxu0 %v8017_v53  ;;  %4636 = vmatpush1.bf16.msra.mxu1 %v8020_v54  ;;  %v8053_v53 = vld [vmem:[#allocation5 + $0x5a0] ss:$16 sps:$4 sm:$0xff]   ;;  %v465_v54 = vpack.c.bf16 %v413_v52, %v413_v52  ;;  %v226_v52 = vunpack.c.l.bf16 %v9372_v3  ;;  %v8106_v3 = vld [vmem:[#allocation5 + $0x6ac] ss:$16 sps:$4 sm:$0xff]  }
 0x1f4   :  { %4473 = vmatprep.subr.bf16.mxu0 %v8025_v61  ;;  %4637 = vmatprep.subr.bf16.mxu1 %v8028_v27  ;;  %v460_v61 = vpack.c.bf16 %v348_v51, %v348_v51  ;;  %v468_v27 = vpack.c.bf16 %v452_v10, %v452_v10  ;;  %v8095_v51 = vld [vmem:[#allocation5 + $0x680] ss:$16 sps:$4 sm:$0xff]   ;;  %v8098_v10 = vld [vmem:[#allocation5 + $0x688] ss:$16 sps:$4 sm:$0xff]  }
 0x1f7   :  { %4474 = vmatpush1.bf16.msra.mxu0 %v8023_v4  ;;  %4638 = vmatpush1.bf16.msra.mxu1 %v8026_v42  ;;  %v3059_v4 = vunpack.c.l.b16 %v457_v41  ;;  %v3067_v42 = vunpack.c.l.b16 %v465_v54 }
 0x1f8   :  { %4475 = vmatprep.subr.bf16.mxu0 %v8031_v39  ;;  %4639 = vmatprep.subr.bf16.mxu1 %v8034_v56  ;;  %v3062_v39 = vunpack.c.l.b16 %v460_v61  ;;  %v3070_v56 = vunpack.c.l.b16 %v468_v27  ;;  %v8101_v61 = vld [vmem:[#allocation5 + $0x6a0] ss:$16 sps:$4 sm:$0xff]   ;;  %v8104_v27 = vld [vmem:[#allocation5 + $0x6a8] ss:$16 sps:$4 sm:$0xff]  }
 0x1f9   :  { %v3075_v20 = vsel %vm1406_vm1, %v3067_v42, %v3059_v4 }
 0x1fa   :  { %v3083_v19 = vpack.c.b16 %v3075_v20, %v3075_v20 }
 0x1fb   :  { %4476 = vmatpush1.bf16.msra.mxu0 %v8029_v40  ;;  %4640 = vmatpush1.bf16.msra.mxu1 %v8032_v25  ;;  %v8065_v40 = vld [vmem:[#allocation5 + $0x5e0] ss:$16 sps:$4 sm:$0xff]   ;;  %v8073_v25 = vld [vmem:[#allocation5 + $0x604] ss:$16 sps:$4 sm:$0xff]  }
 0x1fc   :  { %4477 = vmatprep.subr.bf16.mxu0 %v8037_v21  ;;  %4641 = vmatprep.subr.bf16.mxu1 %v8040_v8  ;;  %v3078_v21 = vsel %vm1406_vm1, %v3070_v56, %v3062_v39  ;;  %v8071_v8 = vld [vmem:[#allocation5 + $0x600] ss:$16 sps:$4 sm:$0xff]   ;;  %v8115_v39 = vld [vmem:[#allocation5 + $0x6e4] ss:$16 sps:$4 sm:$0xff]   ;;  %v8118_v56 = vld [vmem:[#allocation5 + $0x6ec] ss:$16 sps:$4 sm:$0xff]  }
 0x1ff   :  { %4478 = vmatpush1.bf16.msra.mxu0 %v8035_v5  ;;  %4642 = vmatpush1.bf16.msra.mxu1 %v8038_v43  ;;  %v146_v5 = vunpack.c.l.bf16 %v9313_v46  ;;  %v194_v43 = vunpack.c.l.bf16 %v9323_v50  ;;  %v8085_v50 = vld [vmem:[#allocation5 + $0x644] ss:$16 sps:$4 sm:$0xff]  }
 0x200   :  { %4479 = vmatprep.subr.bf16.mxu0 %v8043_v28  ;;  %4643 = vmatprep.subr.bf16.mxu1 %v8046_v12  ;;  %v8082_v28 = vld [vmem:[#allocation5 + $0x62c] ss:$16 sps:$4 sm:$0xff]   ;;  %v3086_v12 = vpack.c.b16 %v3078_v21, %v3078_v21  ;;  %v8119_v21 = vld [vmem:[#allocation5 + $0x700] ss:$16 sps:$4 sm:$0xff]  }
 0x201   :  { %v323_v46 = vadd.f32 %v146_v5, %v138_v16  ;;  %v8127_v5 = vld [vmem:[#allocation5 + $0x724] ss:$16 sps:$4 sm:$0xff]  }
 0x203   :  { %4480 = vmatpush1.bf16.msra.mxu0 %v8041_v18  ;;  %4644 = vmatpush1.bf16.msra.mxu1 %v8044_v29  ;;  %v8077_v18 = vld [vmem:[#allocation5 + $0x620] ss:$16 sps:$4 sm:$0xff]   ;;  %v427_v29 = vadd.f32 %v202_v26, %v194_v43  ;;  %v324_v24 = vadd.f32 %v323_v46, %v154_v37  ;;  %v8130_v43 = vld [vmem:[#allocation5 + $0x72c] ss:$16 sps:$4 sm:$0xff]  }
 0x204   :  { %4481 = vmatprep.subr.bf16.mxu0 %v8049_v58  ;;  %4645 = vmatprep.subr.bf16.mxu1 %v8052_v23  ;;  %v162_v58 = vunpack.c.l.bf16 %v9353_v48  ;;  %v218_v23 = vunpack.c.l.bf16 %v9358_v9  ;;  %v8097_v48 = vld [vmem:[#allocation5 + $0x684] ss:$16 sps:$4 sm:$0xff]   ;;  %v8100_v9 = vld [vmem:[#allocation5 + $0x68c] ss:$16 sps:$4 sm:$0xff]   ;;  %v8125_v26 = vld [vmem:[#allocation5 + $0x720] ss:$16 sps:$4 sm:$0xff]  }
 0x205   :  { %v428_v30 = vadd.f32 %v427_v29, %v210_v15  ;;  %v8131_v37 = vld [vmem:[#allocation5 + $0x740] ss:$16 sps:$4 sm:$0xff]   ;;  %v8134_v15 = vld [vmem:[#allocation5 + $0x748] ss:$16 sps:$4 sm:$0xff]  }
 0x207   :  { %4482 = vmatpush1.bf16.msra.mxu0 %v8047_v44  ;;  %4646 = vmatpush1.bf16.msra.mxu1 %v8050_v45  ;;  %v8089_v44 = vld [vmem:[#allocation5 + $0x660] ss:$16 sps:$4 sm:$0xff]   ;;  %v8092_v45 = vld [vmem:[#allocation5 + $0x668] ss:$16 sps:$4 sm:$0xff]  }
 0x208   :  { %4483 = vmatprep.subr.bf16.mxu0 %v8055_v34  ;;  %4647 = vmatprep.subr.bf16.mxu1 %v8058_v57  ;;  %v325_v34 = vadd.f32 %v324_v24, %v162_v58  ;;  %v429_v57 = vadd.f32 %v428_v30, %v218_v23  ;;  %v8145_v24 = vld [vmem:[#allocation5 + $0x784] ss:$16 sps:$4 sm:$0xff]   ;;  %v8148_v30 = vld [vmem:[#allocation5 + $0x78c] ss:$16 sps:$4 sm:$0xff]  }
 0x20a   :  { %v326_v41 = vadd.f32 %v325_v34, %v170_v33  ;;  %v430_v54 = vadd.f32 %v429_v57, %v226_v52  ;;  %v8146_v33 = vld [vmem:[#allocation5 + $0x788] ss:$16 sps:$4 sm:$0xff]   ;;  %v8151_v57 = vld [vmem:[#allocation5 + $0x7a4] ss:$16 sps:$4 sm:$0xff]  }
 0x20b   :  { %4484 = vmatpush1.bf16.msra.mxu0 %v8053_v53  ;;  %4648 = vmatpush1.bf16.msra.mxu1 %v8056_v38  ;;  %v178_v53 = vunpack.c.l.bf16 %v9381_v6  ;;  %v234_v38 = vunpack.c.l.bf16 %v9386_v11  ;;  %v8112_v6 = vld [vmem:[#allocation5 + $0x6cc] ss:$16 sps:$4 sm:$0xff]  }
 0x20c   :  { %4485 = vmatprep.subr.bf16.mxu0 %v8061_v2  ;;  %4649 = vmatprep.subr.bf16.mxu1 %v8064_v60  ;;  %v186_v2 = vunpack.c.l.bf16 %v9393_v47  ;;  %v242_v60 = vunpack.c.l.bf16 %v9398_v22  ;;  %v8110_v47 = vld [vmem:[#allocation5 + $0x6c8] ss:$16 sps:$4 sm:$0xff]  }
 0x20d   :  { %v431_v4 = vadd.f32 %v430_v54, %v234_v38  ;;  %v8157_v54 = vld [vmem:[#allocation5 + $0x7c4] ss:$16 sps:$4 sm:$0xff]  }
 0x20e   :  { %v328_v11 = vsel %vm249_vm0, %v186_v2, 0.0  ;;  %v432_v42 = vsel %vm249_vm0, %v242_v60, 0.0  ;;  %v9428_v2 = vld [vmem:[#allocation2] sm:$0x3f]  ;;  %v8155_v60 = vld [vmem:[#allocation5 + $0x7c0] ss:$16 sps:$4 sm:$0xff]  }
 0x20f   :  { %4486 = vmatpush1.bf16.msra.mxu0 %v8059_v62  ;;  %4650 = vmatpush1.bf16.msra.mxu1 %v8062_v1  ;;  %v8109_v62 = vld [vmem:[#allocation5 + $0x6c4] ss:$16 sps:$4 sm:$0xff]   ;;  %v327_v1 = vadd.f32 %v326_v41, %v178_v53  ;;  %v433_v22 = vadd.f32 %v432_v42, %v431_v4  ;;  %v8152_v53 = vld [vmem:[#allocation5 + $0x7a8] ss:$16 sps:$4 sm:$0xff]   ;;  %v8166_v4 = vld [vmem:[#allocation5 + $0x7ec] ss:$16 sps:$4 sm:$0xff]  }
 0x210   :  { %4487 = vmatprep.subr.bf16.mxu0 %v8067_v14  ;;  %4651 = vmatprep.subr.bf16.mxu1 %v8070_v55  ;;  %v8107_v14 = vld [vmem:[#allocation5 + $0x6c0] ss:$16 sps:$4 sm:$0xff]   ;;  %v8164_v42 = vld [vmem:[#allocation5 + $0x7e8] ss:$16 sps:$4 sm:$0xff]  }
 0x211   :  { %v329_v55 = vadd.f32 %v328_v11, %v327_v1  ;;  %v8163_v1 = vld [vmem:[#allocation5 + $0x7e4] ss:$16 sps:$4 sm:$0xff]   ;;  %v8161_v11 = vld [vmem:[#allocation5 + $0x7e0] ss:$16 sps:$4 sm:$0xff]  }
 0x213   :  { %4488 = vmatpush1.bf16.msra.mxu0 %v8065_v40  ;;  %4652 = vmatpush1.bf16.msra.mxu1 %v8068_v7  ;;  %v8113_v40 = vld [vmem:[#allocation5 + $0x6e0] ss:$16 sps:$4 sm:$0xff]   ;;  %v8116_v7 = vld [vmem:[#allocation5 + $0x6e8] ss:$16 sps:$4 sm:$0xff]   ;;  %v330_v20 = vrot.slane %v329_v55, 4 }
 0x214   :  { %4498 = vmatprep.subr.bf16.mxu0 %v8073_v25  ;;  %4662 = vmatprep.subr.bf16.mxu1 %v8076_v17  ;;  %v434_v25 = vrot.slane %v433_v22, 4  ;;  %v8121_v17 = vld [vmem:[#allocation5 + $0x704] ss:$16 sps:$4 sm:$0xff]  }
 0x216   :  { %4490 = vmatmul.mubr.bf16.vlgmr.msra.gmra.mrb[0].mxu0 %v3083_v19  ;;  %4654 = vmatmul.mubr.bf16.vlgmr.msra.gmra.mrb[0].mxu1 %v3083_v19  ;;  %v8124_v19 = vld [vmem:[#allocation5 + $0x70c] ss:$16 sps:$4 sm:$0xff]   ;;  %v435_v16 = vadd.f32 %v434_v25, %v433_v22 }
 0x217   :  { %4499 = vmatpush1.bf16.msra.mxu0 %v8071_v8  ;;  %4663 = vmatpush1.bf16.msra.mxu1 %v8074_v13  ;;  %v8122_v8 = vld [vmem:[#allocation5 + $0x708] ss:$16 sps:$4 sm:$0xff]   ;;  %v331_v13 = vadd.f32 %v330_v20, %v329_v55  ;;  %v8172_v55 = vld [vmem:[#allocation5 + $0x100c] ss:$16 sps:$4 sm:$0xff]  }
 0x218   :  { %4500 = vmatprep.subr.bf16.mxu0 %v8079_v49  ;;  %4664 = vmatprep.subr.bf16.mxu1 %v8082_v28  ;;  %v8128_v49 = vld [vmem:[#allocation5 + $0x728] ss:$16 sps:$4 sm:$0xff]   ;;  %v8178_v20 = vld [vmem:[#allocation5 + $0x102c] ss:$16 sps:$4 sm:$0xff]  }
 0x219   :  { %4530 = vmatprep.mubr.bf16.mxu0 %v3086_v12  ;;  %4694 = vmatprep.mubr.bf16.mxu1 %v3086_v12  ;;  %v332_v28 = vrot.slane %v331_v13, 2  ;;  %v436_v12 = vrot.slane %v435_v16, 2 }
 0x21b   :  { %4501 = vmatpush1.bf16.msra.mxu0 %v8077_v18  ;;  %4665 = vmatpush1.bf16.msra.mxu1 %v8080_v63  ;;  %v8133_v18 = vld [vmem:[#allocation5 + $0x744] ss:$16 sps:$4 sm:$0xff]   ;;  %v8136_v63 = vld [vmem:[#allocation5 + $0x74c] ss:$16 sps:$4 sm:$0xff]   ;;  %v333_v46 = vadd.f32 %v332_v28, %v331_v13  ;;  %v437_v29 = vadd.f32 %v436_v12, %v435_v16  ;;  %v8179_v13 = vld [vmem:[#allocation5 + $0x1040] ss:$16 sps:$4 sm:$0xff]  }
 0x21c   :  { %4502 = vmatprep.subr.bf16.mxu0 %v8085_v50  ;;  %4666 = vmatprep.subr.bf16.mxu1 %v8088_v59  ;;  %v8139_v50 = vld [vmem:[#allocation5 + $0x764] ss:$16 sps:$4 sm:$0xff]   ;;  %v8142_v59 = vld [vmem:[#allocation5 + $0x76c] ss:$16 sps:$4 sm:$0xff]   ;;  %v8182_v16 = vld [vmem:[#allocation5 + $0x1048] ss:$16 sps:$4 sm:$0xff]  }
 0x21d   :  { %v334_v58 = vrot.slane %v333_v46, 1  ;;  %v438_v23 = vrot.slane %v437_v29, 1  ;;  %v8193_v28 = vld [vmem:[#allocation5 + $0x1084] ss:$16 sps:$4 sm:$0xff]   ;;  %v8196_v12 = vld [vmem:[#allocation5 + $0x108c] ss:$16 sps:$4 sm:$0xff]  }
 0x21f   :  { %4503 = vmatpush1.bf16.msra.mxu0 %v8083_v32  ;;  %4667 = vmatpush1.bf16.msra.mxu1 %v8086_v35  ;;  %v8137_v32 = vld [vmem:[#allocation5 + $0x760] ss:$16 sps:$4 sm:$0xff]   ;;  %v8140_v35 = vld [vmem:[#allocation5 + $0x768] ss:$16 sps:$4 sm:$0xff]   ;;  %v335_v52 = vadd.f32 %v334_v58, %v333_v46  ;;  %v439_v34 = vadd.f32 %v438_v23, %v437_v29  ;;  %v8211_v58 = vld [vmem:[#allocation5 + $0x10e4] ss:$16 sps:$4 sm:$0xff]  }
 0x220   :  { %4504 = vmatprep.subr.bf16.mxu0 %v8091_v31  ;;  %4668 = vmatprep.subr.bf16.mxu1 %v8094_v36  ;;  %v8622_v31 = vmov 1966171168   ;;  %v8197_v46 = vld [vmem:[#allocation5 + $0x10a0] ss:$16 sps:$4 sm:$0xff]   ;;  %v8200_v29 = vld [vmem:[#allocation5 + $0x10a8] ss:$16 sps:$4 sm:$0xff]  }
 0x221   :  { %v4898_v36 = vunpack.c.l.s4 %v8622_v31  ;;  %v459_v38 = vpack.c.bf16 %v335_v52, %v335_v52  ;;  %v467_v41 = vpack.c.bf16 %v439_v34, %v439_v34  ;;  %v8214_v23 = vld [vmem:[#allocation5 + $0x10ec] ss:$16 sps:$4 sm:$0xff]   ;;  %v8217_v31 = vld [vmem:[#allocation5 + $0x1104] ss:$16 sps:$4 sm:$0xff]   ;;  %v8221_v34 = vld [vmem:[#allocation5 + $0x1120] ss:$16 sps:$4 sm:$0xff]  }
 0x222   :  { %v8226_v52 = vld [vmem:[#allocation5 + $0x112c] ss:$16 sps:$4 sm:$0xff]  }
 0x223   :  { %4505 = vmatpush1.bf16.msra.mxu0 %v8089_v44  ;;  %4669 = vmatpush1.bf16.msra.mxu1 %v8092_v45  ;;  %v4900_v44 = vlaneseq  ;;  %v8143_v45 = vld [vmem:[#allocation5 + $0x780] ss:$16 sps:$4 sm:$0xff]  }
 0x224   :  { %4506 = vmatprep.subr.bf16.mxu0 %v8097_v48  ;;  %4670 = vmatprep.subr.bf16.mxu1 %v8100_v9  ;;  %v8154_v48 = vld [vmem:[#allocation5 + $0x7ac] ss:$16 sps:$4 sm:$0xff]   ;;  %v4899_v9 = vunpack.c.0.s8 %v4898_v36 }
 0x225   :  { %v8220_v36 = vld [vmem:[#allocation5 + $0x110c] ss:$16 sps:$4 sm:$0xff]  }
 0x227   :  { %4507 = vmatpush1.bf16.msra.mxu0 %v8095_v51  ;;  %4671 = vmatpush1.bf16.msra.mxu1 %v8098_v10  ;;  %v4901_v51 = vshrl.u32 %v4900_v44, 7  ;;  %v8149_v10 = vld [vmem:[#allocation5 + $0x7a0] ss:$16 sps:$4 sm:$0xff]  }
 0x228   :  { %4508 = vmatprep.subr.bf16.mxu0 %v8103_v0  ;;  %4672 = vmatprep.subr.bf16.mxu1 %v8106_v3  ;;  %v8160_v0 = vld [vmem:[#allocation5 + $0x7cc] ss:$16 sps:$4 sm:$0xff]   ;;  %v8215_v44 = vld [vmem:[#allocation5 + $0x1100] ss:$16 sps:$4 sm:$0xff]  }
 0x229   :  { %v9426_v3 = vsub.s32 %v4899_v9, %v4901_v51  ;;  %v8232_v9 = vld [vmem:[#allocation5 + $0x114c] ss:$16 sps:$4 sm:$0xff]   ;;  %v8227_v51 = vld [vmem:[#allocation5 + $0x1140] ss:$16 sps:$4 sm:$0xff]  }
 0x22b   :  { %4509 = vmatpush1.bf16.msra.mxu0 %v8101_v61  ;;  %4673 = vmatpush1.bf16.msra.mxu1 %v8104_v27  ;;  %v8158_v61 = vld [vmem:[#allocation5 + $0x7c8] ss:$16 sps:$4 sm:$0xff]   ;;  %v3061_v27 = vunpack.c.l.b16 %v459_v38  ;;  %v8238_v38 = vld [vmem:[#allocation5 + $0x116c] ss:$16 sps:$4 sm:$0xff]  }
 0x22c   :  { %4510 = vmatprep.subr.bf16.mxu0 %v8109_v62  ;;  %4674 = vmatprep.subr.bf16.mxu1 %v8112_v6  ;;  %v3069_v62 = vunpack.c.l.b16 %v467_v41  ;;  %v9432_v6 = vrot.slane %v9428_v2, %v9426_v3  ;;  %v8233_v41 = vld [vmem:[#allocation5 + $0x1160] ss:$16 sps:$4 sm:$0xff]  }
 0x22e   :  { %v4911_v22 = vcombine.high %v9432_v6, %v9432_v6 }
 0x22f   :  { %4511 = vmatpush1.bf16.msra.mxu0 %v8107_v14  ;;  %4675 = vmatpush1.bf16.msra.mxu1 %v8110_v47  ;;  %v3077_v14 = vsel %vm1406_vm1, %v3069_v62, %v3061_v27  ;;  %v8169_v47 = vld [vmem:[#allocation5 + $0x1004] ss:$16 sps:$4 sm:$0xff]   ;;  %v8242_v27 = vld [vmem:[#allocation5 + $0x1188] ss:$16 sps:$4 sm:$0xff]  }
 0x230   :  { %4512 = vmatprep.subr.bf16.mxu0 %v8115_v39  ;;  %4676 = vmatprep.subr.bf16.mxu1 %v8118_v56  ;;  %v3085_v39 = vpack.c.b16 %v3077_v14, %v3077_v14  ;;  %v8167_v56 = vld [vmem:[#allocation5 + $0x1000] ss:$16 sps:$4 sm:$0xff]   ;;  %v9438_v25 = vrot.slane %v4911_v22, %v9426_v3  ;;  %v8247_v62 = vld [vmem:[#allocation5 + $0x11a4] ss:$16 sps:$4 sm:$0xff]   ;;  %v8256_v14 = vld [vmem:[#allocation5 + $0x11cc] ss:$16 sps:$4 sm:$0xff]  }
 0x231   :  { %v8259_v22 = vld [vmem:[#allocation5 + $0x11e4] ss:$16 sps:$4 sm:$0xff]  }
 0x233   :  { %4513 = vmatpush1.bf16.msra.mxu0 %v8113_v40  ;;  %4677 = vmatpush1.bf16.msra.mxu1 %v8116_v7  ;;  %v8170_v40 = vld [vmem:[#allocation5 + $0x1008] ss:$16 sps:$4 sm:$0xff]   ;;  %v8175_v7 = vld [vmem:[#allocation5 + $0x1024] ss:$16 sps:$4 sm:$0xff]  }
 0x234   :  { %4514 = vmatprep.subr.bf16.mxu0 %v8121_v17  ;;  %4678 = vmatprep.subr.bf16.mxu1 %v8124_v19  ;;  %v8173_v17 = vld [vmem:[#allocation5 + $0x1020] ss:$16 sps:$4 sm:$0xff]   ;;  %v8176_v19 = vld [vmem:[#allocation5 + $0x1028] ss:$16 sps:$4 sm:$0xff]  }
 0x237   :  { %4515 = vmatpush1.bf16.msra.mxu0 %v8119_v21  ;;  %4679 = vmatpush1.bf16.msra.mxu1 %v8122_v8  ;;  %v8181_v21 = vld [vmem:[#allocation5 + $0x1044] ss:$16 sps:$4 sm:$0xff]   ;;  %v8184_v8 = vld [vmem:[#allocation5 + $0x104c] ss:$16 sps:$4 sm:$0xff]  }
 0x238   :  { %4516 = vmatprep.subr.bf16.mxu0 %v8127_v5  ;;  %4680 = vmatprep.subr.bf16.mxu1 %v8130_v43  ;;  %v8187_v5 = vld [vmem:[#allocation5 + $0x1064] ss:$16 sps:$4 sm:$0xff]   ;;  %v8190_v43 = vld [vmem:[#allocation5 + $0x106c] ss:$16 sps:$4 sm:$0xff]  }
 0x23b   :  { %4517 = vmatpush1.bf16.msra.mxu0 %v8125_v26  ;;  %4681 = vmatpush1.bf16.msra.mxu1 %v8128_v49  ;;  %v8185_v26 = vld [vmem:[#allocation5 + $0x1060] ss:$16 sps:$4 sm:$0xff]   ;;  %v8188_v49 = vld [vmem:[#allocation5 + $0x1068] ss:$16 sps:$4 sm:$0xff]  }
 0x23c   :  { %4518 = vmatprep.subr.bf16.mxu0 %v8133_v18  ;;  %4682 = vmatprep.subr.bf16.mxu1 %v8136_v63  ;;  %v8191_v18 = vld [vmem:[#allocation5 + $0x1080] ss:$16 sps:$4 sm:$0xff]   ;;  %v8194_v63 = vld [vmem:[#allocation5 + $0x1088] ss:$16 sps:$4 sm:$0xff]  }
 0x23f   :  { %4519 = vmatpush1.bf16.msra.mxu0 %v8131_v37  ;;  %4683 = vmatpush1.bf16.msra.mxu1 %v8134_v15  ;;  %v8199_v37 = vld [vmem:[#allocation5 + $0x10a4] ss:$16 sps:$4 sm:$0xff]   ;;  %v8202_v15 = vld [vmem:[#allocation5 + $0x10ac] ss:$16 sps:$4 sm:$0xff]  }
 0x240   :  { %4520 = vmatprep.subr.bf16.mxu0 %v8139_v50  ;;  %4684 = vmatprep.subr.bf16.mxu1 %v8142_v59  ;;  %v8205_v50 = vld [vmem:[#allocation5 + $0x10c4] ss:$16 sps:$4 sm:$0xff]   ;;  %v8208_v59 = vld [vmem:[#allocation5 + $0x10cc] ss:$16 sps:$4 sm:$0xff]  }
 0x243   :  { %4521 = vmatpush1.bf16.msra.mxu0 %v8137_v32  ;;  %4685 = vmatpush1.bf16.msra.mxu1 %v8140_v35  ;;  %v8203_v32 = vld [vmem:[#allocation5 + $0x10c0] ss:$16 sps:$4 sm:$0xff]   ;;  %v8206_v35 = vld [vmem:[#allocation5 + $0x10c8] ss:$16 sps:$4 sm:$0xff]  }
 0x244   :  { %4522 = vmatprep.subr.bf16.mxu0 %v8145_v24  ;;  %4686 = vmatprep.subr.bf16.mxu1 %v8148_v30  ;;  %v8209_v24 = vld [vmem:[#allocation5 + $0x10e0] ss:$16 sps:$4 sm:$0xff]   ;;  %v8212_v30 = vld [vmem:[#allocation5 + $0x10e8] ss:$16 sps:$4 sm:$0xff]  }
 0x247   :  { %4523 = vmatpush1.bf16.msra.mxu0 %v8143_v45  ;;  %4687 = vmatpush1.bf16.msra.mxu1 %v8146_v33  ;;  %v8218_v45 = vld [vmem:[#allocation5 + $0x1108] ss:$16 sps:$4 sm:$0xff]   ;;  %v8223_v33 = vld [vmem:[#allocation5 + $0x1124] ss:$16 sps:$4 sm:$0xff]  }
 0x248   :  { %4524 = vmatprep.subr.bf16.mxu0 %v8151_v57  ;;  %4688 = vmatprep.subr.bf16.mxu1 %v8154_v48  ;;  %v8224_v57 = vld [vmem:[#allocation5 + $0x1128] ss:$16 sps:$4 sm:$0xff]   ;;  %v8229_v48 = vld [vmem:[#allocation5 + $0x1144] ss:$16 sps:$4 sm:$0xff]  }
 0x24b   :  { %4525 = vmatpush1.bf16.msra.mxu0 %v8149_v10  ;;  %4689 = vmatpush1.bf16.msra.mxu1 %v8152_v53  ;;  %v8230_v10 = vld [vmem:[#allocation5 + $0x1148] ss:$16 sps:$4 sm:$0xff]   ;;  %v8235_v53 = vld [vmem:[#allocation5 + $0x1164] ss:$16 sps:$4 sm:$0xff]  }
 0x24c   :  { %4526 = vmatprep.subr.bf16.mxu0 %v8157_v54  ;;  %4690 = vmatprep.subr.bf16.mxu1 %v8160_v0  ;;  %v8236_v54 = vld [vmem:[#allocation5 + $0x1168] ss:$16 sps:$4 sm:$0xff]   ;;  %v8241_v0 = vld [vmem:[#allocation5 + $0x1184] ss:$16 sps:$4 sm:$0xff]  }
 0x24f   :  { %4527 = vmatpush1.bf16.msra.mxu0 %v8155_v60  ;;  %4691 = vmatpush1.bf16.msra.mxu1 %v8158_v61  ;;  %v8244_v60 = vld [vmem:[#allocation5 + $0x118c] ss:$16 sps:$4 sm:$0xff]   ;;  %v8239_v61 = vld [vmem:[#allocation5 + $0x1180] ss:$16 sps:$4 sm:$0xff]  }
 0x250   :  { %4528 = vmatprep.subr.bf16.mxu0 %v8163_v1  ;;  %4692 = vmatprep.subr.bf16.mxu1 %v8166_v4  ;;  %v8250_v1 = vld [vmem:[#allocation5 + $0x11ac] ss:$16 sps:$4 sm:$0xff]   ;;  %v8245_v4 = vld [vmem:[#allocation5 + $0x11a0] ss:$16 sps:$4 sm:$0xff]  }
 0x253   :  { %4529 = vmatpush1.bf16.msra.mxu0 %v8161_v11  ;;  %4693 = vmatpush1.bf16.msra.mxu1 %v8164_v42  ;;  %v8248_v11 = vld [vmem:[#allocation5 + $0x11a8] ss:$16 sps:$4 sm:$0xff]   ;;  %v8253_v42 = vld [vmem:[#allocation5 + $0x11c4] ss:$16 sps:$4 sm:$0xff]  }
 0x254   :  { %5909 = vmatprep.subr.bf16.mxu0 %v8169_v47  ;;  %6032 = vmatprep.subr.bf16.mxu1 %v8172_v55  ;;  %v8251_v47 = vld [vmem:[#allocation5 + $0x11c0] ss:$16 sps:$4 sm:$0xff]   ;;  %v8254_v55 = vld [vmem:[#allocation5 + $0x11c8] ss:$16 sps:$4 sm:$0xff]  }
 0x256   :  { %4531 = vmatmul.mubr.bf16.vlgmr.msra.gmra.mrb[0].mxu0 %v3085_v39  ;;  %4695 = vmatmul.mubr.bf16.vlgmr.msra.gmra.mrb[0].mxu1 %v3085_v39  ;;  %v8262_v39 = vld [vmem:[#allocation5 + $0x11ec] ss:$16 sps:$4 sm:$0xff]  }
 0x257   :  { %5910 = vmatpush1.bf16.msra.mxu0 %v8167_v56  ;;  %6033 = vmatpush1.bf16.msra.mxu1 %v8170_v40  ;;  %v8257_v56 = vld [vmem:[#allocation5 + $0x11e0] ss:$16 sps:$4 sm:$0xff]   ;;  %v8260_v40 = vld [vmem:[#allocation5 + $0x11e8] ss:$16 sps:$4 sm:$0xff]  }
 0x258   :  { %5911 = vmatprep.subr.bf16.mxu0 %v8175_v7  ;;  %6034 = vmatprep.subr.bf16.mxu1 %v8178_v20  ;;  %v8265_v7 = vld [vmem:[#allocation5 + $0x1204] ss:$16 sps:$4 sm:$0xff]   ;;  %v8268_v20 = vld [vmem:[#allocation5 + $0x120c] ss:$16 sps:$4 sm:$0xff]  }
 0x259   :  { %5941 = vmatprep.mubr.bf16.mxu0 %v9438_v25  ;;  %6064 = vmatprep.mubr.bf16.mxu1 %v9438_v25 }
 0x25b   :  { %5912 = vmatpush1.bf16.msra.mxu0 %v8173_v17  ;;  %6035 = vmatpush1.bf16.msra.mxu1 %v8176_v19  ;;  %v9444_v17 = vrot.slane %v9432_v6, %v9426_v3  ;;  %v8263_v19 = vld [vmem:[#allocation5 + $0x1200] ss:$16 sps:$4 sm:$0xff]   ;;  %v8272_v6 = vld [vmem:[#allocation5 + $0x1228] ss:$16 sps:$4 sm:$0xff]  }
 0x25c   :  { %5913 = vmatprep.subr.bf16.mxu0 %v8181_v21  ;;  %6036 = vmatprep.subr.bf16.mxu1 %v8184_v8  ;;  %v8266_v21 = vld [vmem:[#allocation5 + $0x1208] ss:$16 sps:$4 sm:$0xff]   ;;  %v8271_v8 = vld [vmem:[#allocation5 + $0x1224] ss:$16 sps:$4 sm:$0xff]  }
 0x25f   :  { %5914 = vmatpush1.bf16.msra.mxu0 %v8179_v13  ;;  %6037 = vmatpush1.bf16.msra.mxu1 %v8182_v16  ;;  %v8274_v13 = vld [vmem:[#allocation5 + $0x122c] ss:$16 sps:$4 sm:$0xff]   ;;  %v4942_v16 = vcombine.high %v9438_v25, %v9438_v25  ;;  %v8283_v25 = vld [vmem:[#allocation5 + $0x1264] ss:$16 sps:$4 sm:$0xff]  }
 0x260   :  { %5915 = vmatprep.subr.bf16.mxu0 %v8187_v5  ;;  %6038 = vmatprep.subr.bf16.mxu1 %v8190_v43  ;;  %v8269_v5 = vld [vmem:[#allocation5 + $0x1220] ss:$16 sps:$4 sm:$0xff]   ;;  %v8277_v43 = vld [vmem:[#allocation5 + $0x1244] ss:$16 sps:$4 sm:$0xff]  }
 0x263   :  { %5916 = vmatpush1.bf16.msra.mxu0 %v8185_v26  ;;  %6039 = vmatpush1.bf16.msra.mxu1 %v8188_v49  ;;  %v8280_v26 = vld [vmem:[#allocation5 + $0x124c] ss:$16 sps:$4 sm:$0xff]   ;;  %v8275_v49 = vld [vmem:[#allocation5 + $0x1240] ss:$16 sps:$4 sm:$0xff]  }
 0x264   :  { %5917 = vmatprep.subr.bf16.mxu0 %v8193_v28  ;;  %6040 = vmatprep.subr.bf16.mxu1 %v8196_v12  ;;  %v8278_v28 = vld [vmem:[#allocation5 + $0x1248] ss:$16 sps:$4 sm:$0xff]   ;;  %v8286_v12 = vld [vmem:[#allocation5 + $0x126c] ss:$16 sps:$4 sm:$0xff]  }
 0x267   :  { %5918 = vmatpush1.bf16.msra.mxu0 %v8191_v18  ;;  %6041 = vmatpush1.bf16.msra.mxu1 %v8194_v63  ;;  %v8281_v18 = vld [vmem:[#allocation5 + $0x1260] ss:$16 sps:$4 sm:$0xff]   ;;  %v8284_v63 = vld [vmem:[#allocation5 + $0x1268] ss:$16 sps:$4 sm:$0xff]  }
 0x268   :  { %5919 = vmatprep.subr.bf16.mxu0 %v8199_v37  ;;  %6042 = vmatprep.subr.bf16.mxu1 %v8202_v15  ;;  %v8289_v37 = vld [vmem:[#allocation5 + $0x1284] ss:$16 sps:$4 sm:$0xff]   ;;  %v8292_v15 = vld [vmem:[#allocation5 + $0x128c] ss:$16 sps:$4 sm:$0xff]  }
 0x26b   :  { %5920 = vmatpush1.bf16.msra.mxu0 %v8197_v46  ;;  %6043 = vmatpush1.bf16.msra.mxu1 %v8200_v29  ;;  %v8287_v46 = vld [vmem:[#allocation5 + $0x1280] ss:$16 sps:$4 sm:$0xff]   ;;  %v8290_v29 = vld [vmem:[#allocation5 + $0x1288] ss:$16 sps:$4 sm:$0xff]  }
 0x26c   :  { %5921 = vmatprep.subr.bf16.mxu0 %v8205_v50  ;;  %6044 = vmatprep.subr.bf16.mxu1 %v8208_v59  ;;  %v8295_v50 = vld [vmem:[#allocation5 + $0x12a4] ss:$16 sps:$4 sm:$0xff]   ;;  %v8298_v59 = vld [vmem:[#allocation5 + $0x12ac] ss:$16 sps:$4 sm:$0xff]  }
 0x26f   :  { %5922 = vmatpush1.bf16.msra.mxu0 %v8203_v32  ;;  %6045 = vmatpush1.bf16.msra.mxu1 %v8206_v35  ;;  %v8293_v32 = vld [vmem:[#allocation5 + $0x12a0] ss:$16 sps:$4 sm:$0xff]   ;;  %v8296_v35 = vld [vmem:[#allocation5 + $0x12a8] ss:$16 sps:$4 sm:$0xff]  }
 0x270   :  { %5923 = vmatprep.subr.bf16.mxu0 %v8211_v58  ;;  %6046 = vmatprep.subr.bf16.mxu1 %v8214_v23  ;;  %v8301_v58 = vld [vmem:[#allocation5 + $0x12c4] ss:$16 sps:$4 sm:$0xff]   ;;  %v8304_v23 = vld [vmem:[#allocation5 + $0x12cc] ss:$16 sps:$4 sm:$0xff]  }
 0x273   :  { %5924 = vmatpush1.bf16.msra.mxu0 %v8209_v24  ;;  %6047 = vmatpush1.bf16.msra.mxu1 %v8212_v30  ;;  %v8299_v24 = vld [vmem:[#allocation5 + $0x12c0] ss:$16 sps:$4 sm:$0xff]   ;;  %v8302_v30 = vld [vmem:[#allocation5 + $0x12c8] ss:$16 sps:$4 sm:$0xff]  }
 0x274   :  { %5925 = vmatprep.subr.bf16.mxu0 %v8217_v31  ;;  %6048 = vmatprep.subr.bf16.mxu1 %v8220_v36  ;;  %v8307_v31 = vld [vmem:[#allocation5 + $0x12e4] ss:$16 sps:$4 sm:$0xff]   ;;  %v8310_v36 = vld [vmem:[#allocation5 + $0x12ec] ss:$16 sps:$4 sm:$0xff]  }
 0x277   :  { %5926 = vmatpush1.bf16.msra.mxu0 %v8215_v44  ;;  %6049 = vmatpush1.bf16.msra.mxu1 %v8218_v45  ;;  %v8305_v44 = vld [vmem:[#allocation5 + $0x12e0] ss:$16 sps:$4 sm:$0xff]   ;;  %v8308_v45 = vld [vmem:[#allocation5 + $0x12e8] ss:$16 sps:$4 sm:$0xff]  }
 0x278   :  { %5927 = vmatprep.subr.bf16.mxu0 %v8223_v33  ;;  %6050 = vmatprep.subr.bf16.mxu1 %v8226_v52  ;;  %v8313_v33 = vld [vmem:[#allocation5 + $0x1304] ss:$16 sps:$4 sm:$0xff]   ;;  %v8316_v52 = vld [vmem:[#allocation5 + $0x130c] ss:$16 sps:$4 sm:$0xff]  }
 0x27b   :  { %5928 = vmatpush1.bf16.msra.mxu0 %v8221_v34  ;;  %6051 = vmatpush1.bf16.msra.mxu1 %v8224_v57  ;;  %v8311_v34 = vld [vmem:[#allocation5 + $0x1300] ss:$16 sps:$4 sm:$0xff]   ;;  %v8314_v57 = vld [vmem:[#allocation5 + $0x1308] ss:$16 sps:$4 sm:$0xff]  }
 0x27c   :  { %5929 = vmatprep.subr.bf16.mxu0 %v8229_v48  ;;  %6052 = vmatprep.subr.bf16.mxu1 %v8232_v9  ;;  %v8319_v48 = vld [vmem:[#allocation5 + $0x1324] ss:$16 sps:$4 sm:$0xff]   ;;  %v8322_v9 = vld [vmem:[#allocation5 + $0x132c] ss:$16 sps:$4 sm:$0xff]  }
 0x27f   :  { %5930 = vmatpush1.bf16.msra.mxu0 %v8227_v51  ;;  %6053 = vmatpush1.bf16.msra.mxu1 %v8230_v10  ;;  %v8317_v51 = vld [vmem:[#allocation5 + $0x1320] ss:$16 sps:$4 sm:$0xff]   ;;  %v8320_v10 = vld [vmem:[#allocation5 + $0x1328] ss:$16 sps:$4 sm:$0xff]  }
 0x280   :  { %5931 = vmatprep.subr.bf16.mxu0 %v8235_v53  ;;  %6054 = vmatprep.subr.bf16.mxu1 %v8238_v38  ;;  %v8325_v53 = vld [vmem:[#allocation5 + $0x1344] ss:$16 sps:$4 sm:$0xff]   ;;  %v8328_v38 = vld [vmem:[#allocation5 + $0x134c] ss:$16 sps:$4 sm:$0xff]  }
 0x283   :  { %5932 = vmatpush1.bf16.msra.mxu0 %v8233_v41  ;;  %6055 = vmatpush1.bf16.msra.mxu1 %v8236_v54  ;;  %v8323_v41 = vld [vmem:[#allocation5 + $0x1340] ss:$16 sps:$4 sm:$0xff]   ;;  %v8326_v54 = vld [vmem:[#allocation5 + $0x1348] ss:$16 sps:$4 sm:$0xff]  }
 0x284   :  { %5933 = vmatprep.subr.bf16.mxu0 %v8241_v0  ;;  %6056 = vmatprep.subr.bf16.mxu1 %v8244_v60  ;;  %v8331_v0 = vld [vmem:[#allocation5 + $0x1364] ss:$16 sps:$4 sm:$0xff]   ;;  %v8334_v60 = vld [vmem:[#allocation5 + $0x136c] ss:$16 sps:$4 sm:$0xff]  }
 0x287   :  { %5934 = vmatpush1.bf16.msra.mxu0 %v8239_v61  ;;  %6057 = vmatpush1.bf16.msra.mxu1 %v8242_v27  ;;  %v8329_v61 = vld [vmem:[#allocation5 + $0x1360] ss:$16 sps:$4 sm:$0xff]   ;;  %v8332_v27 = vld [vmem:[#allocation5 + $0x1368] ss:$16 sps:$4 sm:$0xff]  }
 0x288   :  { %5935 = vmatprep.subr.bf16.mxu0 %v8247_v62  ;;  %6058 = vmatprep.subr.bf16.mxu1 %v8250_v1  ;;  %v8337_v62 = vld [vmem:[#allocation5 + $0x1384] ss:$16 sps:$4 sm:$0xff]   ;;  %v8340_v1 = vld [vmem:[#allocation5 + $0x138c] ss:$16 sps:$4 sm:$0xff]  }
 0x28b   :  { %5936 = vmatpush1.bf16.msra.mxu0 %v8245_v4  ;;  %6059 = vmatpush1.bf16.msra.mxu1 %v8248_v11  ;;  %v8335_v4 = vld [vmem:[#allocation5 + $0x1380] ss:$16 sps:$4 sm:$0xff]   ;;  %v8338_v11 = vld [vmem:[#allocation5 + $0x1388] ss:$16 sps:$4 sm:$0xff]  }
 0x28c   :  { %5937 = vmatprep.subr.bf16.mxu0 %v8253_v42  ;;  %6060 = vmatprep.subr.bf16.mxu1 %v8256_v14  ;;  %v8343_v42 = vld [vmem:[#allocation5 + $0x13a4] ss:$16 sps:$4 sm:$0xff]   ;;  %v8346_v14 = vld [vmem:[#allocation5 + $0x13ac] ss:$16 sps:$4 sm:$0xff]  }
 0x28f   :  { %5938 = vmatpush1.bf16.msra.mxu0 %v8251_v47  ;;  %6061 = vmatpush1.bf16.msra.mxu1 %v8254_v55  ;;  %v8341_v47 = vld [vmem:[#allocation5 + $0x13a0] ss:$16 sps:$4 sm:$0xff]   ;;  %v8344_v55 = vld [vmem:[#allocation5 + $0x13a8] ss:$16 sps:$4 sm:$0xff]  }
 0x290   :  { %5939 = vmatprep.subr.bf16.mxu0 %v8259_v22  ;;  %6062 = vmatprep.subr.bf16.mxu1 %v8262_v39  ;;  %v8349_v22 = vld [vmem:[#allocation5 + $0x13c4] ss:$16 sps:$4 sm:$0xff]   ;;  %v8352_v39 = vld [vmem:[#allocation5 + $0x13cc] ss:$16 sps:$4 sm:$0xff]  }
 0x293   :  { %5940 = vmatpush1.bf16.msra.mxu0 %v8257_v56  ;;  %6063 = vmatpush1.bf16.msra.mxu1 %v8260_v40  ;;  %v4896_v56 = vcombine.high %v9428_v2, %v9428_v2  ;;  %v8347_v40 = vld [vmem:[#allocation5 + $0x13c0] ss:$16 sps:$4 sm:$0xff]  }
 0x294   :  { %5950 = vmatprep.subr.bf16.mxu0 %v8265_v7  ;;  %6073 = vmatprep.subr.bf16.mxu1 %v8268_v20  ;;  %v8350_v7 = vld [vmem:[#allocation5 + $0x13c8] ss:$16 sps:$4 sm:$0xff]   ;;  %v8355_v20 = vld [vmem:[#allocation5 + $0x13e4] ss:$16 sps:$4 sm:$0xff]  }
 0x296   :  { %5942 = vmatmul.mubr.bf16.vlgmr.msra.gmra.mrb[0].mxu0 %v9444_v17  ;;  %6065 = vmatmul.mubr.bf16.vlgmr.msra.gmra.mrb[0].mxu1 %v9444_v17 }
 0x297   :  { %5951 = vmatpush1.bf16.msra.mxu0 %v8263_v19  ;;  %6074 = vmatpush1.bf16.msra.mxu1 %v8266_v21  ;;  %v8358_v19 = vld [vmem:[#allocation5 + $0x13ec] ss:$16 sps:$4 sm:$0xff]   ;;  %v9453_v21 = vrot.slane %v4896_v56, %v9426_v3  ;;  %v8439_v56 = vld [vmem:[#allocation5 + $0x15a4] ss:$16 sps:$4 sm:$0xff]  }
 0x298   :  { %5952 = vmatprep.subr.bf16.mxu0 %v8271_v8  ;;  %6075 = vmatprep.subr.bf16.mxu1 %v8274_v13  ;;  %v8353_v8 = vld [vmem:[#allocation5 + $0x13e0] ss:$16 sps:$4 sm:$0xff]   ;;  %v8356_v13 = vld [vmem:[#allocation5 + $0x13e8] ss:$16 sps:$4 sm:$0xff]  }
 0x299   :  { %5982 = vmatprep.mubr.bf16.mxu0 %v4942_v16  ;;  %6105 = vmatprep.mubr.bf16.mxu1 %v4942_v16  ;;  %v8361_v16 = vld [vmem:[#allocation5 + $0x1404] ss:$16 sps:$4 sm:$0xff]   ;;  %v4912_v2 = vcombine.high %v9453_v21, %v9453_v21 }
 0x29b   :  { %5953 = vmatpush1.bf16.msra.mxu0 %v8269_v5  ;;  %6076 = vmatpush1.bf16.msra.mxu1 %v8272_v6  ;;  %v8364_v5 = vld [vmem:[#allocation5 + $0x140c] ss:$16 sps:$4 sm:$0xff]   ;;  %v4941_v6 = vcombine.high %v9444_v17, %v9444_v17 }
 0x29c   :  { %5954 = vmatprep.subr.bf16.mxu0 %v8277_v43  ;;  %6077 = vmatprep.subr.bf16.mxu1 %v8280_v26  ;;  %v8359_v43 = vld [vmem:[#allocation5 + $0x1400] ss:$16 sps:$4 sm:$0xff]   ;;  %v8362_v26 = vld [vmem:[#allocation5 + $0x1408] ss:$16 sps:$4 sm:$0xff]   ;;  %v8376_v17 = vld [vmem:[#allocation5 + $0x144c] ss:$16 sps:$4 sm:$0xff]  }
 0x29f   :  { %5955 = vmatpush1.bf16.msra.mxu0 %v8275_v49  ;;  %6078 = vmatpush1.bf16.msra.mxu1 %v8278_v28  ;;  %v8367_v49 = vld [vmem:[#allocation5 + $0x1424] ss:$16 sps:$4 sm:$0xff]   ;;  %v8370_v28 = vld [vmem:[#allocation5 + $0x142c] ss:$16 sps:$4 sm:$0xff]  }
 0x2a0   :  { %5956 = vmatprep.subr.bf16.mxu0 %v8283_v25  ;;  %6079 = vmatprep.subr.bf16.mxu1 %v8286_v12  ;;  %v4940_v25 = vrot.slane %v4912_v2, %v9426_v3  ;;  %v8365_v12 = vld [vmem:[#allocation5 + $0x1420] ss:$16 sps:$4 sm:$0xff]   ;;  %v8454_v2 = vld [vmem:[#allocation5 + $0x15ec] ss:$16 sps:$4 sm:$0xff]  }
 0x2a3   :  { %5957 = vmatpush1.bf16.msra.mxu0 %v8281_v18  ;;  %6080 = vmatpush1.bf16.msra.mxu1 %v8284_v63  ;;  %v8368_v18 = vld [vmem:[#allocation5 + $0x1428] ss:$16 sps:$4 sm:$0xff]   ;;  %v8373_v63 = vld [vmem:[#allocation5 + $0x1444] ss:$16 sps:$4 sm:$0xff]  }
 0x2a4   :  { %5958 = vmatprep.subr.bf16.mxu0 %v8289_v37  ;;  %6081 = vmatprep.subr.bf16.mxu1 %v8292_v15  ;;  %v8371_v37 = vld [vmem:[#allocation5 + $0x1440] ss:$16 sps:$4 sm:$0xff]   ;;  %v8374_v15 = vld [vmem:[#allocation5 + $0x1448] ss:$16 sps:$4 sm:$0xff]  }
 0x2a7   :  { %5959 = vmatpush1.bf16.msra.mxu0 %v8287_v46  ;;  %6082 = vmatpush1.bf16.msra.mxu1 %v8290_v29  ;;  %v8379_v46 = vld [vmem:[#allocation5 + $0x1464] ss:$16 sps:$4 sm:$0xff]   ;;  %v8382_v29 = vld [vmem:[#allocation5 + $0x146c] ss:$16 sps:$4 sm:$0xff]  }
 0x2a8   :  { %5960 = vmatprep.subr.bf16.mxu0 %v8295_v50  ;;  %6083 = vmatprep.subr.bf16.mxu1 %v8298_v59  ;;  %v8377_v50 = vld [vmem:[#allocation5 + $0x1460] ss:$16 sps:$4 sm:$0xff]   ;;  %v8380_v59 = vld [vmem:[#allocation5 + $0x1468] ss:$16 sps:$4 sm:$0xff]  }
 0x2ab   :  { %5961 = vmatpush1.bf16.msra.mxu0 %v8293_v32  ;;  %6084 = vmatpush1.bf16.msra.mxu1 %v8296_v35  ;;  %v8385_v32 = vld [vmem:[#allocation5 + $0x1484] ss:$16 sps:$4 sm:$0xff]   ;;  %v8388_v35 = vld [vmem:[#allocation5 + $0x148c] ss:$16 sps:$4 sm:$0xff]  }
 0x2ac   :  { %5962 = vmatprep.subr.bf16.mxu0 %v8301_v58  ;;  %6085 = vmatprep.subr.bf16.mxu1 %v8304_v23  ;;  %v8383_v58 = vld [vmem:[#allocation5 + $0x1480] ss:$16 sps:$4 sm:$0xff]   ;;  %v8386_v23 = vld [vmem:[#allocation5 + $0x1488] ss:$16 sps:$4 sm:$0xff]  }
 0x2af   :  { %5963 = vmatpush1.bf16.msra.mxu0 %v8299_v24  ;;  %6086 = vmatpush1.bf16.msra.mxu1 %v8302_v30  ;;  %v8391_v24 = vld [vmem:[#allocation5 + $0x14a4] ss:$16 sps:$4 sm:$0xff]   ;;  %v8394_v30 = vld [vmem:[#allocation5 + $0x14ac] ss:$16 sps:$4 sm:$0xff]  }
 0x2b0   :  { %5964 = vmatprep.subr.bf16.mxu0 %v8307_v31  ;;  %6087 = vmatprep.subr.bf16.mxu1 %v8310_v36  ;;  %v8389_v31 = vld [vmem:[#allocation5 + $0x14a0] ss:$16 sps:$4 sm:$0xff]   ;;  %v8392_v36 = vld [vmem:[#allocation5 + $0x14a8] ss:$16 sps:$4 sm:$0xff]  }
 0x2b3   :  { %5965 = vmatpush1.bf16.msra.mxu0 %v8305_v44  ;;  %6088 = vmatpush1.bf16.msra.mxu1 %v8308_v45  ;;  %v8397_v44 = vld [vmem:[#allocation5 + $0x14c4] ss:$16 sps:$4 sm:$0xff]   ;;  %v8400_v45 = vld [vmem:[#allocation5 + $0x14cc] ss:$16 sps:$4 sm:$0xff]  }
 0x2b4   :  { %5966 = vmatprep.subr.bf16.mxu0 %v8313_v33  ;;  %6089 = vmatprep.subr.bf16.mxu1 %v8316_v52  ;;  %v8395_v33 = vld [vmem:[#allocation5 + $0x14c0] ss:$16 sps:$4 sm:$0xff]   ;;  %v8398_v52 = vld [vmem:[#allocation5 + $0x14c8] ss:$16 sps:$4 sm:$0xff]  }
 0x2b7   :  { %5967 = vmatpush1.bf16.msra.mxu0 %v8311_v34  ;;  %6090 = vmatpush1.bf16.msra.mxu1 %v8314_v57  ;;  %v8403_v34 = vld [vmem:[#allocation5 + $0x14e4] ss:$16 sps:$4 sm:$0xff]   ;;  %v8406_v57 = vld [vmem:[#allocation5 + $0x14ec] ss:$16 sps:$4 sm:$0xff]  }
 0x2b8   :  { %5968 = vmatprep.subr.bf16.mxu0 %v8319_v48  ;;  %6091 = vmatprep.subr.bf16.mxu1 %v8322_v9  ;;  %v8401_v48 = vld [vmem:[#allocation5 + $0x14e0] ss:$16 sps:$4 sm:$0xff]   ;;  %v8404_v9 = vld [vmem:[#allocation5 + $0x14e8] ss:$16 sps:$4 sm:$0xff]  }
 0x2bb   :  { %5969 = vmatpush1.bf16.msra.mxu0 %v8317_v51  ;;  %6092 = vmatpush1.bf16.msra.mxu1 %v8320_v10  ;;  %v8409_v51 = vld [vmem:[#allocation5 + $0x1504] ss:$16 sps:$4 sm:$0xff]   ;;  %v8412_v10 = vld [vmem:[#allocation5 + $0x150c] ss:$16 sps:$4 sm:$0xff]  }
 0x2bc   :  { %5970 = vmatprep.subr.bf16.mxu0 %v8325_v53  ;;  %6093 = vmatprep.subr.bf16.mxu1 %v8328_v38  ;;  %v8407_v53 = vld [vmem:[#allocation5 + $0x1500] ss:$16 sps:$4 sm:$0xff]   ;;  %v8410_v38 = vld [vmem:[#allocation5 + $0x1508] ss:$16 sps:$4 sm:$0xff]  }
 0x2bf   :  { %5971 = vmatpush1.bf16.msra.mxu0 %v8323_v41  ;;  %6094 = vmatpush1.bf16.msra.mxu1 %v8326_v54  ;;  %v8415_v41 = vld [vmem:[#allocation5 + $0x1524] ss:$16 sps:$4 sm:$0xff]   ;;  %v8418_v54 = vld [vmem:[#allocation5 + $0x152c] ss:$16 sps:$4 sm:$0xff]  }
 0x2c0   :  { %5972 = vmatprep.subr.bf16.mxu0 %v8331_v0  ;;  %6095 = vmatprep.subr.bf16.mxu1 %v8334_v60  ;;  %v8413_v0 = vld [vmem:[#allocation5 + $0x1520] ss:$16 sps:$4 sm:$0xff]   ;;  %v8416_v60 = vld [vmem:[#allocation5 + $0x1528] ss:$16 sps:$4 sm:$0xff]  }
 0x2c3   :  { %5973 = vmatpush1.bf16.msra.mxu0 %v8329_v61  ;;  %6096 = vmatpush1.bf16.msra.mxu1 %v8332_v27  ;;  %v8421_v61 = vld [vmem:[#allocation5 + $0x1544] ss:$16 sps:$4 sm:$0xff]   ;;  %v8424_v27 = vld [vmem:[#allocation5 + $0x154c] ss:$16 sps:$4 sm:$0xff]  }
 0x2c4   :  { %5974 = vmatprep.subr.bf16.mxu0 %v8337_v62  ;;  %6097 = vmatprep.subr.bf16.mxu1 %v8340_v1  ;;  %v8419_v62 = vld [vmem:[#allocation5 + $0x1540] ss:$16 sps:$4 sm:$0xff]   ;;  %v8422_v1 = vld [vmem:[#allocation5 + $0x1548] ss:$16 sps:$4 sm:$0xff]  }
 0x2c7   :  { %5975 = vmatpush1.bf16.msra.mxu0 %v8335_v4  ;;  %6098 = vmatpush1.bf16.msra.mxu1 %v8338_v11  ;;  %v8427_v4 = vld [vmem:[#allocation5 + $0x1564] ss:$16 sps:$4 sm:$0xff]   ;;  %v8430_v11 = vld [vmem:[#allocation5 + $0x156c] ss:$16 sps:$4 sm:$0xff]  }
 0x2c8   :  { %5976 = vmatprep.subr.bf16.mxu0 %v8343_v42  ;;  %6099 = vmatprep.subr.bf16.mxu1 %v8346_v14  ;;  %v8425_v42 = vld [vmem:[#allocation5 + $0x1560] ss:$16 sps:$4 sm:$0xff]   ;;  %v8428_v14 = vld [vmem:[#allocation5 + $0x1568] ss:$16 sps:$4 sm:$0xff]  }
 0x2cb   :  { %5977 = vmatpush1.bf16.msra.mxu0 %v8341_v47  ;;  %6100 = vmatpush1.bf16.msra.mxu1 %v8344_v55  ;;  %v8433_v47 = vld [vmem:[#allocation5 + $0x1584] ss:$16 sps:$4 sm:$0xff]   ;;  %v8436_v55 = vld [vmem:[#allocation5 + $0x158c] ss:$16 sps:$4 sm:$0xff]  }
 0x2cc   :  { %5978 = vmatprep.subr.bf16.mxu0 %v8349_v22  ;;  %6101 = vmatprep.subr.bf16.mxu1 %v8352_v39  ;;  %v8431_v22 = vld [vmem:[#allocation5 + $0x1580] ss:$16 sps:$4 sm:$0xff]   ;;  %v8434_v39 = vld [vmem:[#allocation5 + $0x1588] ss:$16 sps:$4 sm:$0xff]  }
 0x2cf   :  { %5979 = vmatpush1.bf16.msra.mxu0 %v8347_v40  ;;  %6102 = vmatpush1.bf16.msra.mxu1 %v8350_v7  ;;  %v8442_v40 = vld [vmem:[#allocation5 + $0x15ac] ss:$16 sps:$4 sm:$0xff]   ;;  %v8437_v7 = vld [vmem:[#allocation5 + $0x15a0] ss:$16 sps:$4 sm:$0xff]  }
 0x2d0   :  { %5980 = vmatprep.subr.bf16.mxu0 %v8355_v20  ;;  %6103 = vmatprep.subr.bf16.mxu1 %v8358_v19  ;;  %v8440_v20 = vld [vmem:[#allocation5 + $0x15a8] ss:$16 sps:$4 sm:$0xff]   ;;  %v8445_v19 = vld [vmem:[#allocation5 + $0x15c4] ss:$16 sps:$4 sm:$0xff]  }
 0x2d3   :  { %5981 = vmatpush1.bf16.msra.mxu0 %v8353_v8  ;;  %6104 = vmatpush1.bf16.msra.mxu1 %v8356_v13  ;;  %v8448_v8 = vld [vmem:[#allocation5 + $0x15cc] ss:$16 sps:$4 sm:$0xff]   ;;  %v8443_v13 = vld [vmem:[#allocation5 + $0x15c0] ss:$16 sps:$4 sm:$0xff]  }
 0x2d4   :  { %5991 = vmatprep.subr.bf16.mxu0 %v8361_v16  ;;  %6114 = vmatprep.subr.bf16.mxu1 %v8364_v5  ;;  %v8446_v16 = vld [vmem:[#allocation5 + $0x15c8] ss:$16 sps:$4 sm:$0xff]   ;;  %v8451_v5 = vld [vmem:[#allocation5 + $0x15e4] ss:$16 sps:$4 sm:$0xff]  }
 0x2d6   :  { %5983 = vmatmul.mubr.bf16.vlgmr.msra.gmra.mrb[0].mxu0 %v4941_v6  ;;  %6106 = vmatmul.mubr.bf16.vlgmr.msra.gmra.mrb[0].mxu1 %v4941_v6  ;;  %v8449_v6 = vld [vmem:[#allocation5 + $0x15e0] ss:$16 sps:$4 sm:$0xff]  }
 0x2d7   :  { %5992 = vmatpush1.bf16.msra.mxu0 %v8359_v43  ;;  %6115 = vmatpush1.bf16.msra.mxu1 %v8362_v26  ;;  %v8452_v43 = vld [vmem:[#allocation5 + $0x15e8] ss:$16 sps:$4 sm:$0xff]   ;;  %v8456_v26 = vld [vmem:[#allocation7 + $0x40] sm:$0xff]  }
 0x2d8   :  { %5993 = vmatprep.subr.bf16.mxu0 %v8367_v49  ;;  %6116 = vmatprep.subr.bf16.mxu1 %v8370_v28  ;;  %v8457_v49 = vld [vmem:[#allocation7 + $0xc0] sm:$0xff]   ;;  %v4926_v28 = vrot.slane %v9453_v21, %v9426_v3  ;;  %v8466_v3 = vld [vmem:[#allocation7 + $0x10] sm:$0xff]  }
 0x2d9   :  { %6023 = vmatprep.mubr.bf16.mxu0 %v4940_v25  ;;  %6146 = vmatprep.mubr.bf16.mxu1 %v4940_v25  ;;  %v8458_v25 = vld [vmem:[#allocation7] sm:$0xff]   ;;  %v8467_v21 = vld [vmem:[#allocation7 + $0x90] sm:$0xff]  }
 0x2db   :  { %5994 = vmatpush1.bf16.msra.mxu0 %v8365_v12  ;;  %6117 = vmatpush1.bf16.msra.mxu1 %v8368_v18  ;;  %v8459_v12 = vld [vmem:[#allocation7 + $0x80] sm:$0xff]   ;;  %v8460_v18 = vld [vmem:[#allocation7 + $0x48] sm:$0xff]  }
 0x2dc   :  { %5995 = vmatprep.subr.bf16.mxu0 %v8373_v63  ;;  %6118 = vmatprep.subr.bf16.mxu1 %v8376_v17  ;;  %v8461_v63 = vld [vmem:[#allocation7 + $0xc8] sm:$0xff]  }
 0x2dd   :  { %v8462_v17 = vld [vmem:[#allocation7 + $0x8] sm:$0xff]  }
 0x2df   :  { %5996 = vmatpush1.bf16.msra.mxu0 %v8371_v37  ;;  %6119 = vmatpush1.bf16.msra.mxu1 %v8374_v15  ;;  %v8463_v37 = vld [vmem:[#allocation7 + $0x88] sm:$0xff]   ;;  %v8464_v15 = vld [vmem:[#allocation7 + $0x50] sm:$0xff]  }
 0x2e0   :  { %5997 = vmatprep.subr.bf16.mxu0 %v8379_v46  ;;  %6120 = vmatprep.subr.bf16.mxu1 %v8382_v29  ;;  %v8465_v46 = vld [vmem:[#allocation7 + $0xd0] sm:$0xff]   ;;  %v8468_v29 = vld [vmem:[#allocation7 + $0x58] sm:$0xff]  }
 0x2e3   :  { %5998 = vmatpush1.bf16.msra.mxu0 %v8377_v50  ;;  %6121 = vmatpush1.bf16.msra.mxu1 %v8380_v59  ;;  %v8469_v50 = vld [vmem:[#allocation7 + $0xd8] sm:$0xff]  }
 0x2e4   :  { %5999 = vmatprep.subr.bf16.mxu0 %v8385_v32  ;;  %6122 = vmatprep.subr.bf16.mxu1 %v8388_v35  ;;  %v8470_v59 = vld [vmem:[#allocation7 + $0x18] sm:$0xff]   ;;  %v8472_v35 = vld [vmem:[#allocation7 + $0x60] sm:$0xff]  }
 0x2e5   :  { %v8471_v32 = vld [vmem:[#allocation7 + $0x98] sm:$0xff]  }
 0x2e7   :  { %6000 = vmatpush1.bf16.msra.mxu0 %v8383_v58  ;;  %6123 = vmatpush1.bf16.msra.mxu1 %v8386_v23  ;;  %v8473_v58 = vld [vmem:[#allocation7 + $0xe0] sm:$0xff]  }
 0x2e8   :  { %6001 = vmatprep.subr.bf16.mxu0 %v8391_v24  ;;  %6124 = vmatprep.subr.bf16.mxu1 %v8394_v30  ;;  %v8474_v23 = vld [vmem:[#allocation7 + $0x20] sm:$0xff]   ;;  %v8476_v30 = vld [vmem:[#allocation7 + $0x68] sm:$0xff]  }
 0x2e9   :  { %v8475_v24 = vld [vmem:[#allocation7 + $0xa0] sm:$0xff]  }
 0x2eb   :  { %6002 = vmatpush1.bf16.msra.mxu0 %v8389_v31  ;;  %6125 = vmatpush1.bf16.msra.mxu1 %v8392_v36  ;;  %v8477_v31 = vld [vmem:[#allocation7 + $0xe8] sm:$0xff]  }
 0x2ec   :  { %6003 = vmatprep.subr.bf16.mxu0 %v8397_v44  ;;  %6126 = vmatprep.subr.bf16.mxu1 %v8400_v45  ;;  %v8478_v36 = vld [vmem:[#allocation7 + $0x28] sm:$0xff]   ;;  %v8480_v45 = vld [vmem:[#allocation7 + $0x70] sm:$0xff]  }
 0x2ed   :  { %v8479_v44 = vld [vmem:[#allocation7 + $0xa8] sm:$0xff]  }
 0x2ef   :  { %6004 = vmatpush1.bf16.msra.mxu0 %v8395_v33  ;;  %6127 = vmatpush1.bf16.msra.mxu1 %v8398_v52  ;;  %v8481_v33 = vld [vmem:[#allocation7 + $0xf0] sm:$0xff]  }
 0x2f0   :  { %6005 = vmatprep.subr.bf16.mxu0 %v8403_v34  ;;  %6128 = vmatprep.subr.bf16.mxu1 %v8406_v57  ;;  %v8482_v52 = vld [vmem:[#allocation7 + $0x30] sm:$0xff]   ;;  %v8484_v57 = vld [vmem:[#allocation7 + $0x78] sm:$0xff]  }
 0x2f1   :  { %v8483_v34 = vld [vmem:[#allocation7 + $0xb0] sm:$0xff]  }
 0x2f3   :  { %6006 = vmatpush1.bf16.msra.mxu0 %v8401_v48  ;;  %6129 = vmatpush1.bf16.msra.mxu1 %v8404_v9  ;;  %v8485_v48 = vld [vmem:[#allocation7 + $0xf8] sm:$0xff]  }
 0x2f4   :  { %6007 = vmatprep.subr.bf16.mxu0 %v8409_v51  ;;  %6130 = vmatprep.subr.bf16.mxu1 %v8412_v10  ;;  %v8486_v9 = vld [vmem:[#allocation7 + $0x38] sm:$0xff]  }
 0x2f5   :  { %v8487_v51 = vld [vmem:[#allocation7 + $0xb8] sm:$0xff]  }
 0x2f7   :  { %6008 = vmatpush1.bf16.msra.mxu0 %v8407_v53  ;;  %6131 = vmatpush1.bf16.msra.mxu1 %v8410_v38 }
 0x2f8   :  { %6009 = vmatprep.subr.bf16.mxu0 %v8415_v41  ;;  %6132 = vmatprep.subr.bf16.mxu1 %v8418_v54 }
 0x2fb   :  { %6010 = vmatpush1.bf16.msra.mxu0 %v8413_v0  ;;  %6133 = vmatpush1.bf16.msra.mxu1 %v8416_v60 }
 0x2fc   :  { %6011 = vmatprep.subr.bf16.mxu0 %v8421_v61  ;;  %6134 = vmatprep.subr.bf16.mxu1 %v8424_v27 }
 0x2ff   :  { %6012 = vmatpush1.bf16.msra.mxu0 %v8419_v62  ;;  %6135 = vmatpush1.bf16.msra.mxu1 %v8422_v1 }
 0x300   :  { %6013 = vmatprep.subr.bf16.mxu0 %v8427_v4  ;;  %6136 = vmatprep.subr.bf16.mxu1 %v8430_v11 }
 0x303   :  { %6014 = vmatpush1.bf16.msra.mxu0 %v8425_v42  ;;  %6137 = vmatpush1.bf16.msra.mxu1 %v8428_v14 }
 0x304   :  { %6015 = vmatprep.subr.bf16.mxu0 %v8433_v47  ;;  %6138 = vmatprep.subr.bf16.mxu1 %v8436_v55 }
 0x307   :  { %6016 = vmatpush1.bf16.msra.mxu0 %v8431_v22  ;;  %6139 = vmatpush1.bf16.msra.mxu1 %v8434_v39  ;;  %v7232_v39 = vld [vmem:[#allocation8] ss:$0 sm:$0xff] }
 0x308   :  { %6017 = vmatprep.subr.bf16.mxu0 %v8439_v56  ;;  %6140 = vmatprep.subr.bf16.mxu1 %v8442_v40 }
 0x30b   :  { %6018 = vmatpush1.bf16.msra.mxu0 %v8437_v7  ;;  %6141 = vmatpush1.bf16.msra.mxu1 %v8440_v20 }
 0x30c   :  { %6019 = vmatprep.subr.bf16.mxu0 %v8445_v19  ;;  %6142 = vmatprep.subr.bf16.mxu1 %v8448_v8 }
 0x30f   :  { %6020 = vmatpush1.bf16.msra.mxu0 %v8443_v13  ;;  %6143 = vmatpush1.bf16.msra.mxu1 %v8446_v16 }
 0x310   :  { %6021 = vmatprep.subr.bf16.mxu0 %v8451_v5  ;;  %6144 = vmatprep.subr.bf16.mxu1 %v8454_v2 }
 0x313   :  { %6022 = vmatpush1.bf16.msra.mxu0 %v8449_v6  ;;  %6145 = vmatpush1.bf16.msra.mxu1 %v8452_v43 }
 0x314   :  { %7265 = vmatprep.subr.bf16.mxu0 %v8456_v26  ;;  %7287 = vmatprep.subr.bf16.mxu1 %v8457_v49 }
 0x316   :  { %6024 = vmatmul.mubr.bf16.vlgmr.msra.gmra.mrb[0].mxu0 %v4926_v28  ;;  %6147 = vmatmul.mubr.bf16.vlgmr.msra.gmra.mrb[0].mxu1 %v4926_v28 }
 0x317   :  { %7266 = vmatpush3.bf16.msra.mxu0 %v8458_v25  ;;  %7288 = vmatpush3.bf16.msra.mxu1 %v8459_v12 }
 0x318   :  { %7267 = vmatprep.subr.bf16.mxu0 %v8460_v18  ;;  %7289 = vmatprep.subr.bf16.mxu1 %v8461_v63 }
 0x31b   :  { %7268 = vmatpush3.bf16.msra.mxu0 %v8462_v17  ;;  %7290 = vmatpush3.bf16.msra.mxu1 %v8463_v37 }
 0x31c   :  { %7269 = vmatprep.subr.bf16.mxu0 %v8464_v15  ;;  %7291 = vmatprep.subr.bf16.mxu1 %v8465_v46 }
 0x31f   :  { %7270 = vmatpush3.bf16.msra.mxu0 %v8466_v3  ;;  %7292 = vmatpush3.bf16.msra.mxu1 %v8467_v21 }
 0x320   :  { %7271 = vmatprep.subr.bf16.mxu0 %v8468_v29  ;;  %7293 = vmatprep.subr.bf16.mxu1 %v8469_v50 }
 0x323   :  { %7272 = vmatpush3.bf16.msra.mxu0 %v8470_v59  ;;  %7294 = vmatpush3.bf16.msra.mxu1 %v8471_v32 }
 0x324   :  { %7273 = vmatprep.subr.bf16.mxu0 %v8472_v35  ;;  %7295 = vmatprep.subr.bf16.mxu1 %v8473_v58 }
 0x327   :  { %7274 = vmatpush3.bf16.msra.mxu0 %v8474_v23  ;;  %7296 = vmatpush3.bf16.msra.mxu1 %v8475_v24 }
 0x328   :  { %7275 = vmatprep.subr.bf16.mxu0 %v8476_v30  ;;  %7297 = vmatprep.subr.bf16.mxu1 %v8477_v31 }
 0x32b   :  { %7276 = vmatpush3.bf16.msra.mxu0 %v8478_v36  ;;  %7298 = vmatpush3.bf16.msra.mxu1 %v8479_v44 }
 0x32c   :  { %7277 = vmatprep.subr.bf16.mxu0 %v8480_v45  ;;  %7299 = vmatprep.subr.bf16.mxu1 %v8481_v33 }
 0x32f   :  { %7278 = vmatpush3.bf16.msra.mxu0 %v8482_v52  ;;  %7300 = vmatpush3.bf16.msra.mxu1 %v8483_v34 }
 0x330   :  { %7279 = vmatprep.subr.bf16.mxu0 %v8484_v57  ;;  %7301 = vmatprep.subr.bf16.mxu1 %v8485_v48 }
 0x333   :  { %7280 = vmatpush3.bf16.msra.mxu0 %v8486_v9  ;;  %7302 = vmatpush3.bf16.msra.mxu1 %v8487_v51 }
 0x3e9   :  { %v6025_v10 = vpop.f32.mrb[0].mxu0  ;;  %v6148_v53 = vpop.f32.mrb[0].mxu1 }
 0x3ea   :  { %8488 = vtanh.f32 %v6025_v10  ;;  %v6027_v38 = vpop.f32.mrb[1].mxu0  ;;  %v6150_v41 = vpop.f32.mrb[1].mxu1 }
 0x3eb   :  { %8490 = vtanh.f32 %v6148_v53  ;;  %v6029_v54 = vpop.f32.mrb[2].mxu0  ;;  %v6152_v0 = vpop.f32.mrb[2].mxu1 }
 0x3ec   :  { %8492 = vtanh.f32 %v6027_v38  ;;  %v6030_v60 = vpop.f32.mrb[3].mxu0  ;;  %v6153_v61 = vpop.f32.mrb[3].mxu1 }
 0x3ed   :  { %8494 = vtanh.f32 %v6150_v41 }
 0x3f4   :  { %v8489_v27 = vpop.eup %8488 }
 0x3f5   :  { %v8491_v62 = vpop.eup %8490  ;;  %v6163_v42 = vpack.c.bf16 %v8489_v27, %v8489_v27 }
 0x3f6   :  { %v8493_v1 = vpop.eup %8492  ;;  %v6165_v47 = vpack.c.bf16 %v8491_v62, %v8491_v62 }
 0x3f7   :  { %v8495_v4 = vpop.eup %8494  ;;  %v6164_v11 = vpack.c.bf16 %v8493_v1, %v8493_v1 }
 0x3f8   :  { %v6166_v14 = vpack.c.bf16 %v8495_v4, %v8495_v4 }
 0x3f9   :  { %6462 = vmatprep.mubr.bf16.mxu0 %v6164_v11 }
 0x3fa   :  { %6502 = vmatprep.mubr.bf16.mxu1 %v6166_v14  ;;  %6463 = vmatmul.mubr.bf16.vlgmr.msra.gmra.mrb[4].mxu0 %v6163_v42 }
 0x3fb   :  { %6503 = vmatmul.mubr.bf16.vlgmr.msra.gmra.mrb[4].mxu1 %v6165_v47 }
 0x4cd   :  { %v7281_v55 = vpop.f32.mrb[4].mxu0 }
 0x4ce   :  { %v7303_v22 = vpop.f32.mrb[4].mxu1  ;;  %v7282_v56 = vpop.f32.mrb[5].mxu0 }
 0x4cf   :  { %v7283_v40 = vadd.f32 %v7282_v56, %v7281_v55  ;;  %v7304_v7 = vpop.f32.mrb[5].mxu1  ;;  %v7284_v20 = vpop.f32.mrb[6].mxu0 }
 0x4d0   :  { %v7305_v19 = vadd.f32 %v7304_v7, %v7303_v22  ;;  %v7306_v8 = vpop.f32.mrb[6].mxu1  ;;  %v7285_v13 = vpop.f32.mrb[7].mxu0 }
 0x4d1   :  { %v6465_v16 = vadd.f32 %v7283_v40, %v7232_v39  ;;  %v7307_v5 = vpop.f32.mrb[7].mxu1 }
 0x4d3   :  { %v6505_v2 = vadd.f32 %v7305_v19, %v6465_v16 }
 0x4d5   :  { %6510 = vst [vmem:[#allocation10] sm:$0x3] %v6505_v2 }
 0x4d6   :  { %8595 = shalt.err (!%p8592_p8)
}
 0x4d7   :  { %s8596_s1 = scalar_lea.hbm %s9480_s6, 32 }
 0x4d8   :  { %p8597_p9 = scmp.ne.s32.totalorder %s9480_s6, %s8596_s1  ;;  %p8600_p10 = scmp.lt.u32.totalorder %s8596_s1, %s9480_s6 }
 0x4da   :  { %p8602_p11 = pnand %p8600_p10, %p8597_p9 }
 0x4dc   :  { %8605 = shalt.err (!%p8602_p11)
}
 0x4dd   :  { %6520 = dma.vmem_to_hbm [thread:$0]  %s6518_s21, 32, %s9480_s6, [#allocation4]  }
 0x4de   :  { %8612 = dma.done.wait [#allocation4], 32  }
 0x4df   :  { %8613 = vsyncadd [#allocation4], 4294967264 }
 0x4e0   :  { %6524 = vsyncpa [#allocation3], 1 }
 0x4e1   :  { %6525 = vsyncpa [#allocation6], 1 }
 0x4e2   :  { %6526 = vsyncpa [#allocation9], 1 }
 0x4e3   :  { %6527 = vsyncpa [#allocation4], 1 }

</bundles_post_ra>
